<compile_context>
chip_gen: v5e
topology: v5e:2x2
jax: 0.10.0
libtpu: 0.0.40
codegen_flags: <defaults>
</compile_context>

<pallas_src>
import numpy as np
import jax
import jax.numpy as jnp
from jax import lax
from jax.experimental import pallas as pl
from jax.experimental.pallas import tpu as pltpu


def _build_schedule(nb, num_cores):
    """Flattened per-core lists of (i, j, k) block triples.

    Upper/diagonal output blocks (i <= j): contributing reduction blocks are
    k in [i, j].  Below-diagonal blocks (j < i): one zero-fill step encoded as
    k == i (> j, so it never accumulates).  Whole block-rows are assigned to
    cores greedily by row cost so the two TensorCores stay balanced; shorter
    lists are padded with no-op steps (k == nb sentinel).
    """
    rows = []
    for i in range(nb):
        contrib = (nb - i) * (nb - i + 1) // 2
        rows.append((contrib + i, i))            # + i zero-fill steps

    core_rows = [[] for _ in range(num_cores)]
    core_cost = [0] * num_cores
    for cost, i in sorted(rows, reverse=True):
        c = min(range(num_cores), key=lambda x: core_cost[x])
        core_cost[c] += cost
        core_rows[c].append(i)

    core_steps = []
    for c in range(num_cores):
        steps = []
        for i in sorted(core_rows[c]):
            for j in range(i):                   # below-diagonal: zero-fill only
                steps.append((i, j, i))
            for j in range(i, nb):               # contributing blocks
                for k in range(i, j + 1):
                    steps.append((i, j, k))
        core_steps.append(steps)

    steps_per_core = max(len(s) for s in core_steps)
    ii = np.zeros((num_cores, steps_per_core), np.int32)
    jj = np.zeros_like(ii)
    kk = np.zeros_like(ii)
    for c, steps in enumerate(core_steps):
        li, lj, _ = steps[-1]
        while len(steps) < steps_per_core:       # no-op padding steps
            steps.append((li, lj, nb))
        arr = np.asarray(steps, np.int32)
        ii[c], jj[c], kk[c] = arr[:, 0], arr[:, 1], arr[:, 2]
    return ii.reshape(-1), jj.reshape(-1), kk.reshape(-1), steps_per_core


def _make_kernel(steps_per_core):
    def kernel(ii_ref, jj_ref, kk_ref, a_ref, b_ref, o_ref):
        t = pl.program_id(0) * steps_per_core + pl.program_id(1)
        i = ii_ref[t]
        j = jj_ref[t]
        k = kk_ref[t]

        # First step of every output block (k == i): zero the resident f32
        # accumulator.  Below-diagonal blocks (j < i) only ever see this step.
        # Padding steps use k == nb, so they skip everything below.
        @pl.when(k == i)
        def _():
            o_ref[...] = jnp.zeros_like(o_ref)

        contrib = k <= j        # real contributing step (k >= i by construction)
        diag_a = k == i         # A tile (i, k) straddles the diagonal
        diag_b = k == j         # B tile (k, j) straddles the diagonal

        def _triu(shape):
            return (lax.broadcasted_iota(jnp.int32, shape, 1)
                    >= lax.broadcasted_iota(jnp.int32, shape, 0))

        @pl.when(contrib & diag_a & diag_b)                       # k == i == j
        def _():
            m = _triu(a_ref.shape)
            a = jnp.where(m, a_ref[...], 0.0)
            b = jnp.where(m, b_ref[...], 0.0)
            o_ref[...] += jnp.dot(a, b, preferred_element_type=jnp.float32)

        @pl.when(contrib & diag_a & jnp.logical_not(diag_b))      # k == i < j
        def _():
            a = jnp.where(_triu(a_ref.shape), a_ref[...], 0.0)
            o_ref[...] += jnp.dot(a, b_ref[...],
                                  preferred_element_type=jnp.float32)

        @pl.when(contrib & jnp.logical_not(diag_a) & diag_b)      # i < k == j
        def _():
            b = jnp.where(_triu(b_ref.shape), b_ref[...], 0.0)
            o_ref[...] += jnp.dot(a_ref[...], b,
                                  preferred_element_type=jnp.float32)

        @pl.when(contrib & jnp.logical_not(diag_a) & jnp.logical_not(diag_b))
        def _():                                                  # i < k < j
            o_ref[...] += jnp.dot(a_ref[...], b_ref[...],
                                  preferred_element_type=jnp.float32)

    return kernel


def upper_triangular_matmul(A, B, *, bt=None):
    """C = triu(A) @ triu(B), returned as an (N, N) float32 matrix."""
    N = A.shape[0]
    assert A.shape == (N, N) and B.shape == (N, N)
    A = A.astype(jnp.float32)
    B = B.astype(jnp.float32)

    if bt is None:
        bt = 512 if N >= 2048 else (256 if N >= 256 else 128)
    Np = -(-N // bt) * bt
    nb = Np // bt
    if nb > 1 and bt % 128 != 0:
        raise ValueError("tile size must be a multiple of 128 when tiling")
    if Np != N:
        pad = Np - N
        A = jnp.pad(A, ((0, pad), (0, pad)))
        B = jnp.pad(B, ((0, pad), (0, pad)))

    num_cores = 2 if nb >= 2 else 1
    ii_np, jj_np, kk_np, steps_per_core = _build_schedule(nb, num_cores)
    ii = jnp.asarray(ii_np)
    jj = jnp.asarray(jj_np)
    kk = jnp.asarray(kk_np)

    nb_last = nb - 1

    def a_map(c, s, ii_ref, jj_ref, kk_ref):
        t = c * steps_per_core + s
        return (ii_ref[t], jnp.minimum(kk_ref[t], nb_last))

    def b_map(c, s, ii_ref, jj_ref, kk_ref):
        t = c * steps_per_core + s
        return (jnp.minimum(kk_ref[t], nb_last), jj_ref[t])

    def o_map(c, s, ii_ref, jj_ref, kk_ref):
        t = c * steps_per_core + s
        return (ii_ref[t], jj_ref[t])

    n_contrib = nb * (nb + 1) * (nb + 2) // 6
    cost = pl.CostEstimate(
        flops=2 * n_contrib * bt * bt * bt,
        transcendentals=0,
        bytes_accessed=n_contrib * 2 * bt * bt * 4 + Np * Np * 4,
    )

    C = pl.pallas_call(
        _make_kernel(steps_per_core),
        out_shape=jax.ShapeDtypeStruct((Np, Np), jnp.float32),
        grid_spec=pltpu.PrefetchScalarGridSpec(
            num_scalar_prefetch=3,
            grid=(num_cores, steps_per_core),
            in_specs=[
                pl.BlockSpec((bt, bt), a_map),
                pl.BlockSpec((bt, bt), b_map),
            ],
            out_specs=pl.BlockSpec((bt, bt), o_map),
        ),
        compiler_params=pltpu.CompilerParams(
            dimension_semantics=("parallel", "arbitrary"),
        ),
        cost_estimate=cost,
    )(ii, jj, kk, A, B)

    if Np != N:
        C = C[:N, :N]
    return C


if __name__ == "__main__":
    key = jax.random.PRNGKey(0)
    k1, k2, k3, k4 = jax.random.split(key, 4)

    def reference(A, B):
        return jnp.dot(jnp.triu(A), jnp.triu(B), precision=lax.Precision.HIGHEST)

    ok = True

    # Single-block case (nb == 1): both masks on the one diagonal tile.
    N = 256
    A = jax.random.normal(k1, (N, N), jnp.float32)
    B = jax.random.normal(k2, (N, N), jnp.float32)
    C = jax.block_until_ready(upper_triangular_matmul(A, B))
    ok &= bool(jnp.allclose(C, reference(A, B), atol=2e-3, rtol=2e-3))

    # Multi-block case (nb == 4): interior tiles, mask-A-only / mask-B-only
    # branches, below-diagonal zero-fill blocks, 2-way core split + padding.
    N = 512
    A = jax.random.normal(k3, (N, N), jnp.float32)
    B = jax.random.normal(k4, (N, N), jnp.float32)
    C = jax.block_until_ready(upper_triangular_matmul(A, B, bt=128))
    ok &= bool(jnp.allclose(C, reference(A, B), atol=2e-3, rtol=2e-3))

    # N not divisible by the tile: exercises the zero-padding path.
    N = 200
    A2, B2 = A[:N, :N], B[:N, :N]
    C2 = jax.block_until_ready(upper_triangular_matmul(A2, B2))
    ok &= bool(jnp.allclose(C2, reference(A2, B2), atol=2e-3, rtol=2e-3))

    assert ok
    print("KERNEL_OK")
</pallas_src>

<mosaic_0001>
module attributes {stable_mosaic.version = 11 : i64} {
  func.func @kernel(%arg0: i32, %arg1: i32, %arg2: memref<1xi32, #tpu.memory_space<smem>>, %arg3: memref<1xi32, #tpu.memory_space<smem>>, %arg4: memref<1xi32, #tpu.memory_space<smem>>, %arg5: memref<256x256xf32, #tpu.memory_space<vmem>>, %arg6: memref<256x256xf32, #tpu.memory_space<vmem>>, %arg7: memref<256x256xf32, #tpu.memory_space<vmem>>) attributes {dimension_semantics = [#tpu.dimension_semantics<parallel>, #tpu.dimension_semantics<arbitrary>], iteration_bounds = array<i64: 1, 1>, scalar_prefetch = 3 : i64, scratch_operands = 0 : i64, tpu.core_type = #tpu.core_type<tc>, window_params = [{transform_indices = @transform_0, window_bounds = array<i64: 256, 256>}, {transform_indices = @transform_1, window_bounds = array<i64: 256, 256>}, {transform_indices = @transform_2, window_bounds = array<i64: 256, 256>}]} {
    %c1_i32 = arith.constant 1 : i32
    %0 = arith.muli %arg0, %c1_i32 : i32
    %1 = arith.addi %0, %arg1 : i32
    %2 = arith.index_cast %1 : i32 to index
    %3 = memref.load %arg2[%2] : memref<1xi32, #tpu.memory_space<smem>>
    %4 = arith.index_cast %1 : i32 to index
    %5 = memref.load %arg3[%4] : memref<1xi32, #tpu.memory_space<smem>>
    %6 = arith.index_cast %1 : i32 to index
    %7 = memref.load %arg4[%6] : memref<1xi32, #tpu.memory_space<smem>>
    %8 = arith.cmpi eq, %7, %3 : i32
    %9 = arith.extui %8 : i1 to i32
    %c0_i32 = arith.constant 0 : i32
    %10 = arith.cmpi ne, %9, %c0_i32 : i32
    scf.if %10 {
      %cst = arith.constant 0.000000e+00 : f32
      %34 = vector.broadcast %cst : f32 to vector<256x256xf32>
      %c0 = arith.constant 0 : index
      %c0_7 = arith.constant 0 : index
      %35 = vector.load %arg7[%c0, %c0_7] : memref<256x256xf32, #tpu.memory_space<vmem>>, vector<256x256xf32>
      tpu.vector_store %arg7[%c0, %c0_7], %34 {strides = array<i32>} : memref<256x256xf32, #tpu.memory_space<vmem>>, vector<256x256xf32>,
    } else {
    }
    %11 = arith.cmpi sle, %7, %5 : i32
    %12 = arith.cmpi eq, %7, %3 : i32
    %13 = arith.cmpi eq, %7, %5 : i32
    %14 = arith.andi %11, %12 : i1
    %15 = arith.andi %14, %13 : i1
    %16 = arith.extui %15 : i1 to i32
    %c0_i32_0 = arith.constant 0 : i32
    %17 = arith.cmpi ne, %16, %c0_i32_0 : i32
    scf.if %17 {
      %34 = tpu.iota {dimensions = array<i32: 1>} : vector<256x256xi32>
      %35 = tpu.iota {dimensions = array<i32: 0>} : vector<256x256xi32>
      %36 = arith.cmpi sge, %34, %35 : vector<256x256xi32>
      %c0 = arith.constant 0 : index
      %c0_7 = arith.constant 0 : index
      %37 = vector.load %arg5[%c0, %c0_7] : memref<256x256xf32, #tpu.memory_space<vmem>>, vector<256x256xf32>
      %cst = arith.constant 0.000000e+00 : f32
      %38 = vector.broadcast %cst : f32 to vector<256x256xf32>
      %39 = arith.select %36, %37, %38 : vector<256x256xi1>, vector<256x256xf32>
      %c0_8 = arith.constant 0 : index
      %c0_9 = arith.constant 0 : index
      %40 = vector.load %arg6[%c0_8, %c0_9] : memref<256x256xf32, #tpu.memory_space<vmem>>, vector<256x256xf32>
      %cst_10 = arith.constant 0.000000e+00 : f32
      %41 = vector.broadcast %cst_10 : f32 to vector<256x256xf32>
      %42 = arith.select %36, %40, %41 : vector<256x256xi1>, vector<256x256xf32>
      %c0_11 = arith.constant 0 : index
      %c0_12 = arith.constant 0 : index
      %43 = vector.load %arg7[%c0_11, %c0_12] : memref<256x256xf32, #tpu.memory_space<vmem>>, vector<256x256xf32>
      %cst_13 = arith.constant dense<0.000000e+00> : vector<256x256xf32>
      %44 = tpu.matmul %39, %42, %cst_13 {dimension_numbers = #tpu.dot_dimension_numbers<[1], [0], [0], [1], [0, 0, 1, 1], [], []>} : vector<256x256xf32>, vector<256x256xf32>, vector<256x256xf32> -> vector<256x256xf32>
      %45 = arith.addf %43, %44 : vector<256x256xf32>
      %c0_14 = arith.constant 0 : index
      %c0_15 = arith.constant 0 : index
      %46 = vector.load %arg7[%c0_14, %c0_15] : memref<256x256xf32, #tpu.memory_space<vmem>>, vector<256x256xf32>
      tpu.vector_store %arg7[%c0_14, %c0_15], %45 {strides = array<i32>} : memref<256x256xf32, #tpu.memory_space<vmem>>, vector<256x256xf32>,
    } else {
    }
    %18 = arith.andi %11, %12 : i1
    %true = arith.constant true
    %19 = arith.xori %13, %true : i1
    %20 = arith.andi %18, %19 : i1
    %21 = arith.extui %20 : i1 to i32
    %c0_i32_1 = arith.constant 0 : i32
    %22 = arith.cmpi ne, %21, %c0_i32_1 : i32
    scf.if %22 {
      %34 = tpu.iota {dimensions = array<i32: 1>} : vector<256x256xi32>
      %35 = tpu.iota {dimensions = array<i32: 0>} : vector<256x256xi32>
      %36 = arith.cmpi sge, %34, %35 : vector<256x256xi32>
      %c0 = arith.constant 0 : index
      %c0_7 = arith.constant 0 : index
      %37 = vector.load %arg5[%c0, %c0_7] : memref<256x256xf32, #tpu.memory_space<vmem>>, vector<256x256xf32>
      %cst = arith.constant 0.000000e+00 : f32
      %38 = vector.broadcast %cst : f32 to vector<256x256xf32>
      %39 = arith.select %36, %37, %38 : vector<256x256xi1>, vector<256x256xf32>
      %c0_8 = arith.constant 0 : index
      %c0_9 = arith.constant 0 : index
      %40 = vector.load %arg7[%c0_8, %c0_9] : memref<256x256xf32, #tpu.memory_space<vmem>>, vector<256x256xf32>
      %c0_10 = arith.constant 0 : index
      %c0_11 = arith.constant 0 : index
      %41 = vector.load %arg6[%c0_10, %c0_11] : memref<256x256xf32, #tpu.memory_space<vmem>>, vector<256x256xf32>
      %cst_12 = arith.constant dense<0.000000e+00> : vector<256x256xf32>
      %42 = tpu.matmul %39, %41, %cst_12 {dimension_numbers = #tpu.dot_dimension_numbers<[1], [0], [0], [1], [0, 0, 1, 1], [], []>} : vector<256x256xf32>, vector<256x256xf32>, vector<256x256xf32> -> vector<256x256xf32>
      %43 = arith.addf %40, %42 : vector<256x256xf32>
      %c0_13 = arith.constant 0 : index
      %c0_14 = arith.constant 0 : index
      %44 = vector.load %arg7[%c0_13, %c0_14] : memref<256x256xf32, #tpu.memory_space<vmem>>, vector<256x256xf32>
      tpu.vector_store %arg7[%c0_13, %c0_14], %43 {strides = array<i32>} : memref<256x256xf32, #tpu.memory_space<vmem>>, vector<256x256xf32>,
    } else {
    }
    %true_2 = arith.constant true
    %23 = arith.xori %12, %true_2 : i1
    %24 = arith.andi %11, %23 : i1
    %25 = arith.andi %24, %13 : i1
    %26 = arith.extui %25 : i1 to i32
    %c0_i32_3 = arith.constant 0 : i32
    %27 = arith.cmpi ne, %26, %c0_i32_3 : i32
    scf.if %27 {
      %34 = tpu.iota {dimensions = array<i32: 1>} : vector<256x256xi32>
      %35 = tpu.iota {dimensions = array<i32: 0>} : vector<256x256xi32>
      %36 = arith.cmpi sge, %34, %35 : vector<256x256xi32>
      %c0 = arith.constant 0 : index
      %c0_7 = arith.constant 0 : index
      %37 = vector.load %arg6[%c0, %c0_7] : memref<256x256xf32, #tpu.memory_space<vmem>>, vector<256x256xf32>
      %cst = arith.constant 0.000000e+00 : f32
      %38 = vector.broadcast %cst : f32 to vector<256x256xf32>
      %39 = arith.select %36, %37, %38 : vector<256x256xi1>, vector<256x256xf32>
      %c0_8 = arith.constant 0 : index
      %c0_9 = arith.constant 0 : index
      %40 = vector.load %arg7[%c0_8, %c0_9] : memref<256x256xf32, #tpu.memory_space<vmem>>, vector<256x256xf32>
      %c0_10 = arith.constant 0 : index
      %c0_11 = arith.constant 0 : index
      %41 = vector.load %arg5[%c0_10, %c0_11] : memref<256x256xf32, #tpu.memory_space<vmem>>, vector<256x256xf32>
      %cst_12 = arith.constant dense<0.000000e+00> : vector<256x256xf32>
      %42 = tpu.matmul %41, %39, %cst_12 {dimension_numbers = #tpu.dot_dimension_numbers<[1], [0], [0], [1], [0, 0, 1, 1], [], []>} : vector<256x256xf32>, vector<256x256xf32>, vector<256x256xf32> -> vector<256x256xf32>
      %43 = arith.addf %40, %42 : vector<256x256xf32>
      %c0_13 = arith.constant 0 : index
      %c0_14 = arith.constant 0 : index
      %44 = vector.load %arg7[%c0_13, %c0_14] : memref<256x256xf32, #tpu.memory_space<vmem>>, vector<256x256xf32>
      tpu.vector_store %arg7[%c0_13, %c0_14], %43 {strides = array<i32>} : memref<256x256xf32, #tpu.memory_space<vmem>>, vector<256x256xf32>,
    } else {
    }
    %true_4 = arith.constant true
    %28 = arith.xori %12, %true_4 : i1
    %29 = arith.andi %11, %28 : i1
    %true_5 = arith.constant true
    %30 = arith.xori %13, %true_5 : i1
    %31 = arith.andi %29, %30 : i1
    %32 = arith.extui %31 : i1 to i32
    %c0_i32_6 = arith.constant 0 : i32
    %33 = arith.cmpi ne, %32, %c0_i32_6 : i32
    scf.if %33 {
      %c0 = arith.constant 0 : index
      %c0_7 = arith.constant 0 : index
      %34 = vector.load %arg7[%c0, %c0_7] : memref<256x256xf32, #tpu.memory_space<vmem>>, vector<256x256xf32>
      %c0_8 = arith.constant 0 : index
      %c0_9 = arith.constant 0 : index
      %35 = vector.load %arg5[%c0_8, %c0_9] : memref<256x256xf32, #tpu.memory_space<vmem>>, vector<256x256xf32>
      %c0_10 = arith.constant 0 : index
      %c0_11 = arith.constant 0 : index
      %36 = vector.load %arg6[%c0_10, %c0_11] : memref<256x256xf32, #tpu.memory_space<vmem>>, vector<256x256xf32>
      %cst = arith.constant dense<0.000000e+00> : vector<256x256xf32>
      %37 = tpu.matmul %35, %36, %cst {dimension_numbers = #tpu.dot_dimension_numbers<[1], [0], [0], [1], [0, 0, 1, 1], [], []>} : vector<256x256xf32>, vector<256x256xf32>, vector<256x256xf32> -> vector<256x256xf32>
      %38 = arith.addf %34, %37 : vector<256x256xf32>
      %c0_12 = arith.constant 0 : index
      %c0_13 = arith.constant 0 : index
      %39 = vector.load %arg7[%c0_12, %c0_13] : memref<256x256xf32, #tpu.memory_space<vmem>>, vector<256x256xf32>
      tpu.vector_store %arg7[%c0_12, %c0_13], %38 {strides = array<i32>} : memref<256x256xf32, #tpu.memory_space<vmem>>, vector<256x256xf32>,
    } else {
    }
    return
  }
  func.func @transform_0(%arg0: i32, %arg1: i32, %arg2: memref<1xi32, #tpu.memory_space<smem>>, %arg3: memref<1xi32, #tpu.memory_space<smem>>, %arg4: memref<1xi32, #tpu.memory_space<smem>>) -> (i32, i32) {
    %c1_i32 = arith.constant 1 : i32
    %0 = arith.muli %arg0, %c1_i32 : i32
    %1 = arith.addi %0, %arg1 : i32
    %2 = arith.index_cast %1 : i32 to index
    %3 = memref.load %arg2[%2] : memref<1xi32, #tpu.memory_space<smem>>
    %4 = arith.index_cast %1 : i32 to index
    %5 = memref.load %arg4[%4] : memref<1xi32, #tpu.memory_space<smem>>
    %c0_i32 = arith.constant 0 : i32
    %6 = arith.minsi %5, %c0_i32 : i32
    %c0_i32_0 = arith.constant 0 : i32
    return %3, %6 : i32, i32
  }
  func.func @transform_1(%arg0: i32, %arg1: i32, %arg2: memref<1xi32, #tpu.memory_space<smem>>, %arg3: memref<1xi32, #tpu.memory_space<smem>>, %arg4: memref<1xi32, #tpu.memory_space<smem>>) -> (i32, i32) {
    %c1_i32 = arith.constant 1 : i32
    %0 = arith.muli %arg0, %c1_i32 : i32
    %1 = arith.addi %0, %arg1 : i32
    %2 = arith.index_cast %1 : i32 to index
    %3 = memref.load %arg4[%2] : memref<1xi32, #tpu.memory_space<smem>>
    %c0_i32 = arith.constant 0 : i32
    %4 = arith.minsi %3, %c0_i32 : i32
    %5 = arith.index_cast %1 : i32 to index
    %6 = memref.load %arg3[%5] : memref<1xi32, #tpu.memory_space<smem>>
    %c0_i32_0 = arith.constant 0 : i32
    return %4, %6 : i32, i32
  }
  func.func @transform_2(%arg0: i32, %arg1: i32, %arg2: memref<1xi32, #tpu.memory_space<smem>>, %arg3: memref<1xi32, #tpu.memory_space<smem>>, %arg4: memref<1xi32, #tpu.memory_space<smem>>) -> (i32, i32) {
    %c1_i32 = arith.constant 1 : i32
    %0 = arith.muli %arg0, %c1_i32 : i32
    %1 = arith.addi %0, %arg1 : i32
    %2 = arith.index_cast %1 : i32 to index
    %3 = memref.load %arg2[%2] : memref<1xi32, #tpu.memory_space<smem>>
    %4 = arith.index_cast %1 : i32 to index
    %5 = memref.load %arg3[%4] : memref<1xi32, #tpu.memory_space<smem>>
    %c0_i32 = arith.constant 0 : i32
    return %3, %5 : i32, i32
  }
}

</mosaic_0001>

<bundles_post_ra>
// kernel: tpu_custom_call.1
= control target key start
LH: loop header
LB: loop body
LE: loop exit
PB: predicated region body
PF: predicated region fallthrough
CT: control target
= control target key end

     0   :  { %s5169_s0 = inlined_call_operand.<no memory space> [shape: s32[1], index: 0, kind: input, shape index: {}]   ;;  %s5170_s1 = inlined_call_operand.<no memory space> [shape: s32[1], index: 1, kind: input, shape index: {}]   ;;  %s5171_s2 = inlined_call_operand.<no memory space> [shape: s32[1], index: 2, kind: input, shape index: {}]   ;;  %s5172_s3 = inlined_call_operand.hbm [shape: f32[256,256], index: 3, kind: input, shape index: {}]   ;;  %s5173_s4 = inlined_call_operand.hbm [shape: f32[256,256], index: 4, kind: input, shape index: {}]   ;;  %s5174_s5 = inlined_call_operand.hbm [shape: f32[256,256], index: 5, kind: output, shape index: {}]  }
   0x1   :  { %10 = sst [smem:[#allocation3]] %s5169_s0 }
   0x2   :  { %11 = sst [smem:[#allocation4]] %s5170_s1 }
   0x3   :  { %13 = vsyncpa [#allocation7], 0 }
   0x4   :  { %14 = vsyncpa [#allocation10], 0 }
   0x5   :  { %15 = vsyncpa [#allocation8], 0  ;;  %s19_s22 = sld [smem:[#allocation3]]  ;;  %p21_p0 = scmp.lt.s32.totalorder %s5171_s2, 0 }
   0x6   :  { %s4170_s28 = smov [#allocation6]   ;;  %s46_s1 = sld [smem:[#allocation4]] }
   0x7   :  { %s4221_s27 = scalar_select %p21_p0, %s5171_s2, 0 }
   0x8   :  { %s4224_s29 = sshll.u32 %s4170_s28, 4  ;;  %s4171_s13 = smov [#allocation9]   ;;  %s34_s29 = int_to_ptr.vmem [resolvable:$true] %s4224_s29 }
   0x9   :  { %s3876_s0 = sshll.u32 %s4221_s27, 1  ;;  %s4081_s11 = sshll.u32 %s4221_s27, 6 }
   0xa   :  { %s4231_s14 = sshll.u32 %s4171_s13, 4  ;;  %s4096_s20 = scalar_lea.hbm %s5172_s3, 512  ;;  %s58_s14 = int_to_ptr.vmem [resolvable:$true] %s4231_s14 }
   0xb   :  { %s4080_s30 = sshll.u32 %s19_s22, 6 }
   0xc   :  { %s28_s6 = sadd.s32 %s4080_s30, %s3876_s0  ;;  %s3880_s15 = sshll.u32 %s46_s1, 1 }
   0xd   :  { %s3878_s7 = sshll.u32 %s28_s6, 3 }
   0xe   :  { %s30_s10 = scalar_lea.hbm %s5172_s3, %s3878_s7 }
   0xf   :  { %s31_s12 = sshll.u32 %s30_s10, 4  ;;  %s32_s12 = int_to_ptr.hbm [resolvable:$true] %s31_s12 }
  0x10   :  { %s4092_s16 = sshra.s32 %s32_s12, 4  ;;  %s4093_s16 = int_to_ptr.hbm [resolvable:$true] %s4092_s16 }
  0x11   :  { %s4094_s17 = scalar_lea.hbm %s4093_s16, 512  ;;  %p4097_p2 = scmp.lt.s32.totalorder %s4093_s16, %s5172_s3 }
  0x12   :  { %p4095_p1 = scmp.ne.s32.totalorder %s4093_s16, %s4094_s17  ;;  %p4098_p3 = scmp.lt.s32.totalorder %s4096_s20, %s4094_s17 }
  0x14   :  { %p4099_p4 = por %p4098_p3, %p4097_p2 }
  0x16   :  { %p4100_p5 = pnand %p4099_p4, %p4095_p1 }
  0x18   :  { %4103 = shalt.err (!%p4100_p5)
}
  0x19   :  { %s4172_s23 = smov 256   ;;  %s4173_s24 = smov 16  }
  0x1a   :  { %39 = dma.hbm_to_vmem [thread:$0]  %s32_s12, 8192, %s34_s29, [#allocation7], %s4172_s23, %s4172_s23, %s4173_s24  }
  0x1b   :  { %s52_s25 = sadd.s32 %s4081_s11, %s3880_s15  ;;  %s4120_s8 = scalar_lea.hbm %s5173_s4, 512 }
  0x1c   :  { %s3882_s26 = sshll.u32 %s52_s25, 3 }
  0x1d   :  { %s54_s28 = scalar_lea.hbm %s5173_s4, %s3882_s26 }
  0x1e   :  { %s55_s1 = sshll.u32 %s54_s28, 4  ;;  %s56_s1 = int_to_ptr.hbm [resolvable:$true] %s55_s1 }
  0x1f   :  { %s4116_s3 = sshra.s32 %s56_s1, 4  ;;  %s4117_s3 = int_to_ptr.hbm [resolvable:$true] %s4116_s3 }
  0x20   :  { %s4118_s30 = scalar_lea.hbm %s4117_s3, 512  ;;  %p4121_p7 = scmp.lt.s32.totalorder %s4117_s3, %s5173_s4 }
  0x21   :  { %p4119_p6 = scmp.ne.s32.totalorder %s4117_s3, %s4118_s30  ;;  %p4122_p8 = scmp.lt.s32.totalorder %s4120_s8, %s4118_s30 }
  0x23   :  { %p4123_p9 = por %p4122_p8, %p4121_p7 }
  0x25   :  { %p4124_p10 = pnand %p4123_p9, %p4119_p6 }
  0x27   :  { %4127 = shalt.err (!%p4124_p10)
}
  0x28   :  { %63 = dma.hbm_to_vmem [thread:$0]  %s56_s1, 8192, %s58_s14, [#allocation10], %s4172_s23, %s4172_s23, %s4173_s24  }
  0x29   :  { %4164 = dma.done.wait [#allocation7], 8192  }
  0x2a   :  { %4165 = vsyncadd [#allocation7], 4294959104 }
  0x2b   :  { %4166 = dma.done.wait [#allocation10], 8192  }
  0x2c   :  { %4167 = vsyncadd [#allocation10], 4294959104  ;;  %s4255_s29 = sld [smem:[#allocation3]] }
  0x2d   :  { %s4257_s11 = sld [smem:[#allocation4]] }
  0x32   :  { %p95_p11 = scmp.eq.s32.totalorder %s5171_s2, %s4255_s29  ;;  %p3883_p12 = scmp.ne.s32.totalorder %s5171_s2, %s4255_s29 }
  0x34   :  { %98 = sbr.rel (%p3883_p12) target bundleno = 122 (0x7a), region = 21 }
  0x39   :  { %v4174_v0 = vmov 0.0  }
  0x3a   :  { %99 = vst [vmem:[#allocation11] sm:$0xff] %v4174_v0 }
  0x3b   :  { %100 = vst [vmem:[#allocation11 + $0x8] sm:$0xff] %v4174_v0 }
  0x3c   :  { %101 = vst [vmem:[#allocation11 + $0x10] sm:$0xff] %v4174_v0 }
  0x3d   :  { %102 = vst [vmem:[#allocation11 + $0x18] sm:$0xff] %v4174_v0 }
  0x3e   :  { %103 = vst [vmem:[#allocation11 + $0x20] sm:$0xff] %v4174_v0 }
  0x3f   :  { %104 = vst [vmem:[#allocation11 + $0x28] sm:$0xff] %v4174_v0 }
  0x40   :  { %105 = vst [vmem:[#allocation11 + $0x30] sm:$0xff] %v4174_v0 }
  0x41   :  { %106 = vst [vmem:[#allocation11 + $0x38] sm:$0xff] %v4174_v0 }
  0x42   :  { %107 = vst [vmem:[#allocation11 + $0x40] sm:$0xff] %v4174_v0 }
  0x43   :  { %108 = vst [vmem:[#allocation11 + $0x48] sm:$0xff] %v4174_v0 }
  0x44   :  { %109 = vst [vmem:[#allocation11 + $0x50] sm:$0xff] %v4174_v0 }
  0x45   :  { %110 = vst [vmem:[#allocation11 + $0x58] sm:$0xff] %v4174_v0 }
  0x46   :  { %111 = vst [vmem:[#allocation11 + $0x60] sm:$0xff] %v4174_v0 }
  0x47   :  { %112 = vst [vmem:[#allocation11 + $0x68] sm:$0xff] %v4174_v0 }
  0x48   :  { %113 = vst [vmem:[#allocation11 + $0x70] sm:$0xff] %v4174_v0 }
  0x49   :  { %114 = vst [vmem:[#allocation11 + $0x78] sm:$0xff] %v4174_v0 }
  0x4a   :  { %115 = vst [vmem:[#allocation11 + $0x80] sm:$0xff] %v4174_v0 }
  0x4b   :  { %116 = vst [vmem:[#allocation11 + $0x88] sm:$0xff] %v4174_v0 }
  0x4c   :  { %117 = vst [vmem:[#allocation11 + $0x90] sm:$0xff] %v4174_v0 }
  0x4d   :  { %118 = vst [vmem:[#allocation11 + $0x98] sm:$0xff] %v4174_v0 }
  0x4e   :  { %119 = vst [vmem:[#allocation11 + $0xa0] sm:$0xff] %v4174_v0 }
  0x4f   :  { %120 = vst [vmem:[#allocation11 + $0xa8] sm:$0xff] %v4174_v0 }
  0x50   :  { %121 = vst [vmem:[#allocation11 + $0xb0] sm:$0xff] %v4174_v0 }
  0x51   :  { %122 = vst [vmem:[#allocation11 + $0xb8] sm:$0xff] %v4174_v0 }
  0x52   :  { %123 = vst [vmem:[#allocation11 + $0xc0] sm:$0xff] %v4174_v0 }
  0x53   :  { %124 = vst [vmem:[#allocation11 + $0xc8] sm:$0xff] %v4174_v0 }
  0x54   :  { %125 = vst [vmem:[#allocation11 + $0xd0] sm:$0xff] %v4174_v0 }
  0x55   :  { %126 = vst [vmem:[#allocation11 + $0xd8] sm:$0xff] %v4174_v0 }
  0x56   :  { %127 = vst [vmem:[#allocation11 + $0xe0] sm:$0xff] %v4174_v0 }
  0x57   :  { %128 = vst [vmem:[#allocation11 + $0xe8] sm:$0xff] %v4174_v0 }
  0x58   :  { %129 = vst [vmem:[#allocation11 + $0xf0] sm:$0xff] %v4174_v0 }
  0x59   :  { %130 = vst [vmem:[#allocation11 + $0xf8] sm:$0xff] %v4174_v0 }
  0x5a   :  { %131 = vst [vmem:[#allocation11 + $0x100] sm:$0xff] %v4174_v0 }
  0x5b   :  { %132 = vst [vmem:[#allocation11 + $0x108] sm:$0xff] %v4174_v0 }
  0x5c   :  { %133 = vst [vmem:[#allocation11 + $0x110] sm:$0xff] %v4174_v0 }
  0x5d   :  { %134 = vst [vmem:[#allocation11 + $0x118] sm:$0xff] %v4174_v0 }
  0x5e   :  { %135 = vst [vmem:[#allocation11 + $0x120] sm:$0xff] %v4174_v0 }
  0x5f   :  { %136 = vst [vmem:[#allocation11 + $0x128] sm:$0xff] %v4174_v0 }
  0x60   :  { %137 = vst [vmem:[#allocation11 + $0x130] sm:$0xff] %v4174_v0 }
  0x61   :  { %138 = vst [vmem:[#allocation11 + $0x138] sm:$0xff] %v4174_v0 }
  0x62   :  { %139 = vst [vmem:[#allocation11 + $0x140] sm:$0xff] %v4174_v0 }
  0x63   :  { %140 = vst [vmem:[#allocation11 + $0x148] sm:$0xff] %v4174_v0 }
  0x64   :  { %141 = vst [vmem:[#allocation11 + $0x150] sm:$0xff] %v4174_v0 }
  0x65   :  { %142 = vst [vmem:[#allocation11 + $0x158] sm:$0xff] %v4174_v0 }
  0x66   :  { %143 = vst [vmem:[#allocation11 + $0x160] sm:$0xff] %v4174_v0 }
  0x67   :  { %144 = vst [vmem:[#allocation11 + $0x168] sm:$0xff] %v4174_v0 }
  0x68   :  { %145 = vst [vmem:[#allocation11 + $0x170] sm:$0xff] %v4174_v0 }
  0x69   :  { %146 = vst [vmem:[#allocation11 + $0x178] sm:$0xff] %v4174_v0 }
  0x6a   :  { %147 = vst [vmem:[#allocation11 + $0x180] sm:$0xff] %v4174_v0 }
  0x6b   :  { %148 = vst [vmem:[#allocation11 + $0x188] sm:$0xff] %v4174_v0 }
  0x6c   :  { %149 = vst [vmem:[#allocation11 + $0x190] sm:$0xff] %v4174_v0 }
  0x6d   :  { %150 = vst [vmem:[#allocation11 + $0x198] sm:$0xff] %v4174_v0 }
  0x6e   :  { %151 = vst [vmem:[#allocation11 + $0x1a0] sm:$0xff] %v4174_v0 }
  0x6f   :  { %152 = vst [vmem:[#allocation11 + $0x1a8] sm:$0xff] %v4174_v0 }
  0x70   :  { %153 = vst [vmem:[#allocation11 + $0x1b0] sm:$0xff] %v4174_v0 }
  0x71   :  { %154 = vst [vmem:[#allocation11 + $0x1b8] sm:$0xff] %v4174_v0 }
  0x72   :  { %155 = vst [vmem:[#allocation11 + $0x1c0] sm:$0xff] %v4174_v0 }
  0x73   :  { %156 = vst [vmem:[#allocation11 + $0x1c8] sm:$0xff] %v4174_v0 }
  0x74   :  { %157 = vst [vmem:[#allocation11 + $0x1d0] sm:$0xff] %v4174_v0 }
  0x75   :  { %158 = vst [vmem:[#allocation11 + $0x1d8] sm:$0xff] %v4174_v0 }
  0x76   :  { %159 = vst [vmem:[#allocation11 + $0x1e0] sm:$0xff] %v4174_v0 }
  0x77   :  { %160 = vst [vmem:[#allocation11 + $0x1e8] sm:$0xff] %v4174_v0 }
  0x78   :  { %161 = vst [vmem:[#allocation11 + $0x1f0] sm:$0xff] %v4174_v0 }
  0x79   :  { %162 = vst [vmem:[#allocation11 + $0x1f8] sm:$0xff] %v4174_v0 }
  0x7a PF:  { %p163_p13 = scmp.le.s32.totalorder %s5171_s2, %s4257_s11  ;;  %p164_p0 = scmp.eq.s32.totalorder %s5171_s2, %s4257_s11 }
  0x7c   :  { %p4354_p1 = pnand %p163_p13, %p95_p11 }
  0x7e   :  { %p166_p2 = pneg %p4354_p1 }
  0x80   :  { %p167_p3 = pnand %p166_p2, %p164_p0 }
  0x82   :  { %170 = sbr.rel (%p167_p3) target bundleno = 558 (0x22e), region = 25 }
  0x87   :  { %v430_v1 = vld [vmem:[#allocation9 + $0xf8] sm:$0xff]  ;;  %v171_v2 = vlaneseq  ;;  %v428_v3 = vld [vmem:[#allocation9 + $0xe8] sm:$0xff]  ;;  %v429_v14 = vld [vmem:[#allocation9 + $0xf0] sm:$0xff]  ;;  %v4175_v55 = vmov 0.0  }
  0x88   :  { %817 = vmatpush.msra.mxu2 %v430_v1  ;;  %v426_v6 = vld [vmem:[#allocation9 + $0xd8] sm:$0xff]  ;;  %v424_v12 = vld [vmem:[#allocation9 + $0xc8] sm:$0xff]  ;;  %v427_v20 = vld [vmem:[#allocation9 + $0xe0] sm:$0xff]  ;;  %719 = vmatpush.msra.mxu1 %v4175_v55 }
  0x89   :  { %v4368_v4 = vand.u32 127, %v171_v2  ;;  %v4370_v5 = vshrl.u32 %v171_v2, 7  ;;  %v462_v9 = vld [vmem:[#allocation9 + $0x1f8] sm:$0xff]  ;;  %v460_v16 = vld [vmem:[#allocation9 + $0x1e8] sm:$0xff]  ;;  %v425_v25 = vld [vmem:[#allocation9 + $0xd0] sm:$0xff] }
  0x8a   :  { %818 = vmatpush.msra.mxu2 %v428_v3  ;;  %v422_v18 = vld [vmem:[#allocation9 + $0xb8] sm:$0xff]  ;;  %v420_v23 = vld [vmem:[#allocation9 + $0xa8] sm:$0xff]  ;;  %v423_v30 = vld [vmem:[#allocation9 + $0xc0] sm:$0xff] }
  0x8b   :  { %v4373_v7 = vadd.s32 128, %v4368_v4  ;;  %v4376_v8 = vadd.s32 248, %v4370_v5  ;;  %v4379_v10 = vadd.s32 240, %v4370_v5  ;;  %v4382_v11 = vadd.s32 232, %v4370_v5  ;;  %v458_v21 = vld [vmem:[#allocation9 + $0x1d8] sm:$0xff]  ;;  %v456_v27 = vld [vmem:[#allocation9 + $0x1c8] sm:$0xff] }
  0x8c   :  { %819 = vmatpush.msra.mxu2 %v426_v6  ;;  %v4385_v13 = vadd.s32 120, %v4370_v5  ;;  %v4388_v15 = vadd.s32 112, %v4370_v5  ;;  %v4395_v17 = vadd.s32 224, %v4370_v5  ;;  %v4398_v19 = vadd.s32 104, %v4370_v5  ;;  %v418_v29 = vld [vmem:[#allocation9 + $0x98] sm:$0xff]  ;;  %v416_v34 = vld [vmem:[#allocation9 + $0x88] sm:$0xff] }
  0x8d   :  { %vm5175_vm0 = vcmp.ge.s32.totalorder %v4373_v7, %v4376_v8  ;;  %vm5176_vm1 = vcmp.ge.s32.totalorder %v4373_v7, %v4379_v10  ;;  %vm5177_vm4 = vcmp.ge.s32.totalorder %v4373_v7, %v4382_v11  ;;  %v4413_v22 = vadd.s32 216, %v4370_v5  ;;  %v454_v32 = vld [vmem:[#allocation9 + $0x1b8] sm:$0xff]  ;;  %v421_v35 = vld [vmem:[#allocation9 + $0xb0] sm:$0xff]  ;;  %v452_v37 = vld [vmem:[#allocation9 + $0x1a8] sm:$0xff] }
  0x8e   :  { %3948 = vmatpush.msk.msra.mxu3 %vm5175_vm0, %v462_v9  ;;  %vm5186_vm2 = vcmp.ge.s32.totalorder %v4368_v4, %v4385_v13  ;;  %820 = vmatpush.msra.mxu2 %v424_v12  ;;  %vm5188_vm3 = vcmp.ge.s32.totalorder %v4368_v4, %v4388_v15  ;;  %v4416_v24 = vadd.s32 96, %v4370_v5  ;;  %vm5190_vm5 = vcmp.ge.s32.totalorder %v4368_v4, %v4398_v19  ;;  %v414_v39 = vld [vmem:[#allocation9 + $0x78] sm:$0xff]  ;;  %v419_v40 = vld [vmem:[#allocation9 + $0xa0] sm:$0xff]  ;;  %v412_v44 = vld [vmem:[#allocation9 + $0x68] sm:$0xff] }
  0x8f   :  { %3884 = vmatpush.msk.msra.mxu0 %vm5186_vm2, %v429_v14  ;;  %v4424_v26 = vadd.s32 88, %v4370_v5  ;;  %vm5178_vm6 = vcmp.ge.s32.totalorder %v4373_v7, %v4395_v17  ;;  %v4432_v28 = vadd.s32 208, %v4370_v5  ;;  %v4440_v31 = vadd.s32 80, %v4370_v5  ;;  %v450_v42 = vld [vmem:[#allocation9 + $0x198] sm:$0xff]  ;;  %v417_v45 = vld [vmem:[#allocation9 + $0x90] sm:$0xff]  ;;  %v448_v47 = vld [vmem:[#allocation9 + $0x188] sm:$0xff] }
  0x90   :  { %3949 = vmatpush.msk.msra.mxu3 %vm5176_vm1, %v460_v16  ;;  %821 = vmatpush.msra.mxu2 %v422_v18  ;;  %vm231_vm7 = vcmp.ge.s32.totalorder %v4368_v4, %v4416_v24  ;;  %vm5179_vm8 = vcmp.ge.s32.totalorder %v4373_v7, %v4413_v22  ;;  %v4448_v33 = vadd.s32 200, %v4370_v5  ;;  %v4456_v36 = vadd.s32 72, %v4370_v5  ;;  %v410_v49 = vld [vmem:[#allocation9 + $0x58] sm:$0xff]  ;;  %v415_v50 = vld [vmem:[#allocation9 + $0x80] sm:$0xff]  ;;  %v408_v54 = vld [vmem:[#allocation9 + $0x48] sm:$0xff] }
  0x91   :  { %3885 = vmatpush.msk.msra.mxu0 %vm5188_vm3, %v427_v20  ;;  %vm229_vm9 = vcmp.ge.s32.totalorder %v4368_v4, %v4424_v26  ;;  %vm5180_vm10 = vcmp.ge.s32.totalorder %v4373_v7, %v4432_v28  ;;  %v4464_v38 = vadd.s32 192, %v4370_v5  ;;  %vm227_vm11 = vcmp.ge.s32.totalorder %v4368_v4, %v4440_v31  ;;  %v446_v52 = vld [vmem:[#allocation9 + $0x178] sm:$0xff]  ;;  %v413_v56 = vld [vmem:[#allocation9 + $0x70] sm:$0xff]  ;;  %v4523_v58 = vld [vmem:[#allocation6 + $0x8] sm:$0xff] }
  0x92   :  { %3950 = vmatpush.msk.msra.mxu3 %vm5177_vm4, %v458_v21  ;;  %822 = vmatpush.msra.mxu2 %v420_v23  ;;  %v4472_v41 = vadd.s32 64, %v4370_v5  ;;  %vm5181_vm12 = vcmp.ge.s32.totalorder %v4373_v7, %v4448_v33  ;;  %v4480_v43 = vadd.s32 184, %v4370_v5  ;;  %vm225_vm13 = vcmp.ge.s32.totalorder %v4368_v4, %v4456_v36  ;;  %v444_v59 = vld [vmem:[#allocation9 + $0x168] sm:$0xff]  ;;  %v406_v61 = vld [vmem:[#allocation9 + $0x38] sm:$0xff]  ;;  %v411_v62 = vld [vmem:[#allocation9 + $0x60] sm:$0xff] }
  0x93   :  { %3886 = vmatpush.msk.msra.mxu0 %vm5190_vm5, %v425_v25  ;;  %v4488_v46 = vadd.s32 56, %v4370_v5  ;;  %vm5182_vm14 = vcmp.ge.s32.totalorder %v4373_v7, %v4464_v38  ;;  %v4496_v48 = vadd.s32 176, %v4370_v5  ;;  %v4504_v51 = vadd.s32 48, %v4370_v5  ;;  %720 = vmatmul.f32.vlgmr.msra.gmra.mxu1 %v4523_v58  ;;  %v442_v0 = vld [vmem:[#allocation9 + $0x158] sm:$0xff]  ;;  %v404_v2 = vld [vmem:[#allocation9 + $0x28] sm:$0xff]  ;;  %v409_v3 = vld [vmem:[#allocation9 + $0x50] sm:$0xff] }
  0x94   :  { %3951 = vmatpush.msk.msra.mxu3 %vm5178_vm6, %v456_v27  ;;  %823 = vmatpush.msra.mxu2 %v418_v29  ;;  %vm223_vm15 = vcmp.ge.s32.totalorder %v4368_v4, %v4472_v41  ;;  %vm5183_vm0 = vcmp.ge.s32.totalorder %v4373_v7, %v4480_v43  ;;  %v4512_v53 = vadd.s32 168, %v4370_v5  ;;  %v4521_v57 = vadd.s32 40, %v4370_v5  ;;  %v440_v9 = vld [vmem:[#allocation9 + $0x148] sm:$0xff]  ;;  %v402_v14 = vld [vmem:[#allocation9 + $0x18] sm:$0xff]  ;;  %v407_v16 = vld [vmem:[#allocation9 + $0x40] sm:$0xff] }
  0x95   :  { %3887 = vmatpush.msk.msra.mxu0 %vm231_vm7, %v423_v30  ;;  %vm221_vm1 = vcmp.ge.s32.totalorder %v4368_v4, %v4488_v46  ;;  %vm5184_vm4 = vcmp.ge.s32.totalorder %v4373_v7, %v4496_v48  ;;  %v4531_v60 = vadd.s32 160, %v4370_v5  ;;  %vm219_vm6 = vcmp.ge.s32.totalorder %v4368_v4, %v4504_v51  ;;  %v438_v20 = vld [vmem:[#allocation9 + $0x138] sm:$0xff]  ;;  %v400_v23 = vld [vmem:[#allocation9 + $0x8] sm:$0xff]  ;;  %v405_v25 = vld [vmem:[#allocation9 + $0x30] sm:$0xff] }
  0x96   :  { %3952 = vmatpush.msk.msra.mxu3 %vm5179_vm8, %v454_v32  ;;  %824 = vmatpush.msra.mxu2 %v416_v34  ;;  %v4540_v63 = vadd.s32 32, %v4370_v5  ;;  %vm5185_vm8 = vcmp.ge.s32.totalorder %v4373_v7, %v4512_v53  ;;  %v4548_v1 = vadd.s32 152, %v4370_v5  ;;  %v4556_v6 = vadd.s32 24, %v4370_v5  ;;  %v271_v27 = vld [vmem:[#allocation6] sm:$0xff]  ;;  %v274_v30 = vld [vmem:[#allocation6 + $0x18] sm:$0xff]  ;;  %v436_v32 = vld [vmem:[#allocation9 + $0x128] sm:$0xff] }
  0x97   :  { %3888 = vmatpush.msk.msra.mxu0 %vm229_vm9, %v421_v35  ;;  %v4564_v12 = vadd.s32 144, %v4370_v5  ;;  %v177_v18 = vadd.s32 16, %v4370_v5  ;;  %v4578_v21 = vadd.s32 136, %v4370_v5  ;;  %v176_v29 = vadd.s32 8, %v4370_v5  ;;  %v403_v35 = vld [vmem:[#allocation9 + $0x20] sm:$0xff]  ;;  %v292_v51 = vld [vmem:[#allocation6 + $0xa8] sm:$0xff] }
  0x98   :  { %3953 = vmatpush.msk.msra.mxu3 %vm5180_vm10, %v452_v37  ;;  %825 = vmatpush.msra.mxu2 %v414_v39  ;;  %vm217_vm10 = vcmp.ge.s32.totalorder %v4368_v4, %v4521_v57  ;;  %v4594_v34 = vadd.s32 128, %v4370_v5  ;;  %v434_v37 = vld [vmem:[#allocation9 + $0x118] sm:$0xff]  ;;  %v401_v39 = vld [vmem:[#allocation9 + $0x10] sm:$0xff]  ;;  %v296_v41 = vld [vmem:[#allocation6 + $0xc8] sm:$0xff] }
  0x99   :  { %3889 = vmatpush.msk.msra.mxu0 %vm227_vm11, %v419_v40  ;;  %vm244_vm2 = vcmp.ge.s32.totalorder %v4373_v7, %v4564_v12  ;;  %vm242_vm3 = vcmp.ge.s32.totalorder %v4373_v7, %v4578_v21  ;;  %v432_v40 = vld [vmem:[#allocation9 + $0x108] sm:$0xff]  ;;  %v290_v57 = vld [vmem:[#allocation6 + $0x98] sm:$0xff]  ;;  %v301_v24 = vld [vmem:[#allocation6 + $0xf0] sm:$0xff] }
  0x9a   :  { %3954 = vmatpush.msk.msra.mxu3 %vm5181_vm12, %v450_v42  ;;  %826 = vmatpush.msra.mxu2 %v412_v44  ;;  %vm5187_vm12 = vcmp.ge.s32.totalorder %v4373_v7, %v4531_v60  ;;  %vm240_vm5 = vcmp.ge.s32.totalorder %v4373_v7, %v4594_v34  ;;  %v399_v42 = vld [vmem:[#allocation9] sm:$0xff]  ;;  %v273_v44 = vld [vmem:[#allocation6 + $0x10] sm:$0xff]  ;;  %v294_v46 = vld [vmem:[#allocation6 + $0xb8] sm:$0xff] }
  0x9b   :  { %3890 = vmatpush.msk.msra.mxu0 %vm225_vm13, %v417_v45  ;;  %723 = vmatmul.f32.gmra.mxu1 %v274_v30  ;;  %v276_v45 = vld [vmem:[#allocation6 + $0x28] sm:$0xff]  ;;  %v298_v36 = vld [vmem:[#allocation6 + $0xd8] sm:$0xff] }
  0x9c   :  { %3955 = vmatpush.msk.msra.mxu3 %vm5182_vm14, %v448_v47  ;;  %827 = vmatpush.msra.mxu2 %v410_v49  ;;  %vm215_vm14 = vcmp.ge.s32.totalorder %v4368_v4, %v4540_v63  ;;  %v275_v47 = vld [vmem:[#allocation6 + $0x20] sm:$0xff]  ;;  %v278_v49 = vld [vmem:[#allocation6 + $0x38] sm:$0xff]  ;;  %v288_v63 = vld [vmem:[#allocation6 + $0x88] sm:$0xff] }
  0x9d   :  { %3891 = vmatpush.msk.msra.mxu0 %vm223_vm15, %v415_v50  ;;  %v277_v50 = vld [vmem:[#allocation6 + $0x30] sm:$0xff]  ;;  %v300_v31 = vld [vmem:[#allocation6 + $0xe8] sm:$0xff]  ;;  %v302_v26 = vld [vmem:[#allocation6 + $0xf8] sm:$0xff] }
  0x9e   :  { %3956 = vmatpush.msk.msra.mxu3 %vm5183_vm0, %v446_v52  ;;  %828 = vmatpush.msra.mxu2 %v408_v54  ;;  %vm5189_vm0 = vcmp.ge.s32.totalorder %v4373_v7, %v4548_v1  ;;  %v280_v52 = vld [vmem:[#allocation6 + $0x48] sm:$0xff]  ;;  %v282_v54 = vld [vmem:[#allocation6 + $0x58] sm:$0xff] }
  0x9f   :  { %3892 = vmatpush.msk.msra.mxu0 %vm221_vm1, %v413_v56  ;;  %v281_v56 = vld [vmem:[#allocation6 + $0x50] sm:$0xff] }
  0xa0   :  { %3957 = vmatpush.msk.msra.mxu3 %vm5184_vm4, %v444_v59  ;;  %829 = vmatpush.msra.mxu2 %v406_v61  ;;  %vm213_vm4 = vcmp.ge.s32.totalorder %v4368_v4, %v4556_v6  ;;  %v283_v59 = vld [vmem:[#allocation6 + $0x60] sm:$0xff]  ;;  %v286_v61 = vld [vmem:[#allocation6 + $0x78] sm:$0xff]  ;;  %v293_v6 = vld [vmem:[#allocation6 + $0xb0] sm:$0xff] }
  0xa1   :  { %3893 = vmatpush.msk.msra.mxu0 %vm219_vm6, %v411_v62  ;;  %v285_v62 = vld [vmem:[#allocation6 + $0x70] sm:$0xff] }
  0xa2   :  { %3958 = vmatpush.msk.msra.mxu3 %vm5185_vm8, %v442_v0  ;;  %830 = vmatpush.msra.mxu2 %v404_v2  ;;  %vm207_vm8 = vcmp.ge.s32.totalorder %v4368_v4, %v4370_v5  ;;  %v279_v5 = vld [vmem:[#allocation6 + $0x40] sm:$0xff]  ;;  %v289_v2 = vld [vmem:[#allocation6 + $0x90] sm:$0xff] }
  0xa3   :  { %3894 = vmatpush.msk.msra.mxu0 %vm217_vm10, %v409_v3  ;;  %726 = vmatmul.f32.gmra.mxu1 %v276_v45  ;;  %v287_v0 = vld [vmem:[#allocation6 + $0x80] sm:$0xff] }
  0xa4   :  { %3959 = vmatpush.msk.msra.mxu3 %vm5187_vm12, %v440_v9  ;;  %831 = vmatpush.msra.mxu2 %v402_v14  ;;  %vm211_vm12 = vcmp.ge.s32.totalorder %v4368_v4, %v177_v18  ;;  %v291_v3 = vld [vmem:[#allocation6 + $0xa0] sm:$0xff]  ;;  %v297_v14 = vld [vmem:[#allocation6 + $0xd0] sm:$0xff] }
  0xa5   :  { %3895 = vmatpush.msk.msra.mxu0 %vm215_vm14, %v407_v16  ;;  %v295_v9 = vld [vmem:[#allocation6 + $0xc0] sm:$0xff] }
  0xa6   :  { %3960 = vmatpush.msk.msra.mxu3 %vm5189_vm0, %v438_v20  ;;  %832 = vmatpush.msra.mxu2 %v400_v23  ;;  %vm209_vm0 = vcmp.ge.s32.totalorder %v4368_v4, %v176_v29  ;;  %v299_v16 = vld [vmem:[#allocation6 + $0xe0] sm:$0xff]  ;;  %v304_v20 = vld [vmem:[#allocation6 + $0x108] sm:$0xff]  ;;  %v306_v23 = vld [vmem:[#allocation6 + $0x118] sm:$0xff] }
  0xa7   :  { %3896 = vmatpush.msk.msra.mxu0 %vm213_vm4, %v405_v25  ;;  %3932 = vmatmul.msk.f32.vlgmr.msra.gmra.mxu2 %vm207_vm8, %v271_v27 }
  0xa8   :  { %3961 = vmatpush.msk.msra.mxu3 %vm244_vm2, %v436_v32  ;;  %v308_v32 = vld [vmem:[#allocation6 + $0x128] sm:$0xff] }
  0xa9   :  { %3897 = vmatpush.msk.msra.mxu0 %vm211_vm12, %v403_v35 }
  0xaa   :  { %3962 = vmatpush.msk.msra.mxu3 %vm242_vm3, %v434_v37 }
  0xab   :  { %3898 = vmatpush.msk.msra.mxu0 %vm209_vm0, %v401_v39  ;;  %729 = vmatmul.f32.gmra.mxu1 %v278_v49 }
  0xac   :  { %3963 = vmatpush.msk.msra.mxu3 %vm240_vm5, %v432_v40 }
  0xad   :  { %946 = vmatmul.f32.vlgmr.msra.gmra.mxu3 %v4523_v58  ;;  %3899 = vmatpush.msk.msra.mxu0 %vm207_vm8, %v399_v42  ;;  %v284_v58 = vld [vmem:[#allocation6 + $0x68] sm:$0xff] }
  0xae   :  { %3900 = vmatmul.msk.f32.vlgmr.msra.gmra.mxu0 %vm207_vm8, %v271_v27  ;;  %v527_v27 = vld [vmem:[#allocation11] sm:$0xff] }
  0xaf   :  { %3933 = vmatmul.msk.f32.gmra.mxu2 %vm209_vm0, %v273_v44 }
  0xb3   :  { %732 = vmatmul.f32.gmra.mxu1 %v280_v52 }
  0xb5   :  { %949 = vmatmul.f32.gmra.mxu3 %v274_v30 }
  0xb6   :  { %3901 = vmatmul.msk.f32.gmra.mxu0 %vm209_vm0, %v273_v44  ;;  %vm5192_vm0 = vcmp.ge.s32.totalorder %v4368_v4, %v4398_v19  ;;  %v529_v44 = vld [vmem:[#allocation11 + $0x10] sm:$0xff] }
  0xb7   :  { %3934 = vmatmul.msk.f32.gmra.mxu2 %vm211_vm12, %v275_v47 }
  0xbb   :  { %735 = vmatmul.f32.gmra.mxu1 %v282_v54 }
  0xbd   :  { %952 = vmatmul.f32.gmra.mxu3 %v276_v45 }
  0xbe   :  { %3902 = vmatmul.msk.f32.gmra.mxu0 %vm211_vm12, %v275_v47  ;;  %v310_v47 = vld [vmem:[#allocation6 + $0x138] sm:$0xff] }
  0xbf   :  { %3935 = vmatmul.msk.f32.gmra.mxu2 %vm213_vm4, %v277_v50 }
  0xc3   :  { %738 = vmatmul.f32.gmra.mxu1 %v284_v58 }
  0xc5   :  { %955 = vmatmul.f32.gmra.mxu3 %v278_v49 }
  0xc6   :  { %3903 = vmatmul.msk.f32.gmra.mxu0 %vm213_vm4, %v277_v50  ;;  %vm5194_vm4 = vcmp.ge.s32.totalorder %v4368_v4, %v4388_v15  ;;  %v530_v50 = vld [vmem:[#allocation11 + $0x18] sm:$0xff] }
  0xc7   :  { %3936 = vmatmul.msk.f32.gmra.mxu2 %vm215_vm14, %v279_v5 }
  0xcb   :  { %741 = vmatmul.f32.gmra.mxu1 %v286_v61 }
  0xcd   :  { %958 = vmatmul.f32.gmra.mxu3 %v280_v52 }
  0xce   :  { %3904 = vmatmul.msk.f32.gmra.mxu0 %vm215_vm14, %v279_v5 }
  0xcf   :  { %3937 = vmatmul.msk.f32.gmra.mxu2 %vm217_vm10, %v281_v56 }
  0xd3   :  { %744 = vmatmul.f32.gmra.mxu1 %v288_v63 }
  0xd5   :  { %961 = vmatmul.f32.gmra.mxu3 %v282_v54 }
  0xd6   :  { %3905 = vmatmul.msk.f32.gmra.mxu0 %vm217_vm10, %v281_v56 }
  0xd7   :  { %3938 = vmatmul.msk.f32.gmra.mxu2 %vm219_vm6, %v283_v59 }
  0xdb   :  { %747 = vmatmul.f32.gmra.mxu1 %v290_v57 }
  0xdd   :  { %964 = vmatmul.f32.gmra.mxu3 %v284_v58 }
  0xde   :  { %3906 = vmatmul.msk.f32.gmra.mxu0 %vm219_vm6, %v283_v59  ;;  %vm5195_vm6 = vmmov %vm5194_vm4  ;;  %v531_v59 = vld [vmem:[#allocation11 + $0x20] sm:$0xff] }
  0xdf   :  { %3939 = vmatmul.msk.f32.gmra.mxu2 %vm221_vm1, %v285_v62 }
  0xe3   :  { %750 = vmatmul.f32.gmra.mxu1 %v292_v51 }
  0xe5   :  { %967 = vmatmul.f32.gmra.mxu3 %v286_v61 }
  0xe6   :  { %3907 = vmatmul.msk.f32.gmra.mxu0 %vm221_vm1, %v285_v62  ;;  %vm5193_vm1 = vmmov %vm5192_vm0  ;;  %v312_v62 = vld [vmem:[#allocation6 + $0x148] sm:$0xff] }
  0xe7   :  { %3940 = vmatmul.msk.f32.gmra.mxu2 %vm223_vm15, %v287_v0 }
  0xeb   :  { %753 = vmatmul.f32.gmra.mxu1 %v294_v46 }
  0xed   :  { %970 = vmatmul.f32.gmra.mxu3 %v288_v63 }
  0xee   :  { %3908 = vmatmul.msk.f32.gmra.mxu0 %vm223_vm15, %v287_v0  ;;  %v532_v0 = vld [vmem:[#allocation11 + $0x28] sm:$0xff]  ;;  %vm5207_vm15 = vcmp.ge.s32.totalorder %v4373_v7, %v4464_v38 }
  0xef   :  { %3941 = vmatmul.msk.f32.gmra.mxu2 %vm225_vm13, %v289_v2 }
  0xf3   :  { %756 = vmatmul.f32.gmra.mxu1 %v296_v41 }
  0xf5   :  { %973 = vmatmul.f32.gmra.mxu3 %v290_v57 }
  0xf6   :  { %3909 = vmatmul.msk.f32.gmra.mxu0 %vm225_vm13, %v289_v2  ;;  %vm5205_vm13 = vcmp.ge.s32.totalorder %v4373_v7, %v4480_v43 }
  0xf7   :  { %3942 = vmatmul.msk.f32.gmra.mxu2 %vm227_vm11, %v291_v3 }
  0xfb   :  { %759 = vmatmul.f32.gmra.mxu1 %v298_v36 }
  0xfd   :  { %976 = vmatmul.f32.gmra.mxu3 %v292_v51 }
  0xfe   :  { %3910 = vmatmul.msk.f32.gmra.mxu0 %vm227_vm11, %v291_v3  ;;  %vm5203_vm11 = vcmp.ge.s32.totalorder %v4373_v7, %v4496_v48 }
  0xff   :  { %3943 = vmatmul.msk.f32.gmra.mxu2 %vm229_vm9, %v293_v6  ;;  %vm5206_vm14 = vmmov %vm5203_vm11 }
 0x103   :  { %762 = vmatmul.f32.gmra.mxu1 %v300_v31 }
 0x105   :  { %979 = vmatmul.f32.gmra.mxu3 %v294_v46 }
 0x106   :  { %3911 = vmatmul.msk.f32.gmra.mxu0 %vm229_vm9, %v293_v6  ;;  %v533_v6 = vld [vmem:[#allocation11 + $0x30] sm:$0xff]  ;;  %vm5201_vm9 = vcmp.ge.s32.totalorder %v4373_v7, %v4512_v53 }
 0x107   :  { %3944 = vmatmul.msk.f32.gmra.mxu2 %vm231_vm7, %v295_v9  ;;  %vm5204_vm12 = vmmov %vm5201_vm9 }
 0x10b   :  { %765 = vmatmul.f32.gmra.mxu1 %v302_v26 }
 0x10d   :  { %982 = vmatmul.f32.gmra.mxu3 %v296_v41 }
 0x10e   :  { %3912 = vmatmul.msk.f32.gmra.mxu0 %vm231_vm7, %v295_v9  ;;  %vm5196_vm7 = vcmp.ge.s32.totalorder %v4368_v4, %v4385_v13  ;;  %v528_v4 = vld [vmem:[#allocation11 + $0x8] sm:$0xff]  ;;  %v314_v9 = vld [vmem:[#allocation6 + $0x158] sm:$0xff] }
 0x10f   :  { %3945 = vmatmul.msk.f32.gmra.mxu2 %vm5192_vm0, %v297_v14  ;;  %vm5197_vm8 = vmmov %vm5196_vm7 }
 0x110   :  { %v721_v18 = vpop.f32.mrf.mxu1  ;;  %vm5208_vm0 = vmmov %vm5205_vm13 }
 0x113   :  { %3916 = vmatmul.msk.f32.gmra.mxu1 %vm240_vm5, %v304_v20 }
 0x115   :  { %985 = vmatmul.f32.gmra.mxu3 %v298_v36 }
 0x116   :  { %3913 = vmatmul.msk.f32.gmra.mxu0 %vm5193_vm1, %v297_v14  ;;  %v534_v14 = vld [vmem:[#allocation11 + $0x38] sm:$0xff]  ;;  %vm5209_vm1 = vcmp.ge.s32.totalorder %v4373_v7, %v4448_v33 }
 0x117   :  { %3946 = vmatmul.msk.f32.gmra.mxu2 %vm5194_vm4, %v299_v16  ;;  %vm5210_vm4 = vmmov %vm5207_vm15 }
 0x118   :  { %v724_v19 = vpop.f32.mrf.mxu1 }
 0x11b   :  { %3917 = vmatmul.msk.f32.gmra.mxu1 %vm242_vm3, %v306_v23 }
 0x11d   :  { %988 = vmatmul.f32.gmra.mxu3 %v300_v31 }
 0x11e   :  { %3914 = vmatmul.msk.f32.gmra.mxu0 %vm5195_vm6, %v299_v16  ;;  %vm5211_vm6 = vcmp.ge.s32.totalorder %v4373_v7, %v4432_v28 }
 0x11f   :  { %3947 = vmatmul.msk.f32.gmra.mxu2 %vm5196_vm7, %v301_v24  ;;  %vm5212_vm7 = vmmov %vm5209_vm1 }
 0x120   :  { %v727_v29 = vpop.f32.mrf.mxu1 }
 0x123   :  { %3918 = vmatmul.msk.f32.gmra.mxu1 %vm244_vm2, %v308_v32 }
 0x125   :  { %991 = vmatmul.f32.gmra.mxu3 %v302_v26 }
 0x126   :  { %3915 = vmatmul.msk.f32.gmra.mxu0 %vm5197_vm8, %v301_v24  ;;  %vm5213_vm8 = vcmp.ge.s32.totalorder %v4373_v7, %v4413_v22 }
 0x127   :  { %881 = vmatmul.f32.gmra.mxu2 %v4175_v55 }
 0x128   :  { %v730_v34 = vpop.f32.mrf.mxu1 }
 0x12a   :  { %v834_v15 = vpop.f32.mrf.mxu2 }
 0x12b   :  { %v608_v25 = vpop.f32.mrf.mxu0 }
 0x12c   :  { %v722_v30 = vadd.f32 %v721_v18, %v608_v25  ;;  %v536_v25 = vld [vmem:[#allocation11 + $0x48] sm:$0xff] }
 0x12d   :  { %3964 = vmatmul.msk.f32.gmra.mxu3 %vm240_vm5, %v304_v20  ;;  %vm5198_vm5 = vcmp.ge.s32.totalorder %v4373_v7, %v4548_v1  ;;  %v535_v20 = vld [vmem:[#allocation11 + $0x40] sm:$0xff] }
 0x12e   :  { %v1043_v35 = vadd.f32 %v722_v30, %v527_v27  ;;  %655 = vmatmul.f32.gmra.mxu0 %v4175_v55  ;;  %3919 = vmatmul.msk.f32.gmra.mxu1 %vm5198_vm5, %v310_v47 }
 0x12f   :  { %884 = vmatmul.f32.gmra.mxu2 %v4175_v55 }
 0x130   :  { %1107 = vst [vmem:[#allocation11] sm:$0xff] %v1043_v35  ;;  %v947_v13 = vpop.f32.mrf.mxu3  ;;  %v733_v21 = vpop.f32.mrf.mxu1 }
 0x131   :  { %v948_v37 = vadd.f32 %v947_v13, %v834_v15 }
 0x132   :  { %v837_v39 = vpop.f32.mrf.mxu2 }
 0x133   :  { %v1044_v40 = vadd.f32 %v948_v37, %v528_v4  ;;  %v611_v42 = vpop.f32.mrf.mxu0  ;;  %v537_v4 = vld [vmem:[#allocation11 + $0x50] sm:$0xff]  ;;  %v318_v37 = vld [vmem:[#allocation6 + $0x178] sm:$0xff] }
 0x134   :  { %v725_v45 = vadd.f32 %v724_v19, %v611_v42 }
 0x135   :  { %1108 = vst [vmem:[#allocation11 + $0x8] sm:$0xff] %v1044_v40  ;;  %3965 = vmatmul.msk.f32.gmra.mxu3 %vm242_vm3, %v306_v23  ;;  %vm5199_vm3 = vcmp.ge.s32.totalorder %v4373_v7, %v4531_v60  ;;  %v316_v23 = vld [vmem:[#allocation6 + $0x168] sm:$0xff]  ;;  %v538_v40 = vld [vmem:[#allocation11 + $0x58] sm:$0xff] }
 0x136   :  { %v1045_v49 = vadd.f32 %v725_v45, %v529_v44  ;;  %658 = vmatmul.f32.gmra.mxu0 %v4175_v55  ;;  %3920 = vmatmul.msk.f32.gmra.mxu1 %vm5199_vm3, %v312_v62  ;;  %vm5202_vm10 = vmmov %vm5199_vm3  ;;  %vm5215_vm3 = vcmp.ge.s32.totalorder %v4373_v7, %v4395_v17 }
 0x137   :  { %887 = vmatmul.f32.gmra.mxu2 %v4175_v55 }
 0x138   :  { %1109 = vst [vmem:[#allocation11 + $0x10] sm:$0xff] %v1045_v49  ;;  %v950_v52 = vpop.f32.mrf.mxu3  ;;  %v736_v12 = vpop.f32.mrf.mxu1  ;;  %v539_v49 = vld [vmem:[#allocation11 + $0x60] sm:$0xff] }
 0x139   :  { %v951_v5 = vadd.f32 %v950_v52, %v837_v39  ;;  %v320_v52 = vld [vmem:[#allocation6 + $0x188] sm:$0xff] }
 0x13a   :  { %v840_v54 = vpop.f32.mrf.mxu2 }
 0x13b   :  { %v1046_v56 = vadd.f32 %v951_v5, %v530_v50  ;;  %v614_v58 = vpop.f32.mrf.mxu0 }
 0x13c   :  { %v728_v61 = vadd.f32 %v727_v29, %v614_v58 }
 0x13d   :  { %1110 = vst [vmem:[#allocation11 + $0x18] sm:$0xff] %v1046_v56  ;;  %3966 = vmatmul.msk.f32.gmra.mxu3 %vm244_vm2, %v308_v32  ;;  %vm5200_vm2 = vmmov %vm5198_vm5 }
 0x13e   :  { %v1047_v63 = vadd.f32 %v728_v61, %v531_v59  ;;  %661 = vmatmul.f32.gmra.mxu0 %v4175_v55  ;;  %3921 = vmatmul.msk.f32.gmra.mxu1 %vm5201_vm9, %v314_v9  ;;  %vm5214_vm5 = vmmov %vm5211_vm6  ;;  %vm5217_vm9 = vcmp.ge.s32.totalorder %v4373_v7, %v4382_v11 }
 0x13f   :  { %890 = vmatmul.f32.gmra.mxu2 %v4175_v55 }
 0x140   :  { %1111 = vst [vmem:[#allocation11 + $0x20] sm:$0xff] %v1047_v63  ;;  %v953_v57 = vpop.f32.mrf.mxu3  ;;  %v739_v1 = vpop.f32.mrf.mxu1 }
 0x141   :  { %v954_v2 = vadd.f32 %v953_v57, %v840_v54  ;;  %v540_v54 = vld [vmem:[#allocation11 + $0x68] sm:$0xff] }
 0x142   :  { %v843_v51 = vpop.f32.mrf.mxu2 }
 0x143   :  { %v1048_v3 = vadd.f32 %v954_v2, %v532_v0  ;;  %v617_v46 = vpop.f32.mrf.mxu0  ;;  %v322_v0 = vld [vmem:[#allocation6 + $0x198] sm:$0xff] }
 0x144   :  { %v731_v41 = vadd.f32 %v730_v34, %v617_v46  ;;  %v542_v2 = vld [vmem:[#allocation11 + $0x78] sm:$0xff] }
 0x145   :  { %1112 = vst [vmem:[#allocation11 + $0x28] sm:$0xff] %v1048_v3  ;;  %3967 = vmatmul.msk.f32.gmra.mxu3 %vm5200_vm2, %v310_v47  ;;  %vm5216_vm2 = vmmov %vm5213_vm8 }
 0x146   :  { %v1049_v36 = vadd.f32 %v731_v41, %v533_v6  ;;  %664 = vmatmul.f32.gmra.mxu0 %v4175_v55  ;;  %3922 = vmatmul.msk.f32.gmra.mxu1 %vm5203_vm11, %v316_v23  ;;  %v543_v41 = vld [vmem:[#allocation11 + $0x80] sm:$0xff]  ;;  %vm5219_vm11 = vcmp.ge.s32.totalorder %v4373_v7, %v4379_v10 }
 0x147   :  { %893 = vmatmul.f32.gmra.mxu2 %v4175_v55 }
 0x148   :  { %1113 = vst [vmem:[#allocation11 + $0x30] sm:$0xff] %v1049_v36  ;;  %v956_v31 = vpop.f32.mrf.mxu3  ;;  %v742_v60 = vpop.f32.mrf.mxu1  ;;  %v324_v36 = vld [vmem:[#allocation6 + $0x1a8] sm:$0xff] }
 0x149   :  { %v957_v16 = vadd.f32 %v956_v31, %v843_v51  ;;  %v544_v31 = vld [vmem:[#allocation11 + $0x88] sm:$0xff] }
 0x14a   :  { %v846_v26 = vpop.f32.mrf.mxu2 }
 0x14b   :  { %v1050_v18 = vadd.f32 %v957_v16, %v534_v14  ;;  %v620_v24 = vpop.f32.mrf.mxu0 }
 0x14c   :  { %v734_v19 = vadd.f32 %v733_v21, %v620_v24 }
 0x14d   :  { %1114 = vst [vmem:[#allocation11 + $0x38] sm:$0xff] %v1050_v18  ;;  %3968 = vmatmul.msk.f32.gmra.mxu3 %vm5202_vm10, %v312_v62  ;;  %v541_v62 = vld [vmem:[#allocation11 + $0x70] sm:$0xff]  ;;  %vm5218_vm10 = vmmov %vm5215_vm3 }
 0x14e   :  { %v1051_v15 = vadd.f32 %v734_v19, %v535_v20  ;;  %667 = vmatmul.f32.gmra.mxu0 %v4175_v55  ;;  %3923 = vmatmul.msk.f32.gmra.mxu1 %vm5205_vm13, %v318_v37  ;;  %vm5221_vm13 = vcmp.ge.s32.totalorder %v4373_v7, %v4376_v8 }
 0x14f   :  { %896 = vmatmul.f32.gmra.mxu2 %v4175_v55 }
 0x150   :  { %1115 = vst [vmem:[#allocation11 + $0x40] sm:$0xff] %v1051_v15  ;;  %v959_v27 = vpop.f32.mrf.mxu3  ;;  %v745_v53 = vpop.f32.mrf.mxu1 }
 0x151   :  { %v960_v29 = vadd.f32 %v959_v27, %v846_v26 }
 0x152   :  { %v849_v30 = vpop.f32.mrf.mxu2 }
 0x153   :  { %v1052_v32 = vadd.f32 %v960_v29, %v536_v25  ;;  %v623_v35 = vpop.f32.mrf.mxu0  ;;  %v546_v25 = vld [vmem:[#allocation11 + $0x98] sm:$0xff] }
 0x154   :  { %v737_v13 = vadd.f32 %v736_v12, %v623_v35 }
 0x155   :  { %1116 = vst [vmem:[#allocation11 + $0x48] sm:$0xff] %v1052_v32  ;;  %3969 = vmatmul.msk.f32.gmra.mxu3 %vm5204_vm12, %v314_v9  ;;  %vm5220_vm12 = vmmov %vm5217_vm9 }
 0x156   :  { %v1053_v39 = vadd.f32 %v737_v13, %v537_v4  ;;  %670 = vmatmul.f32.gmra.mxu0 %v4175_v55  ;;  %3924 = vmatmul.msk.f32.gmra.mxu1 %vm5207_vm15, %v320_v52  ;;  %v547_v4 = vld [vmem:[#allocation11 + $0xa0] sm:$0xff]  ;;  %v328_v13 = vld [vmem:[#allocation6 + $0x1c8] sm:$0xff]  ;;  %vm5223_vm15 = vmmov %vm5221_vm13 }
 0x157   :  { %899 = vmatmul.f32.gmra.mxu2 %v4175_v55 }
 0x158   :  { %1117 = vst [vmem:[#allocation11 + $0x50] sm:$0xff] %v1053_v39  ;;  %v962_v42 = vpop.f32.mrf.mxu3  ;;  %v748_v48 = vpop.f32.mrf.mxu1  ;;  %v548_v39 = vld [vmem:[#allocation11 + $0xa8] sm:$0xff] }
 0x159   :  { %v963_v44 = vadd.f32 %v962_v42, %v849_v30 }
 0x15a   :  { %v852_v34 = vpop.f32.mrf.mxu2 }
 0x15b   :  { %v1054_v45 = vadd.f32 %v963_v44, %v538_v40  ;;  %v626_v47 = vpop.f32.mrf.mxu0 }
 0x15c   :  { %v740_v50 = vadd.f32 %v739_v1, %v626_v47  ;;  %v545_v1 = vld [vmem:[#allocation11 + $0x90] sm:$0xff] }
 0x15d   :  { %1118 = vst [vmem:[#allocation11 + $0x58] sm:$0xff] %v1054_v45  ;;  %3970 = vmatmul.msk.f32.gmra.mxu3 %vm5206_vm14, %v316_v23  ;;  %v326_v23 = vld [vmem:[#allocation6 + $0x1b8] sm:$0xff]  ;;  %v549_v47 = vld [vmem:[#allocation11 + $0xb0] sm:$0xff]  ;;  %vm5222_vm14 = vmmov %vm5219_vm11 }
 0x15e   :  { %v1055_v5 = vadd.f32 %v740_v50, %v539_v49  ;;  %673 = vmatmul.f32.gmra.mxu0 %v4175_v55  ;;  %3925 = vmatmul.msk.f32.gmra.mxu1 %vm5209_vm1, %v322_v0 }
 0x15f   :  { %902 = vmatmul.f32.gmra.mxu2 %v4175_v55 }
 0x160   :  { %1119 = vst [vmem:[#allocation11 + $0x60] sm:$0xff] %v1055_v5  ;;  %v965_v56 = vpop.f32.mrf.mxu3  ;;  %v751_v43 = vpop.f32.mrf.mxu1 }
 0x161   :  { %v966_v58 = vadd.f32 %v965_v56, %v852_v34 }
 0x162   :  { %v855_v59 = vpop.f32.mrf.mxu2 }
 0x163   :  { %v1056_v21 = vadd.f32 %v966_v58, %v540_v54  ;;  %v629_v61 = vpop.f32.mrf.mxu0 }
 0x164   :  { %v743_v63 = vadd.f32 %v742_v60, %v629_v61 }
 0x165   :  { %1120 = vst [vmem:[#allocation11 + $0x68] sm:$0xff] %v1056_v21  ;;  %3971 = vmatmul.msk.f32.gmra.mxu3 %vm5208_vm0, %v318_v37  ;;  %v551_v21 = vld [vmem:[#allocation11 + $0xc0] sm:$0xff] }
 0x166   :  { %v1057_v57 = vadd.f32 %v743_v63, %v541_v62  ;;  %676 = vmatmul.f32.gmra.mxu0 %v4175_v55  ;;  %3926 = vmatmul.msk.f32.gmra.mxu1 %vm5211_vm6, %v324_v36  ;;  %v332_v62 = vld [vmem:[#allocation6 + $0x1e8] sm:$0xff] }
 0x167   :  { %905 = vmatmul.f32.gmra.mxu2 %v4175_v55  ;;  %v552_v63 = vld [vmem:[#allocation11 + $0xc8] sm:$0xff] }
 0x168   :  { %1121 = vst [vmem:[#allocation11 + $0x70] sm:$0xff] %v1057_v57  ;;  %v968_v51 = vpop.f32.mrf.mxu3  ;;  %v754_v38 = vpop.f32.mrf.mxu1 }
 0x169   :  { %v969_v3 = vadd.f32 %v968_v51, %v855_v59 }
 0x16a   :  { %v858_v46 = vpop.f32.mrf.mxu2 }
 0x16b   :  { %v1058_v6 = vadd.f32 %v969_v3, %v542_v2  ;;  %v632_v12 = vpop.f32.mrf.mxu0 }
 0x16c   :  { %v746_v9 = vadd.f32 %v745_v53, %v632_v12  ;;  %v330_v53 = vld [vmem:[#allocation6 + $0x1d8] sm:$0xff] }
 0x16d   :  { %1122 = vst [vmem:[#allocation11 + $0x78] sm:$0xff] %v1058_v6  ;;  %3972 = vmatmul.msk.f32.gmra.mxu3 %vm5210_vm4, %v320_v52  ;;  %v550_v52 = vld [vmem:[#allocation11 + $0xb8] sm:$0xff] }
 0x16e   :  { %v1059_v14 = vadd.f32 %v746_v9, %v543_v41  ;;  %679 = vmatmul.f32.gmra.mxu0 %v4175_v55  ;;  %3927 = vmatmul.msk.f32.gmra.mxu1 %vm5213_vm8, %v326_v23  ;;  %v334_v12 = vld [vmem:[#allocation6 + $0x1f8] sm:$0xff] }
 0x16f   :  { %908 = vmatmul.f32.gmra.mxu2 %v4175_v55 }
 0x170   :  { %1123 = vst [vmem:[#allocation11 + $0x80] sm:$0xff] %v1059_v14  ;;  %v971_v16 = vpop.f32.mrf.mxu3  ;;  %v757_v33 = vpop.f32.mrf.mxu1 }
 0x171   :  { %v972_v26 = vadd.f32 %v971_v16, %v858_v46  ;;  %v553_v46 = vld [vmem:[#allocation11 + $0xd0] sm:$0xff] }
 0x172   :  { %v861_v18 = vpop.f32.mrf.mxu2 }
 0x173   :  { %v1060_v24 = vadd.f32 %v972_v26, %v544_v31  ;;  %v635_v20 = vpop.f32.mrf.mxu0  ;;  %v555_v26 = vld [vmem:[#allocation11 + $0xe0] sm:$0xff] }
 0x174   :  { %v749_v19 = vadd.f32 %v748_v48, %v635_v20  ;;  %v556_v20 = vld [vmem:[#allocation11 + $0xe8] sm:$0xff] }
 0x175   :  { %1124 = vst [vmem:[#allocation11 + $0x88] sm:$0xff] %v1060_v24  ;;  %3973 = vmatmul.msk.f32.gmra.mxu3 %vm5212_vm7, %v322_v0 }
 0x176   :  { %v1061_v15 = vadd.f32 %v749_v19, %v545_v1  ;;  %682 = vmatmul.f32.gmra.mxu0 %v4175_v55  ;;  %3928 = vmatmul.msk.f32.gmra.mxu1 %vm5215_vm3, %v328_v13 }
 0x177   :  { %911 = vmatmul.f32.gmra.mxu2 %v4175_v55 }
 0x178   :  { %1125 = vst [vmem:[#allocation11 + $0x90] sm:$0xff] %v1061_v15  ;;  %v974_v27 = vpop.f32.mrf.mxu3  ;;  %v760_v28 = vpop.f32.mrf.mxu1 }
 0x179   :  { %v975_v29 = vadd.f32 %v974_v27, %v861_v18 }
 0x17a   :  { %v864_v30 = vpop.f32.mrf.mxu2 }
 0x17b   :  { %v1062_v32 = vadd.f32 %v975_v29, %v546_v25  ;;  %v638_v35 = vpop.f32.mrf.mxu0  ;;  %v557_v25 = vld [vmem:[#allocation11 + $0xf0] sm:$0xff] }
 0x17c   :  { %v752_v60 = vadd.f32 %v751_v43, %v638_v35  ;;  %v554_v43 = vld [vmem:[#allocation11 + $0xd8] sm:$0xff] }
 0x17d   :  { %1126 = vst [vmem:[#allocation11 + $0x98] sm:$0xff] %v1062_v32  ;;  %3974 = vmatmul.msk.f32.gmra.mxu3 %vm5214_vm5, %v324_v36 }
 0x17e   :  { %v1063_v37 = vadd.f32 %v752_v60, %v547_v4  ;;  %685 = vmatmul.f32.gmra.mxu0 %v4175_v55  ;;  %3929 = vmatmul.msk.f32.gmra.mxu1 %vm5217_vm9, %v330_v53 }
 0x17f   :  { %914 = vmatmul.f32.gmra.mxu2 %v4175_v55 }
 0x180   :  { %1127 = vst [vmem:[#allocation11 + $0xa0] sm:$0xff] %v1063_v37  ;;  %v977_v40 = vpop.f32.mrf.mxu3  ;;  %v763_v22 = vpop.f32.mrf.mxu1 }
 0x181   :  { %v978_v42 = vadd.f32 %v977_v40, %v864_v30  ;;  %v558_v30 = vld [vmem:[#allocation11 + $0xf8] sm:$0xff] }
 0x182   :  { %v867_v44 = vpop.f32.mrf.mxu2 }
 0x183   :  { %v1064_v34 = vadd.f32 %v978_v42, %v548_v39  ;;  %v641_v45 = vpop.f32.mrf.mxu0  ;;  %v560_v42 = vld [vmem:[#allocation11 + $0x108] sm:$0xff] }
 0x184   :  { %v755_v49 = vadd.f32 %v754_v38, %v641_v45 }
 0x185   :  { %1128 = vst [vmem:[#allocation11 + $0xa8] sm:$0xff] %v1064_v34  ;;  %3975 = vmatmul.msk.f32.gmra.mxu3 %vm5216_vm2, %v326_v23 }
 0x186   :  { %v1065_v50 = vadd.f32 %v755_v49, %v549_v47  ;;  %688 = vmatmul.f32.gmra.mxu0 %v4175_v55  ;;  %3930 = vmatmul.msk.f32.gmra.mxu1 %vm5219_vm11, %v332_v62 }
 0x187   :  { %917 = vmatmul.f32.gmra.mxu2 %v4175_v55 }
 0x188   :  { %1129 = vst [vmem:[#allocation11 + $0xb0] sm:$0xff] %v1065_v50  ;;  %v980_v5 = vpop.f32.mrf.mxu3  ;;  %v766_v17 = vpop.f32.mrf.mxu1 }
 0x189   :  { %v981_v54 = vadd.f32 %v980_v5, %v867_v44 }
 0x18a   :  { %v870_v56 = vpop.f32.mrf.mxu2 }
 0x18b   :  { %v1066_v58 = vadd.f32 %v981_v54, %v550_v52  ;;  %v644_v59 = vpop.f32.mrf.mxu0 }
 0x18c   :  { %v758_v61 = vadd.f32 %v757_v33, %v644_v59 }
 0x18d   :  { %1130 = vst [vmem:[#allocation11 + $0xb8] sm:$0xff] %v1066_v58  ;;  %3976 = vmatmul.msk.f32.gmra.mxu3 %vm5218_vm10, %v328_v13  ;;  %v559_v13 = vld [vmem:[#allocation11 + $0x100] sm:$0xff] }
 0x18e   :  { %v1067_v48 = vadd.f32 %v758_v61, %v551_v21  ;;  %691 = vmatmul.f32.gmra.mxu0 %v4175_v55  ;;  %3931 = vmatmul.msk.f32.gmra.mxu1 %vm5221_vm13, %v334_v12  ;;  %v563_v58 = vld [vmem:[#allocation11 + $0x120] sm:$0xff]  ;;  %v564_v61 = vld [vmem:[#allocation11 + $0x128] sm:$0xff] }
 0x18f   :  { %920 = vmatmul.f32.gmra.mxu2 %v4175_v55 }
 0x190   :  { %1131 = vst [vmem:[#allocation11 + $0xc0] sm:$0xff] %v1067_v48  ;;  %v983_v0 = vpop.f32.mrf.mxu3  ;;  %v769_v11 = vpop.f32.mrf.mxu1 }
 0x191   :  { %v984_v57 = vadd.f32 %v983_v0, %v870_v56 }
 0x192   :  { %v873_v2 = vpop.f32.mrf.mxu2 }
 0x193   :  { %v1068_v51 = vadd.f32 %v984_v57, %v552_v63  ;;  %v647_v3 = vpop.f32.mrf.mxu0 }
 0x194   :  { %v761_v6 = vadd.f32 %v760_v28, %v647_v3 }
 0x195   :  { %1132 = vst [vmem:[#allocation11 + $0xc8] sm:$0xff] %v1068_v51  ;;  %3977 = vmatmul.msk.f32.gmra.mxu3 %vm5220_vm12, %v330_v53  ;;  %v562_v53 = vld [vmem:[#allocation11 + $0x118] sm:$0xff] }
 0x196   :  { %v1069_v41 = vadd.f32 %v761_v6, %v553_v46  ;;  %694 = vmatmul.f32.gmra.mxu0 %v4175_v55 }
 0x197   :  { %923 = vmatmul.f32.gmra.mxu2 %v4175_v55 }
 0x198   :  { %1133 = vst [vmem:[#allocation11 + $0xd0] sm:$0xff] %v1069_v41  ;;  %v986_v9 = vpop.f32.mrf.mxu3  ;;  %v772_v27 = vpop.f32.mrf.mxu1 }
 0x199   :  { %v987_v36 = vadd.f32 %v986_v9, %v873_v2  ;;  %v565_v2 = vld [vmem:[#allocation11 + $0x130] sm:$0xff] }
 0x19a   :  { %v876_v14 = vpop.f32.mrf.mxu2 }
 0x19b   :  { %v1070_v31 = vadd.f32 %v987_v36, %v554_v43  ;;  %v650_v16 = vpop.f32.mrf.mxu0  ;;  %v567_v36 = vld [vmem:[#allocation11 + $0x140] sm:$0xff] }
 0x19c   :  { %v764_v18 = vadd.f32 %v763_v22, %v650_v16 }
 0x19d   :  { %1134 = vst [vmem:[#allocation11 + $0xd8] sm:$0xff] %v1070_v31  ;;  %3978 = vmatmul.msk.f32.gmra.mxu3 %vm5222_vm14, %v332_v62 }
 0x19e   :  { %v1071_v24 = vadd.f32 %v764_v18, %v555_v26  ;;  %697 = vmatmul.f32.gmra.mxu0 %v4175_v55  ;;  %v568_v26 = vld [vmem:[#allocation11 + $0x148] sm:$0xff] }
 0x19f   :  { %926 = vmatmul.f32.gmra.mxu2 %v4175_v55 }
 0x1a0   :  { %1135 = vst [vmem:[#allocation11 + $0xe0] sm:$0xff] %v1071_v24  ;;  %v989_v1 = vpop.f32.mrf.mxu3  ;;  %v775_v37 = vpop.f32.mrf.mxu1 }
 0x1a1   :  { %v990_v38 = vadd.f32 %v989_v1, %v876_v14 }
 0x1a2   :  { %v879_v19 = vpop.f32.mrf.mxu2 }
 0x1a3   :  { %v1072_v23 = vadd.f32 %v990_v38, %v556_v20  ;;  %v653_v15 = vpop.f32.mrf.mxu0  ;;  %v569_v38 = vld [vmem:[#allocation11 + $0x150] sm:$0xff] }
 0x1a4   :  { %v767_v29 = vadd.f32 %v766_v17, %v653_v15  ;;  %v566_v17 = vld [vmem:[#allocation11 + $0x138] sm:$0xff] }
 0x1a5   :  { %1136 = vst [vmem:[#allocation11 + $0xe8] sm:$0xff] %v1072_v23  ;;  %3979 = vmatmul.msk.f32.gmra.mxu3 %vm5223_vm15, %v334_v12 }
 0x1a6   :  { %v1073_v10 = vadd.f32 %v767_v29, %v557_v25  ;;  %700 = vmatmul.f32.gmra.mxu0 %v4175_v55  ;;  %v561_v55 = vld [vmem:[#allocation11 + $0x110] sm:$0xff]  ;;  %v570_v25 = vld [vmem:[#allocation11 + $0x158] sm:$0xff] }
 0x1a8   :  { %1137 = vst [vmem:[#allocation11 + $0xf0] sm:$0xff] %v1073_v10  ;;  %v992_v32 = vpop.f32.mrf.mxu3 }
 0x1a9   :  { %v993_v35 = vadd.f32 %v992_v32, %v879_v19 }
 0x1aa   :  { %v882_v4 = vpop.f32.mrf.mxu2 }
 0x1ab   :  { %v1074_v33 = vadd.f32 %v993_v35, %v558_v30  ;;  %v656_v60 = vpop.f32.mrf.mxu0  ;;  %v778_v47 = vpop.f32.mrf.mxu1  ;;  %v571_v35 = vld [vmem:[#allocation11 + $0x160] sm:$0xff] }
 0x1ac   :  { %v770_v39 = vadd.f32 %v769_v11, %v656_v60 }
 0x1ad   :  { %1138 = vst [vmem:[#allocation11 + $0xf8] sm:$0xff] %v1074_v33 }
 0x1ae   :  { %v1075_v40 = vadd.f32 %v770_v39, %v559_v13  ;;  %v572_v13 = vld [vmem:[#allocation11 + $0x168] sm:$0xff] }
 0x1b0   :  { %1139 = vst [vmem:[#allocation11 + $0x100] sm:$0xff] %v1075_v40  ;;  %v995_v44 = vpop.f32.mrf.mxu3 }
 0x1b1   :  { %v996_v7 = vadd.f32 %v995_v44, %v882_v4 }
 0x1b2   :  { %v885_v8 = vpop.f32.mrf.mxu2 }
 0x1b3   :  { %v1076_v34 = vadd.f32 %v996_v7, %v560_v42  ;;  %v659_v45 = vpop.f32.mrf.mxu0  ;;  %v781_v59 = vpop.f32.mrf.mxu1  ;;  %v573_v7 = vld [vmem:[#allocation11 + $0x170] sm:$0xff] }
 0x1b4   :  { %v773_v28 = vadd.f32 %v772_v27, %v659_v45 }
 0x1b5   :  { %1140 = vst [vmem:[#allocation11 + $0x108] sm:$0xff] %v1076_v34 }
 0x1b6   :  { %v1077_v49 = vadd.f32 %v773_v28, %v561_v55  ;;  %v574_v55 = vld [vmem:[#allocation11 + $0x178] sm:$0xff] }
 0x1b8   :  { %1141 = vst [vmem:[#allocation11 + $0x110] sm:$0xff] %v1077_v49  ;;  %v998_v50 = vpop.f32.mrf.mxu3 }
 0x1b9   :  { %v999_v52 = vadd.f32 %v998_v50, %v885_v8 }
 0x1ba   :  { %v888_v5 = vpop.f32.mrf.mxu2 }
 0x1bb   :  { %v1078_v54 = vadd.f32 %v999_v52, %v562_v53  ;;  %v662_v56 = vpop.f32.mrf.mxu0  ;;  %v784_v51 = vpop.f32.mrf.mxu1  ;;  %v575_v52 = vld [vmem:[#allocation11 + $0x180] sm:$0xff] }
 0x1bc   :  { %v776_v21 = vadd.f32 %v775_v37, %v662_v56 }
 0x1bd   :  { %1142 = vst [vmem:[#allocation11 + $0x118] sm:$0xff] %v1078_v54 }
 0x1be   :  { %v1079_v22 = vadd.f32 %v776_v21, %v563_v58  ;;  %v576_v58 = vld [vmem:[#allocation11 + $0x188] sm:$0xff] }
 0x1c0   :  { %1143 = vst [vmem:[#allocation11 + $0x120] sm:$0xff] %v1079_v22  ;;  %v1001_v62 = vpop.f32.mrf.mxu3 }
 0x1c1   :  { %v1002_v48 = vadd.f32 %v1001_v62, %v888_v5 }
 0x1c2   :  { %v891_v63 = vpop.f32.mrf.mxu2 }
 0x1c3   :  { %v1080_v0 = vadd.f32 %v1002_v48, %v564_v61  ;;  %v665_v57 = vpop.f32.mrf.mxu0  ;;  %v787_v14 = vpop.f32.mrf.mxu1  ;;  %v577_v48 = vld [vmem:[#allocation11 + $0x190] sm:$0xff] }
 0x1c4   :  { %v779_v3 = vadd.f32 %v778_v47, %v665_v57  ;;  %v578_v57 = vld [vmem:[#allocation11 + $0x198] sm:$0xff] }
 0x1c5   :  { %1144 = vst [vmem:[#allocation11 + $0x128] sm:$0xff] %v1080_v0 }
 0x1c6   :  { %v1081_v46 = vadd.f32 %v779_v3, %v565_v2 }
 0x1c8   :  { %1145 = vst [vmem:[#allocation11 + $0x130] sm:$0xff] %v1081_v46  ;;  %v1004_v6 = vpop.f32.mrf.mxu3 }
 0x1c9   :  { %v1005_v12 = vadd.f32 %v1004_v6, %v891_v63 }
 0x1ca   :  { %v894_v41 = vpop.f32.mrf.mxu2 }
 0x1cb   :  { %v1082_v43 = vadd.f32 %v1005_v12, %v566_v17  ;;  %v668_v9 = vpop.f32.mrf.mxu0  ;;  %v790_v19 = vpop.f32.mrf.mxu1  ;;  %v579_v12 = vld [vmem:[#allocation11 + $0x1a0] sm:$0xff] }
 0x1cc   :  { %v782_v31 = vadd.f32 %v781_v59, %v668_v9  ;;  %v580_v9 = vld [vmem:[#allocation11 + $0x1a8] sm:$0xff] }
 0x1cd   :  { %1146 = vst [vmem:[#allocation11 + $0x138] sm:$0xff] %v1082_v43 }
 0x1ce   :  { %v1083_v16 = vadd.f32 %v782_v31, %v567_v36 }
 0x1d0   :  { %1147 = vst [vmem:[#allocation11 + $0x140] sm:$0xff] %v1083_v16  ;;  %v1007_v11 = vpop.f32.mrf.mxu3 }
 0x1d1   :  { %v1008_v18 = vadd.f32 %v1007_v11, %v894_v41  ;;  %v581_v11 = vld [vmem:[#allocation11 + $0x1b0] sm:$0xff] }
 0x1d2   :  { %v897_v24 = vpop.f32.mrf.mxu2 }
 0x1d3   :  { %v1084_v20 = vadd.f32 %v1008_v18, %v568_v26  ;;  %v671_v1 = vpop.f32.mrf.mxu0  ;;  %v793_v4 = vpop.f32.mrf.mxu1 }
 0x1d4   :  { %v785_v23 = vadd.f32 %v784_v51, %v671_v1  ;;  %v582_v1 = vld [vmem:[#allocation11 + $0x1b8] sm:$0xff] }
 0x1d5   :  { %1148 = vst [vmem:[#allocation11 + $0x148] sm:$0xff] %v1084_v20 }
 0x1d6   :  { %v1085_v15 = vadd.f32 %v785_v23, %v569_v38 }
 0x1d8   :  { %1149 = vst [vmem:[#allocation11 + $0x150] sm:$0xff] %v1085_v15  ;;  %v1010_v27 = vpop.f32.mrf.mxu3 }
 0x1d9   :  { %v1011_v29 = vadd.f32 %v1010_v27, %v897_v24  ;;  %v583_v27 = vld [vmem:[#allocation11 + $0x1c0] sm:$0xff] }
 0x1da   :  { %v900_v10 = vpop.f32.mrf.mxu2 }
 0x1db   :  { %v1086_v30 = vadd.f32 %v1011_v29, %v570_v25  ;;  %v674_v32 = vpop.f32.mrf.mxu0  ;;  %v796_v34 = vpop.f32.mrf.mxu1 }
 0x1dc   :  { %v788_v33 = vadd.f32 %v787_v14, %v674_v32  ;;  %v584_v32 = vld [vmem:[#allocation11 + $0x1c8] sm:$0xff] }
 0x1dd   :  { %1150 = vst [vmem:[#allocation11 + $0x158] sm:$0xff] %v1086_v30 }
 0x1de   :  { %v1087_v60 = vadd.f32 %v788_v33, %v571_v35 }
 0x1e0   :  { %1151 = vst [vmem:[#allocation11 + $0x160] sm:$0xff] %v1087_v60  ;;  %v1013_v37 = vpop.f32.mrf.mxu3 }
 0x1e1   :  { %v1014_v39 = vadd.f32 %v1013_v37, %v900_v10  ;;  %v585_v37 = vld [vmem:[#allocation11 + $0x1d0] sm:$0xff] }
 0x1e2   :  { %v903_v40 = vpop.f32.mrf.mxu2 }
 0x1e3   :  { %v1088_v42 = vadd.f32 %v1014_v39, %v572_v13  ;;  %v677_v44 = vpop.f32.mrf.mxu0  ;;  %v799_v56 = vpop.f32.mrf.mxu1 }
 0x1e4   :  { %v791_v8 = vadd.f32 %v790_v19, %v677_v44  ;;  %v586_v44 = vld [vmem:[#allocation11 + $0x1d8] sm:$0xff] }
 0x1e5   :  { %1152 = vst [vmem:[#allocation11 + $0x168] sm:$0xff] %v1088_v42 }
 0x1e6   :  { %v1089_v45 = vadd.f32 %v791_v8, %v573_v7 }
 0x1e8   :  { %1153 = vst [vmem:[#allocation11 + $0x170] sm:$0xff] %v1089_v45  ;;  %v1016_v47 = vpop.f32.mrf.mxu3 }
 0x1e9   :  { %v1017_v28 = vadd.f32 %v1016_v47, %v903_v40 }
 0x1ea   :  { %v906_v49 = vpop.f32.mrf.mxu2 }
 0x1eb   :  { %v1090_v53 = vadd.f32 %v1017_v28, %v574_v55  ;;  %v680_v50 = vpop.f32.mrf.mxu0  ;;  %v802_v3 = vpop.f32.mrf.mxu1  ;;  %v587_v55 = vld [vmem:[#allocation11 + $0x1e0] sm:$0xff] }
 0x1ec   :  { %v794_v5 = vadd.f32 %v793_v4, %v680_v50 }
 0x1ed   :  { %1154 = vst [vmem:[#allocation11 + $0x178] sm:$0xff] %v1090_v53  ;;  %v588_v53 = vld [vmem:[#allocation11 + $0x1e8] sm:$0xff] }
 0x1ee   :  { %v1091_v54 = vadd.f32 %v794_v5, %v575_v52 }
 0x1f0   :  { %1155 = vst [vmem:[#allocation11 + $0x180] sm:$0xff] %v1091_v54  ;;  %v1019_v59 = vpop.f32.mrf.mxu3 }
 0x1f1   :  { %v1020_v21 = vadd.f32 %v1019_v59, %v906_v49 }
 0x1f2   :  { %v909_v22 = vpop.f32.mrf.mxu2 }
 0x1f3   :  { %v1092_v61 = vadd.f32 %v1020_v21, %v576_v58  ;;  %v683_v62 = vpop.f32.mrf.mxu0  ;;  %v805_v18 = vpop.f32.mrf.mxu1  ;;  %v589_v58 = vld [vmem:[#allocation11 + $0x1f0] sm:$0xff] }
 0x1f4   :  { %v797_v63 = vadd.f32 %v796_v34, %v683_v62 }
 0x1f5   :  { %1156 = vst [vmem:[#allocation11 + $0x188] sm:$0xff] %v1092_v61  ;;  %v590_v61 = vld [vmem:[#allocation11 + $0x1f8] sm:$0xff] }
 0x1f6   :  { %v1093_v0 = vadd.f32 %v797_v63, %v577_v48 }
 0x1f8   :  { %1157 = vst [vmem:[#allocation11 + $0x190] sm:$0xff] %v1093_v0  ;;  %v1022_v2 = vpop.f32.mrf.mxu3 }
 0x1f9   :  { %v1023_v51 = vadd.f32 %v1022_v2, %v909_v22 }
 0x1fa   :  { %v912_v46 = vpop.f32.mrf.mxu2 }
 0x1fb   :  { %v1094_v17 = vadd.f32 %v1023_v51, %v578_v57  ;;  %v686_v6 = vpop.f32.mrf.mxu0  ;;  %v808_v10 = vpop.f32.mrf.mxu1 }
 0x1fc   :  { %v800_v41 = vadd.f32 %v799_v56, %v686_v6 }
 0x1fd   :  { %1158 = vst [vmem:[#allocation11 + $0x198] sm:$0xff] %v1094_v17 }
 0x1fe   :  { %v1095_v43 = vadd.f32 %v800_v41, %v579_v12 }
 0x200   :  { %1159 = vst [vmem:[#allocation11 + $0x1a0] sm:$0xff] %v1095_v43  ;;  %v1025_v36 = vpop.f32.mrf.mxu3 }
 0x201   :  { %v1026_v14 = vadd.f32 %v1025_v36, %v912_v46 }
 0x202   :  { %v915_v31 = vpop.f32.mrf.mxu2 }
 0x203   :  { %v1096_v16 = vadd.f32 %v1026_v14, %v580_v9  ;;  %v689_v26 = vpop.f32.mrf.mxu0  ;;  %v811_v42 = vpop.f32.mrf.mxu1 }
 0x204   :  { %v803_v24 = vadd.f32 %v802_v3, %v689_v26 }
 0x205   :  { %1160 = vst [vmem:[#allocation11 + $0x1a8] sm:$0xff] %v1096_v16 }
 0x206   :  { %v1097_v20 = vadd.f32 %v803_v24, %v581_v11 }
 0x208   :  { %1161 = vst [vmem:[#allocation11 + $0x1b0] sm:$0xff] %v1097_v20  ;;  %v1028_v38 = vpop.f32.mrf.mxu3 }
 0x209   :  { %v1029_v19 = vadd.f32 %v1028_v38, %v915_v31 }
 0x20a   :  { %v918_v23 = vpop.f32.mrf.mxu2 }
 0x20b   :  { %v1098_v15 = vadd.f32 %v1029_v19, %v582_v1  ;;  %v692_v25 = vpop.f32.mrf.mxu0  ;;  %v814_v5 = vpop.f32.mrf.mxu1 }
 0x20c   :  { %v806_v29 = vadd.f32 %v805_v18, %v692_v25 }
 0x20d   :  { %1162 = vst [vmem:[#allocation11 + $0x1b8] sm:$0xff] %v1098_v15 }
 0x20e   :  { %v1099_v30 = vadd.f32 %v806_v29, %v583_v27 }
 0x210   :  { %1163 = vst [vmem:[#allocation11 + $0x1c0] sm:$0xff] %v1099_v30  ;;  %v1031_v35 = vpop.f32.mrf.mxu3 }
 0x211   :  { %v1032_v4 = vadd.f32 %v1031_v35, %v918_v23 }
 0x212   :  { %v921_v33 = vpop.f32.mrf.mxu2 }
 0x213   :  { %v1100_v60 = vadd.f32 %v1032_v4, %v584_v32  ;;  %v695_v13 = vpop.f32.mrf.mxu0 }
 0x214   :  { %v809_v39 = vadd.f32 %v808_v10, %v695_v13 }
 0x215   :  { %1164 = vst [vmem:[#allocation11 + $0x1c8] sm:$0xff] %v1100_v60 }
 0x216   :  { %v1101_v40 = vadd.f32 %v809_v39, %v585_v37 }
 0x218   :  { %1165 = vst [vmem:[#allocation11 + $0x1d0] sm:$0xff] %v1101_v40  ;;  %v1034_v7 = vpop.f32.mrf.mxu3 }
 0x219   :  { %v1035_v8 = vadd.f32 %v1034_v7, %v921_v33 }
 0x21a   :  { %v924_v28 = vpop.f32.mrf.mxu2 }
 0x21b   :  { %v1102_v34 = vadd.f32 %v1035_v8, %v586_v44  ;;  %v698_v45 = vpop.f32.mrf.mxu0 }
 0x21c   :  { %v812_v47 = vadd.f32 %v811_v42, %v698_v45 }
 0x21d   :  { %1166 = vst [vmem:[#allocation11 + $0x1d8] sm:$0xff] %v1102_v34 }
 0x21e   :  { %v1103_v49 = vadd.f32 %v812_v47, %v587_v55 }
 0x220   :  { %1167 = vst [vmem:[#allocation11 + $0x1e0] sm:$0xff] %v1103_v49  ;;  %v1037_v50 = vpop.f32.mrf.mxu3 }
 0x221   :  { %v1038_v52 = vadd.f32 %v1037_v50, %v924_v28 }
 0x222   :  { %v927_v22 = vpop.f32.mrf.mxu2 }
 0x223   :  { %v1104_v54 = vadd.f32 %v1038_v52, %v588_v53  ;;  %v701_v56 = vpop.f32.mrf.mxu0 }
 0x224   :  { %v815_v59 = vadd.f32 %v814_v5, %v701_v56 }
 0x225   :  { %1168 = vst [vmem:[#allocation11 + $0x1e8] sm:$0xff] %v1104_v54 }
 0x226   :  { %v1105_v21 = vadd.f32 %v815_v59, %v589_v58 }
 0x228   :  { %1169 = vst [vmem:[#allocation11 + $0x1f0] sm:$0xff] %v1105_v21  ;;  %v1040_v62 = vpop.f32.mrf.mxu3 }
 0x229   :  { %v1041_v48 = vadd.f32 %v1040_v62, %v927_v22 }
 0x22b   :  { %v1106_v63 = vadd.f32 %v1041_v48, %v590_v61 }
 0x22d   :  { %1170 = vst [vmem:[#allocation11 + $0x1f8] sm:$0xff] %v1106_v63 }
 0x22e PF:  { %p1171_p4 = scmp.ne.s32.totalorder %s5171_s2, %s4257_s11 }
 0x230   :  { %p1172_p5 = pnand %p1171_p4, %p166_p2 }
 0x232   :  { %1175 = sbr.rel (%p1172_p5) target bundleno = 985 (0x3d9), region = 29 }
 0x237   :  { %v1499_v0 = vld [vmem:[#allocation9 + $0xf8] sm:$0xff]  ;;  %v1497_v2 = vld [vmem:[#allocation9 + $0xe8] sm:$0xff]  ;;  %v1498_v17 = vld [vmem:[#allocation9 + $0xf0] sm:$0xff]  ;;  %v1176_v55 = vlaneseq }
 0x238   :  { %v1531_v57 = vld [vmem:[#allocation9 + $0x1f8] sm:$0xff]  ;;  %1758 = vmatpush.msra.mxu2 %v1499_v0  ;;  %v1529_v51 = vld [vmem:[#allocation9 + $0x1e8] sm:$0xff]  ;;  %v1530_v6 = vld [vmem:[#allocation9 + $0x1f0] sm:$0xff]  ;;  %1532 = vmatpush.msra.mxu0 %v1498_v17 }
 0x239   :  { %1871 = vmatpush.msra.mxu3 %v1531_v57  ;;  %v1495_v3 = vld [vmem:[#allocation9 + $0xd8] sm:$0xff]  ;;  %v1496_v12 = vld [vmem:[#allocation9 + $0xe0] sm:$0xff]  ;;  %1645 = vmatpush.msra.mxu1 %v1530_v6  ;;  %v1493_v43 = vld [vmem:[#allocation9 + $0xc8] sm:$0xff]  ;;  %v4857_v56 = vand.u32 127, %v1176_v55  ;;  %v4859_v58 = vshrl.u32 %v1176_v55, 7 }
 0x23a   :  { %v1527_v46 = vld [vmem:[#allocation9 + $0x1d8] sm:$0xff]  ;;  %1759 = vmatpush.msra.mxu2 %v1497_v2  ;;  %v1528_v41 = vld [vmem:[#allocation9 + $0x1e0] sm:$0xff]  ;;  %v1525_v9 = vld [vmem:[#allocation9 + $0x1c8] sm:$0xff]  ;;  %1533 = vmatpush.msra.mxu0 %v1496_v12 }
 0x23b   :  { %1872 = vmatpush.msra.mxu3 %v1529_v51  ;;  %v1494_v36 = vld [vmem:[#allocation9 + $0xd0] sm:$0xff]  ;;  %1646 = vmatpush.msra.mxu1 %v1528_v41  ;;  %v1491_v31 = vld [vmem:[#allocation9 + $0xb8] sm:$0xff]  ;;  %v1492_v26 = vld [vmem:[#allocation9 + $0xc0] sm:$0xff]  ;;  %vm1212_vm0 = vcmp.ge.s32.totalorder %v4857_v56, %v4859_v58  ;;  %v1182_v12 = vadd.s32 16, %v4859_v58 }
 0x23c   :  { %1760 = vmatpush.msra.mxu2 %v1495_v3  ;;  %v1526_v14 = vld [vmem:[#allocation9 + $0x1d0] sm:$0xff]  ;;  %v1523_v16 = vld [vmem:[#allocation9 + $0x1b8] sm:$0xff]  ;;  %v1524_v11 = vld [vmem:[#allocation9 + $0x1c0] sm:$0xff]  ;;  %1534 = vmatpush.msra.mxu0 %v1494_v36 }
 0x23d   :  { %1873 = vmatpush.msra.mxu3 %v1527_v46  ;;  %1647 = vmatpush.msra.mxu1 %v1526_v14  ;;  %v1489_v18 = vld [vmem:[#allocation9 + $0xa8] sm:$0xff]  ;;  %v1490_v20 = vld [vmem:[#allocation9 + $0xb0] sm:$0xff]  ;;  %v1487_v38 = vld [vmem:[#allocation9 + $0x98] sm:$0xff]  ;;  %v1181_v46 = vadd.s32 8, %v4859_v58  ;;  %vm1216_vm4 = vcmp.ge.s32.totalorder %v4857_v56, %v1182_v12 }
 0x23e   :  { %1761 = vmatpush.msra.mxu2 %v1493_v43  ;;  %v1521_v24 = vld [vmem:[#allocation9 + $0x1a8] sm:$0xff]  ;;  %v1522_v1 = vld [vmem:[#allocation9 + $0x1b0] sm:$0xff]  ;;  %1535 = vmatpush.msra.mxu0 %v1492_v26  ;;  %v1519_v19 = vld [vmem:[#allocation9 + $0x198] sm:$0xff] }
 0x23f   :  { %1874 = vmatpush.msra.mxu3 %v1525_v9  ;;  %1648 = vmatpush.msra.mxu1 %v1524_v11  ;;  %v1488_v23 = vld [vmem:[#allocation9 + $0xa0] sm:$0xff]  ;;  %v1485_v25 = vld [vmem:[#allocation9 + $0x88] sm:$0xff]  ;;  %v1486_v29 = vld [vmem:[#allocation9 + $0x90] sm:$0xff]  ;;  %vm1214_vm1 = vcmp.ge.s32.totalorder %v4857_v56, %v1181_v46  ;;  %v1183_v9 = vadd.s32 24, %v4859_v58  ;;  %v1185_v11 = vadd.s32 40, %v4859_v58 }
 0x240   :  { %1762 = vmatpush.msra.mxu2 %v1491_v31  ;;  %v1520_v15 = vld [vmem:[#allocation9 + $0x1a0] sm:$0xff]  ;;  %1536 = vmatpush.msra.mxu0 %v1490_v20  ;;  %v1517_v27 = vld [vmem:[#allocation9 + $0x188] sm:$0xff]  ;;  %v1518_v10 = vld [vmem:[#allocation9 + $0x190] sm:$0xff]  ;;  %v1184_v31 = vadd.s32 32, %v4859_v58  ;;  %v1186_v20 = vadd.s32 48, %v4859_v58 }
 0x241   :  { %1875 = vmatpush.msra.mxu3 %v1523_v16  ;;  %1649 = vmatpush.msra.mxu1 %v1522_v1  ;;  %v1483_v30 = vld [vmem:[#allocation9 + $0x78] sm:$0xff]  ;;  %v1484_v35 = vld [vmem:[#allocation9 + $0x80] sm:$0xff]  ;;  %v1481_v33 = vld [vmem:[#allocation9 + $0x68] sm:$0xff]  ;;  %vm1218_vm6 = vcmp.ge.s32.totalorder %v4857_v56, %v1183_v9  ;;  %vm1222_vm8 = vcmp.ge.s32.totalorder %v4857_v56, %v1185_v11 }
 0x242   :  { %1763 = vmatpush.msra.mxu2 %v1489_v18  ;;  %1537 = vmatpush.msra.mxu0 %v1488_v23  ;;  %v1515_v32 = vld [vmem:[#allocation9 + $0x178] sm:$0xff]  ;;  %v1516_v4 = vld [vmem:[#allocation9 + $0x180] sm:$0xff]  ;;  %v1513_v60 = vld [vmem:[#allocation9 + $0x168] sm:$0xff]  ;;  %vm1220_vm7 = vcmp.ge.s32.totalorder %v4857_v56, %v1184_v31  ;;  %vm1224_vm5 = vcmp.ge.s32.totalorder %v4857_v56, %v1186_v20 }
 0x243   :  { %1876 = vmatpush.msra.mxu3 %v1521_v24  ;;  %1650 = vmatpush.msra.mxu1 %v1520_v15  ;;  %v1482_v13 = vld [vmem:[#allocation9 + $0x70] sm:$0xff]  ;;  %v1479_v39 = vld [vmem:[#allocation9 + $0x58] sm:$0xff]  ;;  %v1480_v42 = vld [vmem:[#allocation9 + $0x60] sm:$0xff] }
 0x244   :  { %1764 = vmatpush.msra.mxu2 %v1487_v38  ;;  %1538 = vmatpush.msra.mxu0 %v1486_v29  ;;  %v1514_v37 = vld [vmem:[#allocation9 + $0x170] sm:$0xff]  ;;  %v1511_v40 = vld [vmem:[#allocation9 + $0x158] sm:$0xff]  ;;  %v1512_v44 = vld [vmem:[#allocation9 + $0x160] sm:$0xff] }
 0x245   :  { %1877 = vmatpush.msra.mxu3 %v1519_v19  ;;  %1651 = vmatpush.msra.mxu1 %v1518_v10  ;;  %v1477_v7 = vld [vmem:[#allocation9 + $0x48] sm:$0xff]  ;;  %v1478_v34 = vld [vmem:[#allocation9 + $0x50] sm:$0xff]  ;;  %v1475_v47 = vld [vmem:[#allocation9 + $0x38] sm:$0xff]  ;;  %v1187_v19 = vadd.s32 56, %v4859_v58  ;;  %v1189_v10 = vadd.s32 72, %v4859_v58 }
 0x246   :  { %1765 = vmatpush.msra.mxu2 %v1485_v25  ;;  %1539 = vmatpush.msra.mxu0 %v1484_v35  ;;  %v1509_v8 = vld [vmem:[#allocation9 + $0x148] sm:$0xff]  ;;  %v1510_v45 = vld [vmem:[#allocation9 + $0x150] sm:$0xff]  ;;  %v1507_v28 = vld [vmem:[#allocation9 + $0x138] sm:$0xff]  ;;  %v1188_v25 = vadd.s32 64, %v4859_v58  ;;  %v1190_v35 = vadd.s32 80, %v4859_v58 }
 0x247   :  { %1878 = vmatpush.msra.mxu3 %v1517_v27  ;;  %1652 = vmatpush.msra.mxu1 %v1516_v4  ;;  %v1476_v49 = vld [vmem:[#allocation9 + $0x40] sm:$0xff]  ;;  %v1473_v50 = vld [vmem:[#allocation9 + $0x28] sm:$0xff]  ;;  %v1474_v5 = vld [vmem:[#allocation9 + $0x30] sm:$0xff]  ;;  %vm1226_vm3 = vcmp.ge.s32.totalorder %v4857_v56, %v1187_v19  ;;  %vm1230_vm9 = vcmp.ge.s32.totalorder %v4857_v56, %v1189_v10 }
 0x248   :  { %1766 = vmatpush.msra.mxu2 %v1483_v30  ;;  %1540 = vmatpush.msra.mxu0 %v1482_v13  ;;  %v1508_v53 = vld [vmem:[#allocation9 + $0x140] sm:$0xff]  ;;  %v1505_v52 = vld [vmem:[#allocation9 + $0x128] sm:$0xff]  ;;  %v1506_v54 = vld [vmem:[#allocation9 + $0x130] sm:$0xff]  ;;  %vm1228_vm2 = vcmp.ge.s32.totalorder %v4857_v56, %v1188_v25  ;;  %vm1232_vm10 = vcmp.ge.s32.totalorder %v4857_v56, %v1190_v35 }
 0x249   :  { %1879 = vmatpush.msra.mxu3 %v1515_v32  ;;  %1653 = vmatpush.msra.mxu1 %v1514_v37  ;;  %v1471_v59 = vld [vmem:[#allocation9 + $0x18] sm:$0xff]  ;;  %v1472_v22 = vld [vmem:[#allocation9 + $0x20] sm:$0xff]  ;;  %v1469_v62 = vld [vmem:[#allocation9 + $0x8] sm:$0xff] }
 0x24a   :  { %1767 = vmatpush.msra.mxu2 %v1481_v33  ;;  %1541 = vmatpush.msra.mxu0 %v1480_v42  ;;  %v1503_v21 = vld [vmem:[#allocation9 + $0x118] sm:$0xff]  ;;  %v1504_v61 = vld [vmem:[#allocation9 + $0x120] sm:$0xff]  ;;  %v1501_v48 = vld [vmem:[#allocation9 + $0x108] sm:$0xff] }
 0x24b   :  { %1880 = vmatpush.msra.mxu3 %v1513_v60  ;;  %1654 = vmatpush.msra.mxu1 %v1512_v44  ;;  %v1276_v63 = vld [vmem:[#allocation6] sm:$0xff]  ;;  %v1277_v0 = vld [vmem:[#allocation6 + $0x8] sm:$0xff]  ;;  %v1470_v57 = vld [vmem:[#allocation9 + $0x10] sm:$0xff]  ;;  %v1191_v60 = vadd.s32 88, %v4859_v58  ;;  %v1193_v44 = vadd.s32 104, %v4859_v58 }
 0x24c   :  { %1768 = vmatpush.msra.mxu2 %v1479_v39  ;;  %1542 = vmatpush.msra.mxu0 %v1478_v34  ;;  %v1502_v2 = vld [vmem:[#allocation9 + $0x110] sm:$0xff]  ;;  %v1468_v51 = vld [vmem:[#allocation9] sm:$0xff]  ;;  %v1279_v6 = vld [vmem:[#allocation6 + $0x18] sm:$0xff]  ;;  %v1192_v39 = vadd.s32 96, %v4859_v58  ;;  %v1194_v34 = vadd.s32 112, %v4859_v58 }
 0x24d   :  { %1881 = vmatpush.msra.mxu3 %v1511_v40  ;;  %1655 = vmatpush.msra.mxu1 %v1510_v45  ;;  %v1500_v3 = vld [vmem:[#allocation9 + $0x100] sm:$0xff]  ;;  %v1278_v17 = vld [vmem:[#allocation6 + $0x10] sm:$0xff]  ;;  %v1281_v43 = vld [vmem:[#allocation6 + $0x28] sm:$0xff]  ;;  %vm1234_vm11 = vcmp.ge.s32.totalorder %v4857_v56, %v1191_v60  ;;  %vm1238_vm13 = vcmp.ge.s32.totalorder %v4857_v56, %v1193_v44 }
 0x24e   :  { %1769 = vmatpush.msra.mxu2 %v1477_v7  ;;  %1543 = vmatpush.msra.mxu0 %v1476_v49  ;;  %v1280_v41 = vld [vmem:[#allocation6 + $0x20] sm:$0xff]  ;;  %v1282_v36 = vld [vmem:[#allocation6 + $0x30] sm:$0xff]  ;;  %v1283_v14 = vld [vmem:[#allocation6 + $0x38] sm:$0xff]  ;;  %vm1236_vm12 = vcmp.ge.s32.totalorder %v4857_v56, %v1192_v39  ;;  %vm1240_vm14 = vcmp.ge.s32.totalorder %v4857_v56, %v1194_v34 }
 0x24f   :  { %1882 = vmatpush.msra.mxu3 %v1509_v8  ;;  %1656 = vmatpush.msra.mxu1 %v1508_v53  ;;  %v1284_v16 = vld [vmem:[#allocation6 + $0x40] sm:$0xff]  ;;  %v1285_v26 = vld [vmem:[#allocation6 + $0x48] sm:$0xff]  ;;  %v1286_v18 = vld [vmem:[#allocation6 + $0x50] sm:$0xff]  ;;  %v4900_v53 = vadd.s32 128, %v4857_v56 }
 0x250   :  { %1770 = vmatpush.msra.mxu2 %v1475_v47  ;;  %1544 = vmatpush.msra.mxu0 %v1474_v5  ;;  %v1287_v24 = vld [vmem:[#allocation6 + $0x58] sm:$0xff]  ;;  %v1288_v1 = vld [vmem:[#allocation6 + $0x60] sm:$0xff]  ;;  %v1289_v38 = vld [vmem:[#allocation6 + $0x68] sm:$0xff]  ;;  %v1195_v47 = vadd.s32 120, %v4859_v58  ;;  %v4176_v5 = vmov 0.0  }
 0x251   :  { %1883 = vmatpush.msra.mxu3 %v1507_v28  ;;  %1657 = vmatpush.msra.mxu1 %v1506_v54  ;;  %v1290_v23 = vld [vmem:[#allocation6 + $0x70] sm:$0xff]  ;;  %v1291_v15 = vld [vmem:[#allocation6 + $0x78] sm:$0xff]  ;;  %v1292_v27 = vld [vmem:[#allocation6 + $0x80] sm:$0xff] }
 0x252   :  { %1771 = vmatpush.msra.mxu2 %v1473_v50  ;;  %1545 = vmatpush.msra.mxu0 %v1472_v22  ;;  %v1293_v29 = vld [vmem:[#allocation6 + $0x88] sm:$0xff]  ;;  %v1294_v30 = vld [vmem:[#allocation6 + $0x90] sm:$0xff]  ;;  %v1295_v32 = vld [vmem:[#allocation6 + $0x98] sm:$0xff]  ;;  %vm1242_vm15 = vcmp.ge.s32.totalorder %v4857_v56, %v1195_v47  ;;  %v1196_v50 = vadd.s32 128, %v4859_v58  ;;  %v1197_v22 = vadd.s32 136, %v4859_v58 }
 0x253   :  { %1884 = vmatpush.msra.mxu3 %v1505_v52  ;;  %1658 = vmatpush.msra.mxu1 %v1504_v61  ;;  %v1296_v4 = vld [vmem:[#allocation6 + $0xa0] sm:$0xff]  ;;  %v1297_v33 = vld [vmem:[#allocation6 + $0xa8] sm:$0xff]  ;;  %v1298_v13 = vld [vmem:[#allocation6 + $0xb0] sm:$0xff] }
 0x254   :  { %1772 = vmatpush.msra.mxu2 %v1471_v59  ;;  %1546 = vmatpush.msra.mxu0 %v1470_v57  ;;  %v1299_v37 = vld [vmem:[#allocation6 + $0xb8] sm:$0xff]  ;;  %v1300_v40 = vld [vmem:[#allocation6 + $0xc0] sm:$0xff]  ;;  %v1301_v42 = vld [vmem:[#allocation6 + $0xc8] sm:$0xff] }
 0x255   :  { %1885 = vmatpush.msra.mxu3 %v1503_v21  ;;  %1659 = vmatpush.msra.mxu1 %v1502_v2  ;;  %v1302_v7 = vld [vmem:[#allocation6 + $0xd0] sm:$0xff]  ;;  %v1303_v8 = vld [vmem:[#allocation6 + $0xd8] sm:$0xff]  ;;  %v1304_v45 = vld [vmem:[#allocation6 + $0xe0] sm:$0xff] }
 0x256   :  { %1773 = vmatpush.msra.mxu2 %v1469_v62  ;;  %1547 = vmatpush.msra.mxu0 %v1468_v51  ;;  %v1305_v55 = vld [vmem:[#allocation6 + $0xe8] sm:$0xff]  ;;  %v1306_v28 = vld [vmem:[#allocation6 + $0xf0] sm:$0xff]  ;;  %v1307_v49 = vld [vmem:[#allocation6 + $0xf8] sm:$0xff] }
 0x257   :  { %1886 = vmatpush.msra.mxu3 %v1501_v48  ;;  %4012 = vmatmul.msk.f32.vlgmr.msra.gmra.mxu2 %vm1212_vm0, %v1276_v63  ;;  %v1309_v52 = vld [vmem:[#allocation6 + $0x108] sm:$0xff]  ;;  %v1404_v59 = vld [vmem:[#allocation11] sm:$0xff]  ;;  %v1311_v57 = vld [vmem:[#allocation6 + $0x118] sm:$0xff] }
 0x258   :  { %1887 = vmatmul.f32.vlgmr.msra.gmra.mxu3 %v1277_v0  ;;  %1660 = vmatpush.msra.mxu1 %v1500_v3  ;;  %v1405_v62 = vld [vmem:[#allocation11 + $0x8] sm:$0xff]  ;;  %v1406_v3 = vld [vmem:[#allocation11 + $0x10] sm:$0xff] }
 0x259   :  { %3980 = vmatmul.msk.f32.vlgmr.msra.gmra.mxu0 %vm1212_vm0, %v1276_v63  ;;  %1661 = vmatmul.f32.vlgmr.msra.gmra.mxu1 %v1277_v0  ;;  %vm1245_vm0 = vcmp.ge.s32.totalorder %v4900_v53, %v1196_v50 }
 0x25f   :  { %4013 = vmatmul.msk.f32.gmra.mxu2 %vm1214_vm1, %v1278_v17 }
 0x260   :  { %1890 = vmatmul.f32.gmra.mxu3 %v1279_v6 }
 0x261   :  { %3981 = vmatmul.msk.f32.gmra.mxu0 %vm1214_vm1, %v1278_v17  ;;  %1664 = vmatmul.f32.gmra.mxu1 %v1279_v6  ;;  %vm1247_vm1 = vcmp.ge.s32.totalorder %v4900_v53, %v1197_v22  ;;  %v1198_v17 = vadd.s32 144, %v4859_v58 }
 0x267   :  { %4014 = vmatmul.msk.f32.gmra.mxu2 %vm1216_vm4, %v1280_v41 }
 0x268   :  { %1893 = vmatmul.f32.gmra.mxu3 %v1281_v43 }
 0x269   :  { %3982 = vmatmul.msk.f32.gmra.mxu0 %vm1216_vm4, %v1280_v41  ;;  %1667 = vmatmul.f32.gmra.mxu1 %v1281_v43  ;;  %v1407_v41 = vld [vmem:[#allocation11 + $0x18] sm:$0xff]  ;;  %vm1249_vm4 = vcmp.ge.s32.totalorder %v4900_v53, %v1198_v17 }
 0x26f   :  { %4015 = vmatmul.msk.f32.gmra.mxu2 %vm1218_vm6, %v1282_v36 }
 0x270   :  { %1896 = vmatmul.f32.gmra.mxu3 %v1283_v14 }
 0x271   :  { %3983 = vmatmul.msk.f32.gmra.mxu0 %vm1218_vm6, %v1282_v36  ;;  %1670 = vmatmul.f32.gmra.mxu1 %v1283_v14  ;;  %v1313_v14 = vld [vmem:[#allocation6 + $0x128] sm:$0xff] }
 0x277   :  { %4016 = vmatmul.msk.f32.gmra.mxu2 %vm1220_vm7, %v1284_v16 }
 0x278   :  { %1899 = vmatmul.f32.gmra.mxu3 %v1285_v26 }
 0x279   :  { %3984 = vmatmul.msk.f32.gmra.mxu0 %vm1220_vm7, %v1284_v16  ;;  %1673 = vmatmul.f32.gmra.mxu1 %v1285_v26  ;;  %v1408_v26 = vld [vmem:[#allocation11 + $0x20] sm:$0xff] }
 0x27f   :  { %4017 = vmatmul.msk.f32.gmra.mxu2 %vm1222_vm8, %v1286_v18 }
 0x280   :  { %1902 = vmatmul.f32.gmra.mxu3 %v1287_v24 }
 0x281   :  { %3985 = vmatmul.msk.f32.gmra.mxu0 %vm1222_vm8, %v1286_v18  ;;  %1676 = vmatmul.f32.gmra.mxu1 %v1287_v24  ;;  %v1199_v18 = vadd.s32 152, %v4859_v58 }
 0x283   :  { %vm1251_vm6 = vcmp.ge.s32.totalorder %v4900_v53, %v1199_v18 }
 0x287   :  { %4018 = vmatmul.msk.f32.gmra.mxu2 %vm1224_vm5, %v1288_v1 }
 0x288   :  { %1905 = vmatmul.f32.gmra.mxu3 %v1289_v38 }
 0x289   :  { %3986 = vmatmul.msk.f32.gmra.mxu0 %vm1224_vm5, %v1288_v1  ;;  %1679 = vmatmul.f32.gmra.mxu1 %v1289_v38  ;;  %v1409_v1 = vld [vmem:[#allocation11 + $0x28] sm:$0xff] }
 0x28f   :  { %4019 = vmatmul.msk.f32.gmra.mxu2 %vm1226_vm3, %v1290_v23 }
 0x290   :  { %1908 = vmatmul.f32.gmra.mxu3 %v1291_v15 }
 0x291   :  { %3987 = vmatmul.msk.f32.gmra.mxu0 %vm1226_vm3, %v1290_v23  ;;  %1682 = vmatmul.f32.gmra.mxu1 %v1291_v15  ;;  %v1315_v15 = vld [vmem:[#allocation6 + $0x138] sm:$0xff] }
 0x297   :  { %4020 = vmatmul.msk.f32.gmra.mxu2 %vm1228_vm2, %v1292_v27 }
 0x298   :  { %1911 = vmatmul.f32.gmra.mxu3 %v1293_v29 }
 0x299   :  { %3988 = vmatmul.msk.f32.gmra.mxu0 %vm1228_vm2, %v1292_v27  ;;  %1685 = vmatmul.f32.gmra.mxu1 %v1293_v29  ;;  %v1410_v29 = vld [vmem:[#allocation11 + $0x30] sm:$0xff] }
 0x29f   :  { %4021 = vmatmul.msk.f32.gmra.mxu2 %vm1230_vm9, %v1294_v30 }
 0x2a0   :  { %1914 = vmatmul.f32.gmra.mxu3 %v1295_v32 }
 0x2a1   :  { %3989 = vmatmul.msk.f32.gmra.mxu0 %vm1230_vm9, %v1294_v30  ;;  %1688 = vmatmul.f32.gmra.mxu1 %v1295_v32  ;;  %v1200_v30 = vadd.s32 160, %v4859_v58 }
 0x2a3   :  { %vm1253_vm7 = vcmp.ge.s32.totalorder %v4900_v53, %v1200_v30 }
 0x2a7   :  { %4022 = vmatmul.msk.f32.gmra.mxu2 %vm1232_vm10, %v1296_v4 }
 0x2a8   :  { %1917 = vmatmul.f32.gmra.mxu3 %v1297_v33 }
 0x2a9   :  { %3990 = vmatmul.msk.f32.gmra.mxu0 %vm1232_vm10, %v1296_v4  ;;  %1691 = vmatmul.f32.gmra.mxu1 %v1297_v33  ;;  %v1411_v4 = vld [vmem:[#allocation11 + $0x38] sm:$0xff] }
 0x2af   :  { %4023 = vmatmul.msk.f32.gmra.mxu2 %vm1234_vm11, %v1298_v13 }
 0x2b0   :  { %1920 = vmatmul.f32.gmra.mxu3 %v1299_v37 }
 0x2b1   :  { %3991 = vmatmul.msk.f32.gmra.mxu0 %vm1234_vm11, %v1298_v13  ;;  %1694 = vmatmul.f32.gmra.mxu1 %v1299_v37  ;;  %v1317_v37 = vld [vmem:[#allocation6 + $0x148] sm:$0xff] }
 0x2b7   :  { %4024 = vmatmul.msk.f32.gmra.mxu2 %vm1236_vm12, %v1300_v40 }
 0x2b8   :  { %1923 = vmatmul.f32.gmra.mxu3 %v1301_v42 }
 0x2b9   :  { %3992 = vmatmul.msk.f32.gmra.mxu0 %vm1236_vm12, %v1300_v40  ;;  %1697 = vmatmul.f32.gmra.mxu1 %v1301_v42  ;;  %v1412_v42 = vld [vmem:[#allocation11 + $0x40] sm:$0xff] }
 0x2bf   :  { %4025 = vmatmul.msk.f32.gmra.mxu2 %vm1238_vm13, %v1302_v7 }
 0x2c0   :  { %1926 = vmatmul.f32.gmra.mxu3 %v1303_v8 }
 0x2c1   :  { %3993 = vmatmul.msk.f32.gmra.mxu0 %vm1238_vm13, %v1302_v7  ;;  %1700 = vmatmul.f32.gmra.mxu1 %v1303_v8  ;;  %v1201_v7 = vadd.s32 168, %v4859_v58 }
 0x2c3   :  { %vm1255_vm8 = vcmp.ge.s32.totalorder %v4900_v53, %v1201_v7 }
 0x2c7   :  { %4026 = vmatmul.msk.f32.gmra.mxu2 %vm1240_vm14, %v1304_v45 }
 0x2c8   :  { %1929 = vmatmul.f32.gmra.mxu3 %v1305_v55 }
 0x2c9   :  { %3994 = vmatmul.msk.f32.gmra.mxu0 %vm1240_vm14, %v1304_v45  ;;  %1703 = vmatmul.f32.gmra.mxu1 %v1305_v55  ;;  %v1413_v45 = vld [vmem:[#allocation11 + $0x48] sm:$0xff] }
 0x2cf   :  { %4027 = vmatmul.msk.f32.gmra.mxu2 %vm1242_vm15, %v1306_v28 }
 0x2d0   :  { %1932 = vmatmul.f32.gmra.mxu3 %v1307_v49 }
 0x2d1   :  { %3995 = vmatmul.msk.f32.gmra.mxu0 %vm1242_vm15, %v1306_v28  ;;  %1706 = vmatmul.f32.gmra.mxu1 %v1307_v49  ;;  %v1319_v49 = vld [vmem:[#allocation6 + $0x158] sm:$0xff] }
 0x2d6   :  { %v1549_v54 = vpop.f32.mrf.mxu0  ;;  %v1662_v21 = vpop.f32.mrf.mxu1 }
 0x2d7   :  { %1822 = vmatmul.f32.gmra.mxu2 %v4176_v5  ;;  %v1663_v56 = vadd.f32 %v1662_v21, %v1549_v54  ;;  %v1414_v54 = vld [vmem:[#allocation11 + $0x50] sm:$0xff]  ;;  %v1202_v21 = vadd.s32 176, %v4859_v58 }
 0x2d8   :  { %4028 = vmatmul.msk.f32.gmra.mxu3 %vm1245_vm0, %v1309_v52 }
 0x2d9   :  { %v1984_v63 = vadd.f32 %v1663_v56, %v1404_v59  ;;  %1596 = vmatmul.f32.gmra.mxu0 %v4176_v5  ;;  %3996 = vmatmul.msk.f32.gmra.mxu1 %vm1245_vm0, %v1309_v52  ;;  %vm1257_vm5 = vcmp.ge.s32.totalorder %v4900_v53, %v1202_v21 }
 0x2da   :  { %v1775_v61 = vpop.f32.mrf.mxu2 }
 0x2db   :  { %v1888_v48 = vpop.f32.mrf.mxu3  ;;  %2048 = vst [vmem:[#allocation11] sm:$0xff] %v1984_v63 }
 0x2dc   :  { %v1889_v0 = vadd.f32 %v1888_v48, %v1775_v61  ;;  %v1415_v61 = vld [vmem:[#allocation11 + $0x58] sm:$0xff] }
 0x2de   :  { %v1985_v2 = vadd.f32 %v1889_v0, %v1405_v62  ;;  %v1552_v51 = vpop.f32.mrf.mxu0  ;;  %v1665_v46 = vpop.f32.mrf.mxu1  ;;  %v1321_v0 = vld [vmem:[#allocation6 + $0x168] sm:$0xff] }
 0x2df   :  { %1825 = vmatmul.f32.gmra.mxu2 %v4176_v5  ;;  %v1666_v6 = vadd.f32 %v1665_v46, %v1552_v51  ;;  %v1416_v51 = vld [vmem:[#allocation11 + $0x60] sm:$0xff]  ;;  %v1203_v46 = vadd.s32 184, %v4859_v58 }
 0x2e0   :  { %2049 = vst [vmem:[#allocation11 + $0x8] sm:$0xff] %v1985_v2  ;;  %4029 = vmatmul.msk.f32.gmra.mxu3 %vm1247_vm1, %v1311_v57 }
 0x2e1   :  { %v1986_v9 = vadd.f32 %v1666_v6, %v1406_v3  ;;  %1599 = vmatmul.f32.gmra.mxu0 %v4176_v5  ;;  %3997 = vmatmul.msk.f32.gmra.mxu1 %vm1247_vm1, %v1311_v57  ;;  %vm1259_vm3 = vcmp.ge.s32.totalorder %v4900_v53, %v1203_v46 }
 0x2e2   :  { %v1778_v12 = vpop.f32.mrf.mxu2 }
 0x2e3   :  { %v1891_v43 = vpop.f32.mrf.mxu3  ;;  %2050 = vst [vmem:[#allocation11 + $0x10] sm:$0xff] %v1986_v9 }
 0x2e4   :  { %v1892_v36 = vadd.f32 %v1891_v43, %v1778_v12  ;;  %v1417_v12 = vld [vmem:[#allocation11 + $0x68] sm:$0xff] }
 0x2e6   :  { %v1987_v31 = vadd.f32 %v1892_v36, %v1407_v41  ;;  %v1555_v16 = vpop.f32.mrf.mxu0  ;;  %v1668_v11 = vpop.f32.mrf.mxu1  ;;  %v1323_v36 = vld [vmem:[#allocation6 + $0x178] sm:$0xff] }
 0x2e7   :  { %1828 = vmatmul.f32.gmra.mxu2 %v4176_v5  ;;  %v1669_v24 = vadd.f32 %v1668_v11, %v1555_v16  ;;  %v1418_v16 = vld [vmem:[#allocation11 + $0x70] sm:$0xff]  ;;  %v1204_v11 = vadd.s32 192, %v4859_v58 }
 0x2e8   :  { %2051 = vst [vmem:[#allocation11 + $0x18] sm:$0xff] %v1987_v31  ;;  %4030 = vmatmul.msk.f32.gmra.mxu3 %vm1249_vm4, %v1313_v14 }
 0x2e9   :  { %v1988_v19 = vadd.f32 %v1669_v24, %v1408_v26  ;;  %1602 = vmatmul.f32.gmra.mxu0 %v4176_v5  ;;  %3998 = vmatmul.msk.f32.gmra.mxu1 %vm1249_vm4, %v1313_v14  ;;  %vm1261_vm2 = vcmp.ge.s32.totalorder %v4900_v53, %v1204_v11 }
 0x2ea   :  { %v1781_v20 = vpop.f32.mrf.mxu2 }
 0x2eb   :  { %v1894_v38 = vpop.f32.mrf.mxu3  ;;  %2052 = vst [vmem:[#allocation11 + $0x20] sm:$0xff] %v1988_v19 }
 0x2ec   :  { %v1895_v23 = vadd.f32 %v1894_v38, %v1781_v20  ;;  %v1419_v20 = vld [vmem:[#allocation11 + $0x78] sm:$0xff] }
 0x2ee   :  { %v1989_v25 = vadd.f32 %v1895_v23, %v1409_v1  ;;  %v1558_v27 = vpop.f32.mrf.mxu0  ;;  %v1671_v10 = vpop.f32.mrf.mxu1  ;;  %v1325_v23 = vld [vmem:[#allocation6 + $0x188] sm:$0xff] }
 0x2ef   :  { %1831 = vmatmul.f32.gmra.mxu2 %v4176_v5  ;;  %v1672_v32 = vadd.f32 %v1671_v10, %v1558_v27  ;;  %v1420_v27 = vld [vmem:[#allocation11 + $0x80] sm:$0xff]  ;;  %v1205_v10 = vadd.s32 200, %v4859_v58 }
 0x2f0   :  { %2053 = vst [vmem:[#allocation11 + $0x28] sm:$0xff] %v1989_v25  ;;  %4031 = vmatmul.msk.f32.gmra.mxu3 %vm1251_vm6, %v1315_v15 }
 0x2f1   :  { %v1990_v60 = vadd.f32 %v1672_v32, %v1410_v29  ;;  %1605 = vmatmul.f32.gmra.mxu0 %v4176_v5  ;;  %3999 = vmatmul.msk.f32.gmra.mxu1 %vm1251_vm6, %v1315_v15  ;;  %vm1263_vm9 = vcmp.ge.s32.totalorder %v4900_v53, %v1205_v10 }
 0x2f2   :  { %v1784_v35 = vpop.f32.mrf.mxu2 }
 0x2f3   :  { %v1897_v33 = vpop.f32.mrf.mxu3  ;;  %2054 = vst [vmem:[#allocation11 + $0x30] sm:$0xff] %v1990_v60 }
 0x2f4   :  { %v1898_v13 = vadd.f32 %v1897_v33, %v1784_v35  ;;  %v1421_v35 = vld [vmem:[#allocation11 + $0x88] sm:$0xff] }
 0x2f6   :  { %v1991_v39 = vadd.f32 %v1898_v13, %v1411_v4  ;;  %v1561_v40 = vpop.f32.mrf.mxu0  ;;  %v1674_v44 = vpop.f32.mrf.mxu1  ;;  %v1327_v13 = vld [vmem:[#allocation6 + $0x198] sm:$0xff] }
 0x2f7   :  { %1834 = vmatmul.f32.gmra.mxu2 %v4176_v5  ;;  %v1675_v8 = vadd.f32 %v1674_v44, %v1561_v40  ;;  %v1422_v40 = vld [vmem:[#allocation11 + $0x90] sm:$0xff]  ;;  %v1206_v44 = vadd.s32 208, %v4859_v58 }
 0x2f8   :  { %2055 = vst [vmem:[#allocation11 + $0x38] sm:$0xff] %v1991_v39  ;;  %4032 = vmatmul.msk.f32.gmra.mxu3 %vm1253_vm7, %v1317_v37 }
 0x2f9   :  { %v1992_v47 = vadd.f32 %v1675_v8, %v1412_v42  ;;  %1608 = vmatmul.f32.gmra.mxu0 %v4176_v5  ;;  %4000 = vmatmul.msk.f32.gmra.mxu1 %vm1253_vm7, %v1317_v37  ;;  %vm1265_vm10 = vcmp.ge.s32.totalorder %v4900_v53, %v1206_v44 }
 0x2fa   :  { %v1787_v34 = vpop.f32.mrf.mxu2 }
 0x2fb   :  { %v1900_v55 = vpop.f32.mrf.mxu3  ;;  %2056 = vst [vmem:[#allocation11 + $0x40] sm:$0xff] %v1992_v47 }
 0x2fc   :  { %v1901_v28 = vadd.f32 %v1900_v55, %v1787_v34  ;;  %v1423_v34 = vld [vmem:[#allocation11 + $0x98] sm:$0xff] }
 0x2fe   :  { %v1993_v50 = vadd.f32 %v1901_v28, %v1413_v45  ;;  %v1564_v52 = vpop.f32.mrf.mxu0  ;;  %v1677_v59 = vpop.f32.mrf.mxu1  ;;  %v1329_v28 = vld [vmem:[#allocation6 + $0x1a8] sm:$0xff] }
 0x2ff   :  { %1837 = vmatmul.f32.gmra.mxu2 %v4176_v5  ;;  %v1678_v22 = vadd.f32 %v1677_v59, %v1564_v52  ;;  %v1424_v52 = vld [vmem:[#allocation11 + $0xa0] sm:$0xff]  ;;  %v1207_v59 = vadd.s32 216, %v4859_v58 }
 0x300   :  { %2057 = vst [vmem:[#allocation11 + $0x48] sm:$0xff] %v1993_v50  ;;  %4033 = vmatmul.msk.f32.gmra.mxu3 %vm1255_vm8, %v1319_v49 }
 0x301   :  { %v1994_v48 = vadd.f32 %v1678_v22, %v1414_v54  ;;  %1611 = vmatmul.f32.gmra.mxu0 %v4176_v5  ;;  %4001 = vmatmul.msk.f32.gmra.mxu1 %vm1255_vm8, %v1319_v49  ;;  %vm1267_vm11 = vcmp.ge.s32.totalorder %v4900_v53, %v1207_v59  ;;  %v1435_v59 = vld [vmem:[#allocation11 + $0xf8] sm:$0xff] }
 0x302   :  { %v1790_v56 = vpop.f32.mrf.mxu2 }
 0x303   :  { %v1903_v62 = vpop.f32.mrf.mxu3  ;;  %2058 = vst [vmem:[#allocation11 + $0x50] sm:$0xff] %v1994_v48 }
 0x304   :  { %v1904_v63 = vadd.f32 %v1903_v62, %v1790_v56  ;;  %v1425_v56 = vld [vmem:[#allocation11 + $0xa8] sm:$0xff] }
 0x306   :  { %v1995_v57 = vadd.f32 %v1904_v63, %v1415_v61  ;;  %v1567_v2 = vpop.f32.mrf.mxu0  ;;  %v1680_v3 = vpop.f32.mrf.mxu1  ;;  %v1331_v63 = vld [vmem:[#allocation6 + $0x1b8] sm:$0xff] }
 0x307   :  { %1840 = vmatmul.f32.gmra.mxu2 %v4176_v5  ;;  %v1681_v17 = vadd.f32 %v1680_v3, %v1567_v2  ;;  %v1426_v2 = vld [vmem:[#allocation11 + $0xb0] sm:$0xff]  ;;  %v1208_v3 = vadd.s32 224, %v4859_v58 }
 0x308   :  { %2059 = vst [vmem:[#allocation11 + $0x58] sm:$0xff] %v1995_v57  ;;  %4034 = vmatmul.msk.f32.gmra.mxu3 %vm1257_vm5, %v1321_v0 }
 0x309   :  { %v1996_v43 = vadd.f32 %v1681_v17, %v1416_v51  ;;  %1614 = vmatmul.f32.gmra.mxu0 %v4176_v5  ;;  %4002 = vmatmul.msk.f32.gmra.mxu1 %vm1257_vm5, %v1321_v0  ;;  %vm1269_vm12 = vcmp.ge.s32.totalorder %v4900_v53, %v1208_v3 }
 0x30a   :  { %v1793_v6 = vpop.f32.mrf.mxu2 }
 0x30b   :  { %v1906_v41 = vpop.f32.mrf.mxu3  ;;  %2060 = vst [vmem:[#allocation11 + $0x60] sm:$0xff] %v1996_v43 }
 0x30c   :  { %v1907_v9 = vadd.f32 %v1906_v41, %v1793_v6  ;;  %v1427_v6 = vld [vmem:[#allocation11 + $0xb8] sm:$0xff] }
 0x30e   :  { %v1997_v14 = vadd.f32 %v1907_v9, %v1417_v12  ;;  %v1570_v31 = vpop.f32.mrf.mxu0  ;;  %v1683_v26 = vpop.f32.mrf.mxu1  ;;  %v1333_v9 = vld [vmem:[#allocation6 + $0x1c8] sm:$0xff] }
 0x30f   :  { %1843 = vmatmul.f32.gmra.mxu2 %v4176_v5  ;;  %v1684_v18 = vadd.f32 %v1683_v26, %v1570_v31  ;;  %v1428_v31 = vld [vmem:[#allocation11 + $0xc0] sm:$0xff]  ;;  %v1209_v26 = vadd.s32 232, %v4859_v58 }
 0x310   :  { %2061 = vst [vmem:[#allocation11 + $0x68] sm:$0xff] %v1997_v14  ;;  %4035 = vmatmul.msk.f32.gmra.mxu3 %vm1259_vm3, %v1323_v36 }
 0x311   :  { %v1998_v38 = vadd.f32 %v1684_v18, %v1418_v16  ;;  %1617 = vmatmul.f32.gmra.mxu0 %v4176_v5  ;;  %4003 = vmatmul.msk.f32.gmra.mxu1 %vm1259_vm3, %v1323_v36  ;;  %vm1271_vm13 = vcmp.ge.s32.totalorder %v4900_v53, %v1209_v26  ;;  %v1440_v26 = vld [vmem:[#allocation11 + $0x120] sm:$0xff] }
 0x312   :  { %v1796_v24 = vpop.f32.mrf.mxu2 }
 0x313   :  { %v1909_v1 = vpop.f32.mrf.mxu3  ;;  %2062 = vst [vmem:[#allocation11 + $0x70] sm:$0xff] %v1998_v38 }
 0x314   :  { %v1910_v19 = vadd.f32 %v1909_v1, %v1796_v24  ;;  %v1429_v24 = vld [vmem:[#allocation11 + $0xc8] sm:$0xff] }
 0x316   :  { %v1999_v15 = vadd.f32 %v1910_v19, %v1419_v20  ;;  %v1573_v25 = vpop.f32.mrf.mxu0  ;;  %v1686_v29 = vpop.f32.mrf.mxu1  ;;  %v1335_v19 = vld [vmem:[#allocation6 + $0x1d8] sm:$0xff] }
 0x317   :  { %1846 = vmatmul.f32.gmra.mxu2 %v4176_v5  ;;  %v1687_v30 = vadd.f32 %v1686_v29, %v1573_v25  ;;  %v1430_v25 = vld [vmem:[#allocation11 + $0xd0] sm:$0xff]  ;;  %v1210_v29 = vadd.s32 240, %v4859_v58 }
 0x318   :  { %2063 = vst [vmem:[#allocation11 + $0x78] sm:$0xff] %v1999_v15  ;;  %4036 = vmatmul.msk.f32.gmra.mxu3 %vm1261_vm2, %v1325_v23 }
 0x319   :  { %v2000_v33 = vadd.f32 %v1687_v30, %v1420_v27  ;;  %1620 = vmatmul.f32.gmra.mxu0 %v4176_v5  ;;  %4004 = vmatmul.msk.f32.gmra.mxu1 %vm1261_vm2, %v1325_v23  ;;  %vm1273_vm14 = vcmp.ge.s32.totalorder %v4900_v53, %v1210_v29 }
 0x31a   :  { %v1799_v32 = vpop.f32.mrf.mxu2 }
 0x31b   :  { %v1912_v4 = vpop.f32.mrf.mxu3  ;;  %2064 = vst [vmem:[#allocation11 + $0x80] sm:$0xff] %v2000_v33 }
 0x31c   :  { %v1913_v60 = vadd.f32 %v1912_v4, %v1799_v32  ;;  %v1431_v32 = vld [vmem:[#allocation11 + $0xd8] sm:$0xff] }
 0x31e   :  { %v2001_v37 = vadd.f32 %v1913_v60, %v1421_v35  ;;  %v1576_v39 = vpop.f32.mrf.mxu0  ;;  %v1689_v42 = vpop.f32.mrf.mxu1  ;;  %v1337_v60 = vld [vmem:[#allocation6 + $0x1e8] sm:$0xff] }
 0x31f   :  { %1849 = vmatmul.f32.gmra.mxu2 %v4176_v5  ;;  %v1690_v7 = vadd.f32 %v1689_v42, %v1576_v39  ;;  %v1432_v39 = vld [vmem:[#allocation11 + $0xe0] sm:$0xff]  ;;  %v1211_v42 = vadd.s32 248, %v4859_v58 }
 0x320   :  { %2065 = vst [vmem:[#allocation11 + $0x88] sm:$0xff] %v2001_v37  ;;  %4037 = vmatmul.msk.f32.gmra.mxu3 %vm1263_vm9, %v1327_v13 }
 0x321   :  { %v2002_v55 = vadd.f32 %v1690_v7, %v1422_v40  ;;  %1623 = vmatmul.f32.gmra.mxu0 %v4176_v5  ;;  %4005 = vmatmul.msk.f32.gmra.mxu1 %vm1263_vm9, %v1327_v13  ;;  %vm1275_vm15 = vcmp.ge.s32.totalorder %v4900_v53, %v1211_v42  ;;  %v1445_v42 = vld [vmem:[#allocation11 + $0x148] sm:$0xff] }
 0x322   :  { %v1802_v8 = vpop.f32.mrf.mxu2 }
 0x323   :  { %v1915_v45 = vpop.f32.mrf.mxu3  ;;  %2066 = vst [vmem:[#allocation11 + $0x90] sm:$0xff] %v2002_v55 }
 0x324   :  { %v1916_v47 = vadd.f32 %v1915_v45, %v1802_v8  ;;  %v1433_v8 = vld [vmem:[#allocation11 + $0xe8] sm:$0xff] }
 0x326   :  { %v2003_v49 = vadd.f32 %v1916_v47, %v1423_v34  ;;  %v1579_v50 = vpop.f32.mrf.mxu0  ;;  %v1692_v54 = vpop.f32.mrf.mxu1  ;;  %v1339_v47 = vld [vmem:[#allocation6 + $0x1f8] sm:$0xff] }
 0x327   :  { %1852 = vmatmul.f32.gmra.mxu2 %v4176_v5  ;;  %v1693_v21 = vadd.f32 %v1692_v54, %v1579_v50 }
 0x328   :  { %2067 = vst [vmem:[#allocation11 + $0x98] sm:$0xff] %v2003_v49  ;;  %4038 = vmatmul.msk.f32.gmra.mxu3 %vm1265_vm10, %v1329_v28  ;;  %v1434_v49 = vld [vmem:[#allocation11 + $0xf0] sm:$0xff] }
 0x329   :  { %v2004_v62 = vadd.f32 %v1693_v21, %v1424_v52  ;;  %1626 = vmatmul.f32.gmra.mxu0 %v4176_v5  ;;  %4006 = vmatmul.msk.f32.gmra.mxu1 %vm1265_vm10, %v1329_v28 }
 0x32a   :  { %v1805_v22 = vpop.f32.mrf.mxu2 }
 0x32b   :  { %v1918_v61 = vpop.f32.mrf.mxu3  ;;  %2068 = vst [vmem:[#allocation11 + $0xa0] sm:$0xff] %v2004_v62 }
 0x32c   :  { %v1919_v48 = vadd.f32 %v1918_v61, %v1805_v22 }
 0x32e   :  { %v2005_v0 = vadd.f32 %v1919_v48, %v1425_v56  ;;  %v1582_v57 = vpop.f32.mrf.mxu0  ;;  %v1695_v51 = vpop.f32.mrf.mxu1  ;;  %v1436_v48 = vld [vmem:[#allocation11 + $0x100] sm:$0xff] }
 0x32f   :  { %1855 = vmatmul.f32.gmra.mxu2 %v4176_v5  ;;  %v1696_v46 = vadd.f32 %v1695_v51, %v1582_v57 }
 0x330   :  { %2069 = vst [vmem:[#allocation11 + $0xa8] sm:$0xff] %v2005_v0  ;;  %4039 = vmatmul.msk.f32.gmra.mxu3 %vm1267_vm11, %v1331_v63 }
 0x331   :  { %v2006_v41 = vadd.f32 %v1696_v46, %v1426_v2  ;;  %1629 = vmatmul.f32.gmra.mxu0 %v4176_v5  ;;  %4007 = vmatmul.msk.f32.gmra.mxu1 %vm1267_vm11, %v1331_v63  ;;  %v1437_v2 = vld [vmem:[#allocation11 + $0x108] sm:$0xff] }
 0x332   :  { %v1808_v17 = vpop.f32.mrf.mxu2 }
 0x333   :  { %v1921_v12 = vpop.f32.mrf.mxu3  ;;  %2070 = vst [vmem:[#allocation11 + $0xb0] sm:$0xff] %v2006_v41 }
 0x334   :  { %v1922_v43 = vadd.f32 %v1921_v12, %v1808_v17 }
 0x336   :  { %v2007_v36 = vadd.f32 %v1922_v43, %v1427_v6  ;;  %v1585_v14 = vpop.f32.mrf.mxu0  ;;  %v1698_v16 = vpop.f32.mrf.mxu1  ;;  %v1439_v43 = vld [vmem:[#allocation11 + $0x118] sm:$0xff] }
 0x337   :  { %1858 = vmatmul.f32.gmra.mxu2 %v4176_v5  ;;  %v1699_v11 = vadd.f32 %v1698_v16, %v1585_v14 }
 0x338   :  { %2071 = vst [vmem:[#allocation11 + $0xb8] sm:$0xff] %v2007_v36  ;;  %4040 = vmatmul.msk.f32.gmra.mxu3 %vm1269_vm12, %v1333_v9 }
 0x339   :  { %v2008_v1 = vadd.f32 %v1699_v11, %v1428_v31  ;;  %1632 = vmatmul.f32.gmra.mxu0 %v4176_v5  ;;  %4008 = vmatmul.msk.f32.gmra.mxu1 %vm1269_vm12, %v1333_v9 }
 0x33a   :  { %v1811_v18 = vpop.f32.mrf.mxu2 }
 0x33b   :  { %v1924_v20 = vpop.f32.mrf.mxu3  ;;  %2072 = vst [vmem:[#allocation11 + $0xc0] sm:$0xff] %v2008_v1 }
 0x33c   :  { %v1925_v38 = vadd.f32 %v1924_v20, %v1811_v18  ;;  %v1441_v20 = vld [vmem:[#allocation11 + $0x128] sm:$0xff] }
 0x33e   :  { %v2009_v23 = vadd.f32 %v1925_v38, %v1429_v24  ;;  %v1588_v15 = vpop.f32.mrf.mxu0  ;;  %v1701_v27 = vpop.f32.mrf.mxu1 }
 0x33f   :  { %1861 = vmatmul.f32.gmra.mxu2 %v4176_v5  ;;  %v1702_v10 = vadd.f32 %v1701_v27, %v1588_v15 }
 0x340   :  { %2073 = vst [vmem:[#allocation11 + $0xc8] sm:$0xff] %v2009_v23  ;;  %4041 = vmatmul.msk.f32.gmra.mxu3 %vm1271_vm13, %v1335_v19 }
 0x341   :  { %v2010_v4 = vadd.f32 %v1702_v10, %v1430_v25  ;;  %1635 = vmatmul.f32.gmra.mxu0 %v4176_v5  ;;  %4009 = vmatmul.msk.f32.gmra.mxu1 %vm1271_vm13, %v1335_v19  ;;  %v1442_v25 = vld [vmem:[#allocation11 + $0x130] sm:$0xff] }
 0x342   :  { %v1814_v30 = vpop.f32.mrf.mxu2 }
 0x343   :  { %v1927_v35 = vpop.f32.mrf.mxu3  ;;  %2074 = vst [vmem:[#allocation11 + $0xd0] sm:$0xff] %v2010_v4 }
 0x344   :  { %v1928_v33 = vadd.f32 %v1927_v35, %v1814_v30  ;;  %v1443_v30 = vld [vmem:[#allocation11 + $0x138] sm:$0xff] }
 0x346   :  { %v2011_v13 = vadd.f32 %v1928_v33, %v1431_v32  ;;  %v1591_v37 = vpop.f32.mrf.mxu0  ;;  %v1704_v40 = vpop.f32.mrf.mxu1 }
 0x347   :  { %1864 = vmatmul.f32.gmra.mxu2 %v4176_v5  ;;  %v1705_v44 = vadd.f32 %v1704_v40, %v1591_v37 }
 0x348   :  { %2075 = vst [vmem:[#allocation11 + $0xd8] sm:$0xff] %v2011_v13  ;;  %4042 = vmatmul.msk.f32.gmra.mxu3 %vm1273_vm14, %v1337_v60  ;;  %v1444_v13 = vld [vmem:[#allocation11 + $0x140] sm:$0xff] }
 0x349   :  { %v2012_v45 = vadd.f32 %v1705_v44, %v1432_v39  ;;  %1638 = vmatmul.f32.gmra.mxu0 %v4176_v5  ;;  %4010 = vmatmul.msk.f32.gmra.mxu1 %vm1273_vm14, %v1337_v60 }
 0x34a   :  { %v1817_v7 = vpop.f32.mrf.mxu2 }
 0x34b   :  { %v1930_v34 = vpop.f32.mrf.mxu3  ;;  %2076 = vst [vmem:[#allocation11 + $0xe0] sm:$0xff] %v2012_v45 }
 0x34c   :  { %v1931_v55 = vadd.f32 %v1930_v34, %v1817_v7 }
 0x34e   :  { %v2013_v28 = vadd.f32 %v1931_v55, %v1433_v8  ;;  %v1594_v58 = vpop.f32.mrf.mxu0  ;;  %v1707_v50 = vpop.f32.mrf.mxu1  ;;  %v1446_v55 = vld [vmem:[#allocation11 + $0x150] sm:$0xff] }
 0x34f   :  { %1867 = vmatmul.f32.gmra.mxu2 %v4176_v5  ;;  %v1708_v52 = vadd.f32 %v1707_v50, %v1594_v58 }
 0x350   :  { %2077 = vst [vmem:[#allocation11 + $0xe8] sm:$0xff] %v2013_v28  ;;  %4043 = vmatmul.msk.f32.gmra.mxu3 %vm1275_vm15, %v1339_v47 }
 0x351   :  { %v2014_v22 = vadd.f32 %v1708_v52, %v1434_v49  ;;  %1641 = vmatmul.f32.gmra.mxu0 %v4176_v5  ;;  %4011 = vmatmul.msk.f32.gmra.mxu1 %vm1275_vm15, %v1339_v47  ;;  %v1438_v5 = vld [vmem:[#allocation11 + $0x110] sm:$0xff]  ;;  %v1447_v49 = vld [vmem:[#allocation11 + $0x158] sm:$0xff] }
 0x352   :  { %v1820_v54 = vpop.f32.mrf.mxu2 }
 0x353   :  { %v1933_v21 = vpop.f32.mrf.mxu3  ;;  %2078 = vst [vmem:[#allocation11 + $0xf0] sm:$0xff] %v2014_v22  ;;  %v1448_v22 = vld [vmem:[#allocation11 + $0x160] sm:$0xff] }
 0x354   :  { %v1934_v56 = vadd.f32 %v1933_v21, %v1820_v54 }
 0x356   :  { %v2015_v61 = vadd.f32 %v1934_v56, %v1435_v59  ;;  %v1597_v62 = vpop.f32.mrf.mxu0  ;;  %v1710_v63 = vpop.f32.mrf.mxu1 }
 0x357   :  { %v1711_v0 = vadd.f32 %v1710_v63, %v1597_v62 }
 0x358   :  { %2079 = vst [vmem:[#allocation11 + $0xf8] sm:$0xff] %v2015_v61 }
 0x359   :  { %v2016_v3 = vadd.f32 %v1711_v0, %v1436_v48  ;;  %v1449_v48 = vld [vmem:[#allocation11 + $0x168] sm:$0xff] }
 0x35a   :  { %v1823_v57 = vpop.f32.mrf.mxu2 }
 0x35b   :  { %v1936_v51 = vpop.f32.mrf.mxu3  ;;  %2080 = vst [vmem:[#allocation11 + $0x100] sm:$0xff] %v2016_v3  ;;  %v1450_v3 = vld [vmem:[#allocation11 + $0x170] sm:$0xff] }
 0x35c   :  { %v1937_v46 = vadd.f32 %v1936_v51, %v1823_v57 }
 0x35e   :  { %v2017_v17 = vadd.f32 %v1937_v46, %v1437_v2  ;;  %v1600_v6 = vpop.f32.mrf.mxu0  ;;  %v1713_v12 = vpop.f32.mrf.mxu1 }
 0x35f   :  { %v1714_v53 = vadd.f32 %v1713_v12, %v1600_v6 }
 0x360   :  { %2081 = vst [vmem:[#allocation11 + $0x108] sm:$0xff] %v2017_v17 }
 0x361   :  { %v2018_v36 = vadd.f32 %v1714_v53, %v1438_v5  ;;  %v1451_v5 = vld [vmem:[#allocation11 + $0x178] sm:$0xff] }
 0x362   :  { %v1826_v41 = vpop.f32.mrf.mxu2 }
 0x363   :  { %v1939_v9 = vpop.f32.mrf.mxu3  ;;  %2082 = vst [vmem:[#allocation11 + $0x110] sm:$0xff] %v2018_v36  ;;  %v1452_v36 = vld [vmem:[#allocation11 + $0x180] sm:$0xff] }
 0x364   :  { %v1940_v14 = vadd.f32 %v1939_v9, %v1826_v41 }
 0x366   :  { %v2019_v31 = vadd.f32 %v1940_v14, %v1439_v43  ;;  %v1603_v16 = vpop.f32.mrf.mxu0  ;;  %v1716_v11 = vpop.f32.mrf.mxu1 }
 0x367   :  { %v1717_v18 = vadd.f32 %v1716_v11, %v1603_v16 }
 0x368   :  { %2083 = vst [vmem:[#allocation11 + $0x118] sm:$0xff] %v2019_v31 }
 0x369   :  { %v2020_v38 = vadd.f32 %v1717_v18, %v1440_v26  ;;  %v1453_v26 = vld [vmem:[#allocation11 + $0x188] sm:$0xff] }
 0x36a   :  { %v1829_v24 = vpop.f32.mrf.mxu2 }
 0x36b   :  { %v1942_v1 = vpop.f32.mrf.mxu3  ;;  %2084 = vst [vmem:[#allocation11 + $0x120] sm:$0xff] %v2020_v38  ;;  %v1454_v38 = vld [vmem:[#allocation11 + $0x190] sm:$0xff] }
 0x36c   :  { %v1943_v19 = vadd.f32 %v1942_v1, %v1829_v24 }
 0x36e   :  { %v2021_v23 = vadd.f32 %v1943_v19, %v1441_v20  ;;  %v1606_v15 = vpop.f32.mrf.mxu0  ;;  %v1719_v27 = vpop.f32.mrf.mxu1 }
 0x36f   :  { %v1720_v29 = vadd.f32 %v1719_v27, %v1606_v15 }
 0x370   :  { %2085 = vst [vmem:[#allocation11 + $0x128] sm:$0xff] %v2021_v23 }
 0x371   :  { %v2022_v35 = vadd.f32 %v1720_v29, %v1442_v25  ;;  %v1455_v25 = vld [vmem:[#allocation11 + $0x198] sm:$0xff] }
 0x372   :  { %v1832_v10 = vpop.f32.mrf.mxu2 }
 0x373   :  { %v1945_v32 = vpop.f32.mrf.mxu3  ;;  %2086 = vst [vmem:[#allocation11 + $0x130] sm:$0xff] %v2022_v35  ;;  %v1456_v35 = vld [vmem:[#allocation11 + $0x1a0] sm:$0xff] }
 0x374   :  { %v1946_v4 = vadd.f32 %v1945_v32, %v1832_v10 }
 0x376   :  { %v2023_v33 = vadd.f32 %v1946_v4, %v1443_v30  ;;  %v1609_v60 = vpop.f32.mrf.mxu0  ;;  %v1722_v37 = vpop.f32.mrf.mxu1 }
 0x377   :  { %v1723_v39 = vadd.f32 %v1722_v37, %v1609_v60 }
 0x378   :  { %2087 = vst [vmem:[#allocation11 + $0x138] sm:$0xff] %v2023_v33 }
 0x379   :  { %v2024_v7 = vadd.f32 %v1723_v39, %v1444_v13  ;;  %v1457_v13 = vld [vmem:[#allocation11 + $0x1a8] sm:$0xff] }
 0x37a   :  { %v1835_v40 = vpop.f32.mrf.mxu2 }
 0x37b   :  { %v1948_v44 = vpop.f32.mrf.mxu3  ;;  %2088 = vst [vmem:[#allocation11 + $0x140] sm:$0xff] %v2024_v7  ;;  %v1458_v7 = vld [vmem:[#allocation11 + $0x1b0] sm:$0xff] }
 0x37c   :  { %v1949_v8 = vadd.f32 %v1948_v44, %v1835_v40 }
 0x37e   :  { %v2025_v34 = vadd.f32 %v1949_v8, %v1445_v42  ;;  %v1612_v45 = vpop.f32.mrf.mxu0  ;;  %v1725_v47 = vpop.f32.mrf.mxu1 }
 0x37f   :  { %v1726_v28 = vadd.f32 %v1725_v47, %v1612_v45 }
 0x380   :  { %2089 = vst [vmem:[#allocation11 + $0x148] sm:$0xff] %v2025_v34 }
 0x381   :  { %v2026_v52 = vadd.f32 %v1726_v28, %v1446_v55  ;;  %v1459_v55 = vld [vmem:[#allocation11 + $0x1b8] sm:$0xff] }
 0x382   :  { %v1838_v58 = vpop.f32.mrf.mxu2 }
 0x383   :  { %v1951_v50 = vpop.f32.mrf.mxu3  ;;  %2090 = vst [vmem:[#allocation11 + $0x150] sm:$0xff] %v2026_v52  ;;  %v1460_v52 = vld [vmem:[#allocation11 + $0x1c0] sm:$0xff] }
 0x384   :  { %v1952_v54 = vadd.f32 %v1951_v50, %v1838_v58 }
 0x386   :  { %v2027_v59 = vadd.f32 %v1952_v54, %v1447_v49  ;;  %v1615_v21 = vpop.f32.mrf.mxu0  ;;  %v1728_v56 = vpop.f32.mrf.mxu1 }
 0x387   :  { %v1729_v61 = vadd.f32 %v1728_v56, %v1615_v21 }
 0x388   :  { %2091 = vst [vmem:[#allocation11 + $0x158] sm:$0xff] %v2027_v59 }
 0x389   :  { %v2028_v0 = vadd.f32 %v1729_v61, %v1448_v22  ;;  %v1461_v22 = vld [vmem:[#allocation11 + $0x1c8] sm:$0xff] }
 0x38a   :  { %v1841_v62 = vpop.f32.mrf.mxu2 }
 0x38b   :  { %v1954_v63 = vpop.f32.mrf.mxu3  ;;  %2092 = vst [vmem:[#allocation11 + $0x160] sm:$0xff] %v2028_v0  ;;  %v1462_v0 = vld [vmem:[#allocation11 + $0x1d0] sm:$0xff] }
 0x38c   :  { %v1955_v57 = vadd.f32 %v1954_v63, %v1841_v62 }
 0x38e   :  { %v2029_v2 = vadd.f32 %v1955_v57, %v1449_v48  ;;  %v1618_v51 = vpop.f32.mrf.mxu0  ;;  %v1731_v46 = vpop.f32.mrf.mxu1 }
 0x38f   :  { %v1732_v17 = vadd.f32 %v1731_v46, %v1618_v51 }
 0x390   :  { %2093 = vst [vmem:[#allocation11 + $0x168] sm:$0xff] %v2029_v2 }
 0x391   :  { %v2030_v53 = vadd.f32 %v1732_v17, %v1450_v3  ;;  %v1463_v3 = vld [vmem:[#allocation11 + $0x1d8] sm:$0xff] }
 0x392   :  { %v1844_v6 = vpop.f32.mrf.mxu2 }
 0x393   :  { %v1957_v12 = vpop.f32.mrf.mxu3  ;;  %2094 = vst [vmem:[#allocation11 + $0x170] sm:$0xff] %v2030_v53  ;;  %v1464_v53 = vld [vmem:[#allocation11 + $0x1e0] sm:$0xff] }
 0x394   :  { %v1958_v41 = vadd.f32 %v1957_v12, %v1844_v6 }
 0x396   :  { %v2031_v43 = vadd.f32 %v1958_v41, %v1451_v5  ;;  %v1621_v9 = vpop.f32.mrf.mxu0  ;;  %v1734_v14 = vpop.f32.mrf.mxu1 }
 0x397   :  { %v1735_v31 = vadd.f32 %v1734_v14, %v1621_v9 }
 0x398   :  { %2095 = vst [vmem:[#allocation11 + $0x178] sm:$0xff] %v2031_v43 }
 0x399   :  { %v2032_v18 = vadd.f32 %v1735_v31, %v1452_v36  ;;  %v1465_v36 = vld [vmem:[#allocation11 + $0x1e8] sm:$0xff] }
 0x39a   :  { %v1847_v16 = vpop.f32.mrf.mxu2 }
 0x39b   :  { %v1960_v11 = vpop.f32.mrf.mxu3  ;;  %2096 = vst [vmem:[#allocation11 + $0x180] sm:$0xff] %v2032_v18  ;;  %v1466_v18 = vld [vmem:[#allocation11 + $0x1f0] sm:$0xff] }
 0x39c   :  { %v1961_v24 = vadd.f32 %v1960_v11, %v1847_v16 }
 0x39e   :  { %v2033_v20 = vadd.f32 %v1961_v24, %v1453_v26  ;;  %v1624_v1 = vpop.f32.mrf.mxu0  ;;  %v1737_v19 = vpop.f32.mrf.mxu1 }
 0x39f   :  { %v1738_v23 = vadd.f32 %v1737_v19, %v1624_v1 }
 0x3a0   :  { %2097 = vst [vmem:[#allocation11 + $0x188] sm:$0xff] %v2033_v20 }
 0x3a1   :  { %v2034_v29 = vadd.f32 %v1738_v23, %v1454_v38  ;;  %v1467_v38 = vld [vmem:[#allocation11 + $0x1f8] sm:$0xff] }
 0x3a2   :  { %v1850_v15 = vpop.f32.mrf.mxu2 }
 0x3a3   :  { %v1963_v27 = vpop.f32.mrf.mxu3  ;;  %2098 = vst [vmem:[#allocation11 + $0x190] sm:$0xff] %v2034_v29 }
 0x3a4   :  { %v1964_v10 = vadd.f32 %v1963_v27, %v1850_v15 }
 0x3a6   :  { %v2035_v30 = vadd.f32 %v1964_v10, %v1455_v25  ;;  %v1627_v32 = vpop.f32.mrf.mxu0  ;;  %v1740_v4 = vpop.f32.mrf.mxu1 }
 0x3a7   :  { %v1741_v33 = vadd.f32 %v1740_v4, %v1627_v32 }
 0x3a8   :  { %2099 = vst [vmem:[#allocation11 + $0x198] sm:$0xff] %v2035_v30 }
 0x3a9   :  { %v2036_v39 = vadd.f32 %v1741_v33, %v1456_v35 }
 0x3aa   :  { %v1853_v60 = vpop.f32.mrf.mxu2 }
 0x3ab   :  { %v1966_v37 = vpop.f32.mrf.mxu3  ;;  %2100 = vst [vmem:[#allocation11 + $0x1a0] sm:$0xff] %v2036_v39 }
 0x3ac   :  { %v1967_v40 = vadd.f32 %v1966_v37, %v1853_v60 }
 0x3ae   :  { %v2037_v42 = vadd.f32 %v1967_v40, %v1457_v13  ;;  %v1630_v44 = vpop.f32.mrf.mxu0  ;;  %v1743_v8 = vpop.f32.mrf.mxu1 }
 0x3af   :  { %v1744_v34 = vadd.f32 %v1743_v8, %v1630_v44 }
 0x3b0   :  { %2101 = vst [vmem:[#allocation11 + $0x1a8] sm:$0xff] %v2037_v42 }
 0x3b1   :  { %v2038_v28 = vadd.f32 %v1744_v34, %v1458_v7 }
 0x3b2   :  { %v1856_v45 = vpop.f32.mrf.mxu2 }
 0x3b3   :  { %v1969_v47 = vpop.f32.mrf.mxu3  ;;  %2102 = vst [vmem:[#allocation11 + $0x1b0] sm:$0xff] %v2038_v28 }
 0x3b4   :  { %v1970_v58 = vadd.f32 %v1969_v47, %v1856_v45 }
 0x3b6   :  { %v2039_v49 = vadd.f32 %v1970_v58, %v1459_v55  ;;  %v1633_v50 = vpop.f32.mrf.mxu0  ;;  %v1746_v54 = vpop.f32.mrf.mxu1 }
 0x3b7   :  { %v1747_v59 = vadd.f32 %v1746_v54, %v1633_v50 }
 0x3b8   :  { %2103 = vst [vmem:[#allocation11 + $0x1b8] sm:$0xff] %v2039_v49 }
 0x3b9   :  { %v2040_v61 = vadd.f32 %v1747_v59, %v1460_v52 }
 0x3ba   :  { %v1859_v21 = vpop.f32.mrf.mxu2 }
 0x3bb   :  { %v1972_v56 = vpop.f32.mrf.mxu3  ;;  %2104 = vst [vmem:[#allocation11 + $0x1c0] sm:$0xff] %v2040_v61 }
 0x3bc   :  { %v1973_v62 = vadd.f32 %v1972_v56, %v1859_v21 }
 0x3be   :  { %v2041_v48 = vadd.f32 %v1973_v62, %v1461_v22  ;;  %v1636_v63 = vpop.f32.mrf.mxu0  ;;  %v1749_v57 = vpop.f32.mrf.mxu1 }
 0x3bf   :  { %v1750_v2 = vadd.f32 %v1749_v57, %v1636_v63 }
 0x3c0   :  { %2105 = vst [vmem:[#allocation11 + $0x1c8] sm:$0xff] %v2041_v48 }
 0x3c1   :  { %v2042_v17 = vadd.f32 %v1750_v2, %v1462_v0 }
 0x3c2   :  { %v1862_v51 = vpop.f32.mrf.mxu2 }
 0x3c3   :  { %v1975_v46 = vpop.f32.mrf.mxu3  ;;  %2106 = vst [vmem:[#allocation11 + $0x1d0] sm:$0xff] %v2042_v17 }
 0x3c4   :  { %v1976_v6 = vadd.f32 %v1975_v46, %v1862_v51 }
 0x3c6   :  { %v2043_v5 = vadd.f32 %v1976_v6, %v1463_v3  ;;  %v1639_v12 = vpop.f32.mrf.mxu0  ;;  %v1752_v41 = vpop.f32.mrf.mxu1 }
 0x3c7   :  { %v1753_v43 = vadd.f32 %v1752_v41, %v1639_v12 }
 0x3c8   :  { %2107 = vst [vmem:[#allocation11 + $0x1d8] sm:$0xff] %v2043_v5 }
 0x3c9   :  { %v2044_v31 = vadd.f32 %v1753_v43, %v1464_v53 }
 0x3ca   :  { %v1865_v9 = vpop.f32.mrf.mxu2 }
 0x3cb   :  { %v1978_v14 = vpop.f32.mrf.mxu3  ;;  %2108 = vst [vmem:[#allocation11 + $0x1e0] sm:$0xff] %v2044_v31 }
 0x3cc   :  { %v1979_v16 = vadd.f32 %v1978_v14, %v1865_v9 }
 0x3ce   :  { %v2045_v26 = vadd.f32 %v1979_v16, %v1465_v36  ;;  %v1642_v11 = vpop.f32.mrf.mxu0  ;;  %v1755_v24 = vpop.f32.mrf.mxu1 }
 0x3cf   :  { %v1756_v20 = vadd.f32 %v1755_v24, %v1642_v11 }
 0x3d0   :  { %2109 = vst [vmem:[#allocation11 + $0x1e8] sm:$0xff] %v2045_v26 }
 0x3d1   :  { %v2046_v23 = vadd.f32 %v1756_v20, %v1466_v18 }
 0x3d2   :  { %v1868_v1 = vpop.f32.mrf.mxu2 }
 0x3d3   :  { %v1981_v19 = vpop.f32.mrf.mxu3  ;;  %2110 = vst [vmem:[#allocation11 + $0x1f0] sm:$0xff] %v2046_v23 }
 0x3d4   :  { %v1982_v15 = vadd.f32 %v1981_v19, %v1868_v1 }
 0x3d6   :  { %v2047_v25 = vadd.f32 %v1982_v15, %v1467_v38 }
 0x3d8   :  { %2111 = vst [vmem:[#allocation11 + $0x1f8] sm:$0xff] %v2047_v25 }
 0x3d9 PF:  { %p5040_p6 = pnand %p3883_p12, %p163_p13 }
 0x3db   :  { %p2114_p7 = pneg %p5040_p6 }
 0x3dd   :  { %p2115_p8 = pnand %p2114_p7, %p164_p0 }
 0x3df   :  { %2118 = sbr.rel (%p2115_p8) target bundleno = 1419 (0x58b), region = 33 }
 0x3e4   :  { %v2250_v27 = vld [vmem:[#allocation9 + $0xf8] sm:$0xff]  ;;  %v2119_v29 = vlaneseq  ;;  %v2248_v10 = vld [vmem:[#allocation9 + $0xe8] sm:$0xff]  ;;  %v2249_v42 = vld [vmem:[#allocation9 + $0xf0] sm:$0xff]  ;;  %v4177_v11 = vmov 0.0  }
 0x3e5   :  { %2701 = vmatpush.msra.mxu2 %v2250_v27  ;;  %v2246_v35 = vld [vmem:[#allocation9 + $0xd8] sm:$0xff]  ;;  %v2244_v39 = vld [vmem:[#allocation9 + $0xc8] sm:$0xff]  ;;  %v2247_v55 = vld [vmem:[#allocation9 + $0xe0] sm:$0xff]  ;;  %2603 = vmatpush.msra.mxu1 %v4177_v11 }
 0x3e6   :  { %v5054_v30 = vand.u32 127, %v2119_v29  ;;  %v5056_v32 = vshrl.u32 %v2119_v29, 7  ;;  %v2282_v60 = vld [vmem:[#allocation9 + $0x1f8] sm:$0xff]  ;;  %v2280_v7 = vld [vmem:[#allocation9 + $0x1e8] sm:$0xff]  ;;  %v2245_v50 = vld [vmem:[#allocation9 + $0xd0] sm:$0xff] }
 0x3e7   :  { %2702 = vmatpush.msra.mxu2 %v2248_v10  ;;  %v2242_v34 = vld [vmem:[#allocation9 + $0xb8] sm:$0xff]  ;;  %v2240_v58 = vld [vmem:[#allocation9 + $0xa8] sm:$0xff]  ;;  %v2243_v22 = vld [vmem:[#allocation9 + $0xc0] sm:$0xff] }
 0x3e8   :  { %v5059_v4 = vadd.s32 128, %v5054_v30  ;;  %v2154_v33 = vadd.s32 248, %v5056_v32  ;;  %v2153_v13 = vadd.s32 240, %v5056_v32  ;;  %v2152_v37 = vadd.s32 232, %v5056_v32  ;;  %v2278_v47 = vld [vmem:[#allocation9 + $0x1d8] sm:$0xff]  ;;  %v2276_v54 = vld [vmem:[#allocation9 + $0x1c8] sm:$0xff] }
 0x3e9   :  { %2703 = vmatpush.msra.mxu2 %v2246_v35  ;;  %v2138_v40 = vadd.s32 120, %v5056_v32  ;;  %v2137_v44 = vadd.s32 112, %v5056_v32  ;;  %v2151_v8 = vadd.s32 224, %v5056_v32  ;;  %v2136_v45 = vadd.s32 104, %v5056_v32  ;;  %v2238_v21 = vld [vmem:[#allocation9 + $0x98] sm:$0xff]  ;;  %v2236_v48 = vld [vmem:[#allocation9 + $0x88] sm:$0xff] }
 0x3ea   :  { %vm2218_vm0 = vcmp.ge.s32.totalorder %v5059_v4, %v2154_v33  ;;  %vm2216_vm1 = vcmp.ge.s32.totalorder %v5059_v4, %v2153_v13  ;;  %vm2214_vm7 = vcmp.ge.s32.totalorder %v5059_v4, %v2152_v37  ;;  %v2150_v28 = vadd.s32 216, %v5056_v32  ;;  %v2274_v61 = vld [vmem:[#allocation9 + $0x1b8] sm:$0xff]  ;;  %v2241_v63 = vld [vmem:[#allocation9 + $0xb0] sm:$0xff]  ;;  %v2272_v57 = vld [vmem:[#allocation9 + $0x1a8] sm:$0xff] }
 0x3eb   :  { %4060 = vmatpush.msk.msra.mxu3 %vm2218_vm0, %v2282_v60  ;;  %vm2185_vm4 = vcmp.ge.s32.totalorder %v5054_v30, %v2138_v40  ;;  %2704 = vmatpush.msra.mxu2 %v2244_v39  ;;  %vm2183_vm6 = vcmp.ge.s32.totalorder %v5054_v30, %v2137_v44  ;;  %v2135_v49 = vadd.s32 96, %v5056_v32  ;;  %vm2181_vm8 = vcmp.ge.s32.totalorder %v5054_v30, %v2136_v45  ;;  %v2234_v51 = vld [vmem:[#allocation9 + $0x78] sm:$0xff]  ;;  %v2239_v3 = vld [vmem:[#allocation9 + $0xa0] sm:$0xff]  ;;  %v2232_v5 = vld [vmem:[#allocation9 + $0x68] sm:$0xff] }
 0x3ec   :  { %4044 = vmatpush.msk.msra.mxu0 %vm2185_vm4, %v2249_v42  ;;  %v2134_v52 = vadd.s32 88, %v5056_v32  ;;  %vm2212_vm5 = vcmp.ge.s32.totalorder %v5059_v4, %v2151_v8  ;;  %v2149_v59 = vadd.s32 208, %v5056_v32  ;;  %v2133_v56 = vadd.s32 80, %v5056_v32  ;;  %v2270_v17 = vld [vmem:[#allocation9 + $0x198] sm:$0xff]  ;;  %v2237_v12 = vld [vmem:[#allocation9 + $0x90] sm:$0xff]  ;;  %v2268_v41 = vld [vmem:[#allocation9 + $0x188] sm:$0xff] }
 0x3ed   :  { %4061 = vmatpush.msk.msra.mxu3 %vm2216_vm1, %v2280_v7  ;;  %2705 = vmatpush.msra.mxu2 %v2242_v34  ;;  %vm2179_vm3 = vcmp.ge.s32.totalorder %v5054_v30, %v2135_v49  ;;  %vm2210_vm2 = vcmp.ge.s32.totalorder %v5059_v4, %v2150_v28  ;;  %v2148_v62 = vadd.s32 200, %v5056_v32  ;;  %v2132_v0 = vadd.s32 72, %v5056_v32  ;;  %v2230_v9 = vld [vmem:[#allocation9 + $0x58] sm:$0xff]  ;;  %v2235_v36 = vld [vmem:[#allocation9 + $0x80] sm:$0xff]  ;;  %v2228_v26 = vld [vmem:[#allocation9 + $0x48] sm:$0xff] }
 0x3ee   :  { %4045 = vmatpush.msk.msra.mxu0 %vm2183_vm6, %v2247_v55  ;;  %vm2177_vm9 = vcmp.ge.s32.totalorder %v5054_v30, %v2134_v52  ;;  %vm2208_vm10 = vcmp.ge.s32.totalorder %v5059_v4, %v2149_v59  ;;  %v2147_v2 = vadd.s32 192, %v5056_v32  ;;  %vm2175_vm11 = vcmp.ge.s32.totalorder %v5054_v30, %v2133_v56  ;;  %v2266_v31 = vld [vmem:[#allocation9 + $0x178] sm:$0xff]  ;;  %v2233_v18 = vld [vmem:[#allocation9 + $0x70] sm:$0xff]  ;;  %v5107_v20 = vld [vmem:[#allocation6 + $0x8] sm:$0xff] }
 0x3ef   :  { %4062 = vmatpush.msk.msra.mxu3 %vm2214_vm7, %v2278_v47  ;;  %2706 = vmatpush.msra.mxu2 %v2240_v58  ;;  %v2131_v46 = vadd.s32 64, %v5056_v32  ;;  %vm2206_vm12 = vcmp.ge.s32.totalorder %v5059_v4, %v2148_v62  ;;  %v2146_v6 = vadd.s32 184, %v5056_v32  ;;  %vm2173_vm13 = vcmp.ge.s32.totalorder %v5054_v30, %v2132_v0  ;;  %v2264_v1 = vld [vmem:[#allocation9 + $0x168] sm:$0xff]  ;;  %v2226_v19 = vld [vmem:[#allocation9 + $0x38] sm:$0xff]  ;;  %v2231_v23 = vld [vmem:[#allocation9 + $0x60] sm:$0xff] }
 0x3f0   :  { %4046 = vmatpush.msk.msra.mxu0 %vm2181_vm8, %v2245_v50  ;;  %v2130_v53 = vadd.s32 56, %v5056_v32  ;;  %vm2204_vm14 = vcmp.ge.s32.totalorder %v5059_v4, %v2147_v2  ;;  %v2145_v43 = vadd.s32 176, %v5056_v32  ;;  %v2129_v14 = vadd.s32 48, %v5056_v32  ;;  %2604 = vmatmul.f32.vlgmr.msra.gmra.mxu1 %v5107_v20  ;;  %v2262_v25 = vld [vmem:[#allocation9 + $0x158] sm:$0xff]  ;;  %v2224_v29 = vld [vmem:[#allocation9 + $0x28] sm:$0xff]  ;;  %v2229_v10 = vld [vmem:[#allocation9 + $0x50] sm:$0xff] }
 0x3f1   :  { %4063 = vmatpush.msk.msra.mxu3 %vm2212_vm5, %v2276_v54  ;;  %2707 = vmatpush.msra.mxu2 %v2238_v21  ;;  %vm2171_vm15 = vcmp.ge.s32.totalorder %v5054_v30, %v2131_v46  ;;  %vm2202_vm0 = vcmp.ge.s32.totalorder %v5059_v4, %v2146_v6  ;;  %v2144_v16 = vadd.s32 168, %v5056_v32  ;;  %v2128_v24 = vadd.s32 40, %v5056_v32  ;;  %v2260_v33 = vld [vmem:[#allocation9 + $0x148] sm:$0xff]  ;;  %v2222_v13 = vld [vmem:[#allocation9 + $0x18] sm:$0xff]  ;;  %v2227_v37 = vld [vmem:[#allocation9 + $0x40] sm:$0xff] }
 0x3f2   :  { %4047 = vmatpush.msk.msra.mxu0 %vm2179_vm3, %v2243_v22  ;;  %vm2169_vm1 = vcmp.ge.s32.totalorder %v5054_v30, %v2130_v53  ;;  %vm2200_vm4 = vcmp.ge.s32.totalorder %v5059_v4, %v2145_v43  ;;  %v2143_v38 = vadd.s32 160, %v5056_v32  ;;  %vm2167_vm6 = vcmp.ge.s32.totalorder %v5054_v30, %v2129_v14  ;;  %v2258_v40 = vld [vmem:[#allocation9 + $0x138] sm:$0xff]  ;;  %v2220_v44 = vld [vmem:[#allocation9 + $0x8] sm:$0xff]  ;;  %v2225_v7 = vld [vmem:[#allocation9 + $0x30] sm:$0xff] }
 0x3f3   :  { %4064 = vmatpush.msk.msra.mxu3 %vm2210_vm2, %v2274_v61  ;;  %2708 = vmatpush.msra.mxu2 %v2236_v48  ;;  %v2127_v15 = vadd.s32 32, %v5056_v32  ;;  %vm2198_vm7 = vcmp.ge.s32.totalorder %v5059_v4, %v2144_v16  ;;  %v2142_v27 = vadd.s32 152, %v5056_v32  ;;  %vm2165_vm8 = vcmp.ge.s32.totalorder %v5054_v30, %v2128_v24  ;;  %v2411_v8 = vld [vmem:[#allocation6] sm:$0xff]  ;;  %v2414_v45 = vld [vmem:[#allocation6 + $0x18] sm:$0xff]  ;;  %v2256_v55 = vld [vmem:[#allocation9 + $0x128] sm:$0xff] }
 0x3f4   :  { %4048 = vmatpush.msk.msra.mxu0 %vm2177_vm9, %v2241_v63  ;;  %v2126_v35 = vadd.s32 24, %v5056_v32  ;;  %vm2196_vm5 = vcmp.ge.s32.totalorder %v5059_v4, %v2143_v38  ;;  %v2141_v60 = vadd.s32 144, %v5056_v32  ;;  %v2125_v39 = vadd.s32 16, %v5056_v32  ;;  %v2223_v28 = vld [vmem:[#allocation9 + $0x20] sm:$0xff]  ;;  %v2254_v58 = vld [vmem:[#allocation9 + $0x118] sm:$0xff]  ;;  %v2221_v49 = vld [vmem:[#allocation9 + $0x10] sm:$0xff] }
 0x3f5   :  { %4065 = vmatpush.msk.msra.mxu3 %vm2208_vm10, %v2272_v57  ;;  %2709 = vmatpush.msra.mxu2 %v2234_v51  ;;  %vm2163_vm3 = vcmp.ge.s32.totalorder %v5054_v30, %v2127_v15  ;;  %vm2194_vm2 = vcmp.ge.s32.totalorder %v5059_v4, %v2142_v27  ;;  %v2140_v42 = vadd.s32 136, %v5056_v32  ;;  %v2124_v34 = vadd.s32 8, %v5056_v32  ;;  %v2252_v50 = vld [vmem:[#allocation9 + $0x108] sm:$0xff]  ;;  %v2219_v52 = vld [vmem:[#allocation9] sm:$0xff]  ;;  %v2413_v54 = vld [vmem:[#allocation6 + $0x10] sm:$0xff] }
 0x3f6   :  { %4049 = vmatpush.msk.msra.mxu0 %vm2175_vm11, %v2239_v3  ;;  %vm2161_vm9 = vcmp.ge.s32.totalorder %v5054_v30, %v2126_v35  ;;  %vm2192_vm10 = vcmp.ge.s32.totalorder %v5059_v4, %v2141_v60  ;;  %v2139_v47 = vadd.s32 128, %v5056_v32  ;;  %vm2159_vm11 = vcmp.ge.s32.totalorder %v5054_v30, %v2125_v39  ;;  %v2416_v59 = vld [vmem:[#allocation6 + $0x28] sm:$0xff]  ;;  %v2415_v21 = vld [vmem:[#allocation6 + $0x20] sm:$0xff]  ;;  %v2417_v22 = vld [vmem:[#allocation6 + $0x30] sm:$0xff] }
 0x3f7   :  { %4066 = vmatpush.msk.msra.mxu3 %vm2206_vm12, %v2270_v17  ;;  %2710 = vmatpush.msra.mxu2 %v2232_v5  ;;  %vm2190_vm12 = vcmp.ge.s32.totalorder %v5059_v4, %v2140_v42  ;;  %v2422_v56 = vld [vmem:[#allocation6 + $0x58] sm:$0xff]  ;;  %v2421_v61 = vld [vmem:[#allocation6 + $0x50] sm:$0xff]  ;;  %v2424_v62 = vld [vmem:[#allocation6 + $0x68] sm:$0xff] }
 0x3f8   :  { %4050 = vmatpush.msk.msra.mxu0 %vm2173_vm13, %v2237_v12  ;;  %2607 = vmatmul.f32.gmra.mxu1 %v2414_v45  ;;  %vm2157_vm13 = vcmp.ge.s32.totalorder %v5054_v30, %v2124_v34  ;;  %v2423_v48 = vld [vmem:[#allocation6 + $0x60] sm:$0xff]  ;;  %v2426_v63 = vld [vmem:[#allocation6 + $0x78] sm:$0xff]  ;;  %v2425_v0 = vld [vmem:[#allocation6 + $0x70] sm:$0xff] }
 0x3f9   :  { %4067 = vmatpush.msk.msra.mxu3 %vm2204_vm14, %v2268_v41  ;;  %2711 = vmatpush.msra.mxu2 %v2230_v9  ;;  %vm2188_vm14 = vcmp.ge.s32.totalorder %v5059_v4, %v2139_v47  ;;  %v2418_v4 = vld [vmem:[#allocation6 + $0x38] sm:$0xff]  ;;  %v2428_v57 = vld [vmem:[#allocation6 + $0x88] sm:$0xff]  ;;  %v2427_v2 = vld [vmem:[#allocation6 + $0x80] sm:$0xff] }
 0x3fa   :  { %4051 = vmatpush.msk.msra.mxu0 %vm2171_vm15, %v2235_v36  ;;  %vm2155_vm15 = vcmp.ge.s32.totalorder %v5054_v30, %v5056_v32  ;;  %v2420_v30 = vld [vmem:[#allocation6 + $0x48] sm:$0xff]  ;;  %v2419_v32 = vld [vmem:[#allocation6 + $0x40] sm:$0xff]  ;;  %v2430_v51 = vld [vmem:[#allocation6 + $0x98] sm:$0xff] }
 0x3fb   :  { %4068 = vmatpush.msk.msra.mxu3 %vm2202_vm0, %v2266_v31  ;;  %2712 = vmatpush.msra.mxu2 %v2228_v26  ;;  %v2429_v3 = vld [vmem:[#allocation6 + $0x90] sm:$0xff]  ;;  %v2432_v46 = vld [vmem:[#allocation6 + $0xa8] sm:$0xff]  ;;  %v2431_v17 = vld [vmem:[#allocation6 + $0xa0] sm:$0xff] }
 0x3fc   :  { %4052 = vmatpush.msk.msra.mxu0 %vm2169_vm1, %v2233_v18  ;;  %v2434_v6 = vld [vmem:[#allocation6 + $0xb8] sm:$0xff]  ;;  %v2433_v5 = vld [vmem:[#allocation6 + $0xb0] sm:$0xff]  ;;  %v2436_v12 = vld [vmem:[#allocation6 + $0xc8] sm:$0xff] }
 0x3fd   :  { %4069 = vmatpush.msk.msra.mxu3 %vm2200_vm4, %v2264_v1  ;;  %2713 = vmatpush.msra.mxu2 %v2226_v19  ;;  %v2435_v53 = vld [vmem:[#allocation6 + $0xc0] sm:$0xff]  ;;  %v2438_v41 = vld [vmem:[#allocation6 + $0xd8] sm:$0xff]  ;;  %v2437_v43 = vld [vmem:[#allocation6 + $0xd0] sm:$0xff] }
 0x3fe   :  { %4053 = vmatpush.msk.msra.mxu0 %vm2167_vm6, %v2231_v23  ;;  %v2440_v9 = vld [vmem:[#allocation6 + $0xe8] sm:$0xff]  ;;  %v2439_v36 = vld [vmem:[#allocation6 + $0xe0] sm:$0xff]  ;;  %v2442_v14 = vld [vmem:[#allocation6 + $0xf8] sm:$0xff] }
 0x3ff   :  { %4070 = vmatpush.msk.msra.mxu3 %vm2198_vm7, %v2262_v25  ;;  %2714 = vmatpush.msra.mxu2 %v2224_v29  ;;  %v2441_v16 = vld [vmem:[#allocation6 + $0xf0] sm:$0xff]  ;;  %v2444_v26 = vld [vmem:[#allocation6 + $0x108] sm:$0xff]  ;;  %v2443_v18 = vld [vmem:[#allocation6 + $0x100] sm:$0xff] }
 0x400   :  { %4054 = vmatpush.msk.msra.mxu0 %vm2165_vm8, %v2229_v10  ;;  %2610 = vmatmul.f32.gmra.mxu1 %v2416_v59  ;;  %v2446_v24 = vld [vmem:[#allocation6 + $0x118] sm:$0xff]  ;;  %v2347_v38 = vld [vmem:[#allocation11] sm:$0xff]  ;;  %v2445_v15 = vld [vmem:[#allocation6 + $0x110] sm:$0xff] }
 0x401   :  { %4071 = vmatpush.msk.msra.mxu3 %vm2196_vm5, %v2260_v33  ;;  %2715 = vmatpush.msra.mxu2 %v2222_v13  ;;  %v2448_v25 = vld [vmem:[#allocation6 + $0x128] sm:$0xff]  ;;  %v2447_v42 = vld [vmem:[#allocation6 + $0x120] sm:$0xff] }
 0x402   :  { %4055 = vmatpush.msk.msra.mxu0 %vm2163_vm3, %v2227_v37  ;;  %v2348_v29 = vld [vmem:[#allocation11 + $0x8] sm:$0xff]  ;;  %v2349_v37 = vld [vmem:[#allocation11 + $0x10] sm:$0xff] }
 0x403   :  { %4072 = vmatpush.msk.msra.mxu3 %vm2194_vm2, %v2258_v40  ;;  %2716 = vmatpush.msra.mxu2 %v2220_v44  ;;  %v2450_v44 = vld [vmem:[#allocation6 + $0x138] sm:$0xff] }
 0x404   :  { %4056 = vmatpush.msk.msra.mxu0 %vm2161_vm9, %v2225_v7  ;;  %2717 = vmatmul.f32.vlgmr.msra.gmra.mxu2 %v2411_v8 }
 0x405   :  { %4073 = vmatpush.msk.msra.mxu3 %vm2192_vm10, %v2256_v55 }
 0x406   :  { %4057 = vmatpush.msk.msra.mxu0 %vm2159_vm11, %v2223_v28 }
 0x407   :  { %4074 = vmatpush.msk.msra.mxu3 %vm2190_vm12, %v2254_v58  ;;  %v2351_v58 = vld [vmem:[#allocation11 + $0x20] sm:$0xff] }
 0x408   :  { %4058 = vmatpush.msk.msra.mxu0 %vm2157_vm13, %v2221_v49  ;;  %2613 = vmatmul.f32.gmra.mxu1 %v2418_v4 }
 0x409   :  { %4075 = vmatpush.msk.msra.mxu3 %vm2188_vm14, %v2252_v50 }
 0x40a   :  { %2830 = vmatmul.f32.vlgmr.msra.gmra.mxu3 %v5107_v20  ;;  %4059 = vmatpush.msk.msra.mxu0 %vm2155_vm15, %v2219_v52  ;;  %v2449_v52 = vld [vmem:[#allocation6 + $0x130] sm:$0xff] }
 0x40b   :  { %2491 = vmatmul.f32.vlgmr.msra.gmra.mxu0 %v2411_v8  ;;  %v2350_v8 = vld [vmem:[#allocation11 + $0x18] sm:$0xff] }
 0x40c   :  { %2720 = vmatmul.f32.gmra.mxu2 %v2413_v54 }
 0x410   :  { %2616 = vmatmul.f32.gmra.mxu1 %v2420_v30 }
 0x412   :  { %2833 = vmatmul.f32.gmra.mxu3 %v2414_v45 }
 0x413   :  { %2494 = vmatmul.f32.gmra.mxu0 %v2413_v54  ;;  %v2452_v54 = vld [vmem:[#allocation6 + $0x148] sm:$0xff] }
 0x414   :  { %2723 = vmatmul.f32.gmra.mxu2 %v2415_v21 }
 0x418   :  { %2619 = vmatmul.f32.gmra.mxu1 %v2422_v56 }
 0x41a   :  { %2836 = vmatmul.f32.gmra.mxu3 %v2416_v59 }
 0x41b   :  { %2497 = vmatmul.f32.gmra.mxu0 %v2415_v21  ;;  %v2352_v21 = vld [vmem:[#allocation11 + $0x28] sm:$0xff] }
 0x41c   :  { %2726 = vmatmul.f32.gmra.mxu2 %v2417_v22 }
 0x420   :  { %2622 = vmatmul.f32.gmra.mxu1 %v2424_v62 }
 0x422   :  { %2839 = vmatmul.f32.gmra.mxu3 %v2418_v4 }
 0x423   :  { %2500 = vmatmul.f32.gmra.mxu0 %v2417_v22 }
 0x424   :  { %2729 = vmatmul.f32.gmra.mxu2 %v2419_v32 }
 0x428   :  { %2625 = vmatmul.f32.gmra.mxu1 %v2426_v63 }
 0x42a   :  { %2842 = vmatmul.f32.gmra.mxu3 %v2420_v30 }
 0x42b   :  { %2503 = vmatmul.f32.gmra.mxu0 %v2419_v32 }
 0x42c   :  { %2732 = vmatmul.f32.gmra.mxu2 %v2421_v61 }
 0x430   :  { %2628 = vmatmul.f32.gmra.mxu1 %v2428_v57 }
 0x432   :  { %2845 = vmatmul.f32.gmra.mxu3 %v2422_v56 }
 0x433   :  { %2506 = vmatmul.f32.gmra.mxu0 %v2421_v61  ;;  %v2353_v61 = vld [vmem:[#allocation11 + $0x30] sm:$0xff] }
 0x434   :  { %2735 = vmatmul.f32.gmra.mxu2 %v2423_v48 }
 0x438   :  { %2631 = vmatmul.f32.gmra.mxu1 %v2430_v51 }
 0x43a   :  { %2848 = vmatmul.f32.gmra.mxu3 %v2424_v62 }
 0x43b   :  { %2509 = vmatmul.f32.gmra.mxu0 %v2423_v48 }
 0x43c   :  { %2738 = vmatmul.f32.gmra.mxu2 %v2425_v0 }
 0x440   :  { %2634 = vmatmul.f32.gmra.mxu1 %v2432_v46 }
 0x442   :  { %2851 = vmatmul.f32.gmra.mxu3 %v2426_v63  ;;  %v2451_v63 = vld [vmem:[#allocation6 + $0x140] sm:$0xff] }
 0x443   :  { %2512 = vmatmul.f32.gmra.mxu0 %v2425_v0  ;;  %v2454_v0 = vld [vmem:[#allocation6 + $0x158] sm:$0xff] }
 0x444   :  { %2741 = vmatmul.f32.gmra.mxu2 %v2427_v2 }
 0x448   :  { %2637 = vmatmul.f32.gmra.mxu1 %v2434_v6 }
 0x44a   :  { %2854 = vmatmul.f32.gmra.mxu3 %v2428_v57 }
 0x44b   :  { %2515 = vmatmul.f32.gmra.mxu0 %v2427_v2  ;;  %v2354_v2 = vld [vmem:[#allocation11 + $0x38] sm:$0xff] }
 0x44c   :  { %2744 = vmatmul.f32.gmra.mxu2 %v2429_v3 }
 0x450   :  { %2640 = vmatmul.f32.gmra.mxu1 %v2436_v12 }
 0x452   :  { %2857 = vmatmul.f32.gmra.mxu3 %v2430_v51 }
 0x453   :  { %2518 = vmatmul.f32.gmra.mxu0 %v2429_v3 }
 0x454   :  { %2747 = vmatmul.f32.gmra.mxu2 %v2431_v17 }
 0x458   :  { %2643 = vmatmul.f32.gmra.mxu1 %v2438_v41 }
 0x45a   :  { %2860 = vmatmul.f32.gmra.mxu3 %v2432_v46 }
 0x45b   :  { %2521 = vmatmul.f32.gmra.mxu0 %v2431_v17 }
 0x45c   :  { %2750 = vmatmul.f32.gmra.mxu2 %v2433_v5 }
 0x460   :  { %2646 = vmatmul.f32.gmra.mxu1 %v2440_v9 }
 0x462   :  { %2863 = vmatmul.f32.gmra.mxu3 %v2434_v6 }
 0x463   :  { %2524 = vmatmul.f32.gmra.mxu0 %v2433_v5  ;;  %v2355_v5 = vld [vmem:[#allocation11 + $0x40] sm:$0xff] }
 0x464   :  { %2753 = vmatmul.f32.gmra.mxu2 %v2435_v53 }
 0x468   :  { %2649 = vmatmul.f32.gmra.mxu1 %v2442_v14 }
 0x46a   :  { %2866 = vmatmul.f32.gmra.mxu3 %v2436_v12 }
 0x46b   :  { %2527 = vmatmul.f32.gmra.mxu0 %v2435_v53 }
 0x46c   :  { %2756 = vmatmul.f32.gmra.mxu2 %v2437_v43 }
 0x46d   :  { %v2605_v31 = vpop.f32.mrf.mxu1 }
 0x470   :  { %2652 = vmatmul.f32.gmra.mxu1 %v2444_v26 }
 0x472   :  { %2869 = vmatmul.f32.gmra.mxu3 %v2438_v41  ;;  %v2453_v41 = vld [vmem:[#allocation6 + $0x150] sm:$0xff] }
 0x473   :  { %2530 = vmatmul.f32.gmra.mxu0 %v2437_v43  ;;  %v2456_v43 = vld [vmem:[#allocation6 + $0x168] sm:$0xff] }
 0x474   :  { %2759 = vmatmul.f32.gmra.mxu2 %v2439_v36 }
 0x475   :  { %v2608_v11 = vpop.f32.mrf.mxu1 }
 0x478   :  { %2655 = vmatmul.f32.gmra.mxu1 %v2446_v24 }
 0x47a   :  { %2872 = vmatmul.f32.gmra.mxu3 %v2440_v9 }
 0x47b   :  { %2533 = vmatmul.f32.gmra.mxu0 %v2439_v36  ;;  %v2356_v36 = vld [vmem:[#allocation11 + $0x48] sm:$0xff] }
 0x47c   :  { %2762 = vmatmul.f32.gmra.mxu2 %v2441_v16 }
 0x47d   :  { %v2611_v19 = vpop.f32.mrf.mxu1 }
 0x480   :  { %2658 = vmatmul.f32.gmra.mxu1 %v2448_v25 }
 0x482   :  { %2875 = vmatmul.f32.gmra.mxu3 %v2442_v14 }
 0x483   :  { %2536 = vmatmul.f32.gmra.mxu0 %v2441_v16 }
 0x484   :  { %2765 = vmatmul.f32.gmra.mxu2 %v2443_v18 }
 0x485   :  { %v2614_v39 = vpop.f32.mrf.mxu1 }
 0x487   :  { %v2718_v20 = vpop.f32.mrf.mxu2 }
 0x488   :  { %v2492_v1 = vpop.f32.mrf.mxu0  ;;  %2661 = vmatmul.f32.gmra.mxu1 %v2450_v44 }
 0x489   :  { %v2606_v23 = vadd.f32 %v2605_v31, %v2492_v1  ;;  %v2455_v1 = vld [vmem:[#allocation6 + $0x160] sm:$0xff] }
 0x48a   :  { %2878 = vmatmul.f32.gmra.mxu3 %v2444_v26 }
 0x48b   :  { %v2927_v27 = vadd.f32 %v2606_v23, %v2347_v38  ;;  %2539 = vmatmul.f32.gmra.mxu0 %v2443_v18  ;;  %v2357_v18 = vld [vmem:[#allocation11 + $0x50] sm:$0xff]  ;;  %v2458_v38 = vld [vmem:[#allocation6 + $0x178] sm:$0xff] }
 0x48c   :  { %2768 = vmatmul.f32.gmra.mxu2 %v2445_v15  ;;  %v2358_v23 = vld [vmem:[#allocation11 + $0x58] sm:$0xff] }
 0x48d   :  { %2991 = vst [vmem:[#allocation11] sm:$0xff] %v2927_v27  ;;  %v2831_v10 = vpop.f32.mrf.mxu3  ;;  %v2617_v49 = vpop.f32.mrf.mxu1 }
 0x48e   :  { %v2832_v35 = vadd.f32 %v2831_v10, %v2718_v20 }
 0x48f   :  { %v2721_v33 = vpop.f32.mrf.mxu2 }
 0x490   :  { %v2928_v60 = vadd.f32 %v2832_v35, %v2348_v29  ;;  %v2495_v13 = vpop.f32.mrf.mxu0  ;;  %2664 = vmatmul.f32.gmra.mxu1 %v2452_v54  ;;  %v2359_v35 = vld [vmem:[#allocation11 + $0x60] sm:$0xff] }
 0x491   :  { %v2609_v40 = vadd.f32 %v2608_v11, %v2495_v13  ;;  %v2457_v13 = vld [vmem:[#allocation6 + $0x170] sm:$0xff] }
 0x492   :  { %2992 = vst [vmem:[#allocation11 + $0x8] sm:$0xff] %v2928_v60  ;;  %2881 = vmatmul.f32.gmra.mxu3 %v2446_v24 }
 0x493   :  { %v2929_v7 = vadd.f32 %v2609_v40, %v2349_v37  ;;  %2542 = vmatmul.f32.gmra.mxu0 %v2445_v15  ;;  %v2460_v37 = vld [vmem:[#allocation6 + $0x188] sm:$0xff] }
 0x494   :  { %2771 = vmatmul.f32.gmra.mxu2 %v2447_v42  ;;  %v2360_v40 = vld [vmem:[#allocation11 + $0x68] sm:$0xff] }
 0x495   :  { %2993 = vst [vmem:[#allocation11 + $0x10] sm:$0xff] %v2929_v7  ;;  %v2834_v34 = vpop.f32.mrf.mxu3  ;;  %v2620_v62 = vpop.f32.mrf.mxu1 }
 0x496   :  { %v2835_v45 = vadd.f32 %v2834_v34, %v2721_v33 }
 0x497   :  { %v2724_v55 = vpop.f32.mrf.mxu2 }
 0x498   :  { %v2930_v47 = vadd.f32 %v2835_v45, %v2350_v8  ;;  %v2498_v28 = vpop.f32.mrf.mxu0  ;;  %2667 = vmatmul.f32.gmra.mxu1 %v2454_v0  ;;  %v2361_v45 = vld [vmem:[#allocation11 + $0x70] sm:$0xff] }
 0x499   :  { %v2612_v50 = vadd.f32 %v2611_v19, %v2498_v28  ;;  %v2459_v28 = vld [vmem:[#allocation6 + $0x180] sm:$0xff] }
 0x49a   :  { %2994 = vst [vmem:[#allocation11 + $0x18] sm:$0xff] %v2930_v47  ;;  %2884 = vmatmul.f32.gmra.mxu3 %v2448_v25 }
 0x49b   :  { %v2931_v59 = vadd.f32 %v2612_v50, %v2351_v58  ;;  %2545 = vmatmul.f32.gmra.mxu0 %v2447_v42  ;;  %v2462_v58 = vld [vmem:[#allocation6 + $0x198] sm:$0xff] }
 0x49c   :  { %2774 = vmatmul.f32.gmra.mxu2 %v2449_v52  ;;  %v2362_v50 = vld [vmem:[#allocation11 + $0x78] sm:$0xff] }
 0x49d   :  { %2995 = vst [vmem:[#allocation11 + $0x20] sm:$0xff] %v2931_v59  ;;  %v2837_v4 = vpop.f32.mrf.mxu3  ;;  %v2623_v12 = vpop.f32.mrf.mxu1 }
 0x49e   :  { %v2838_v22 = vadd.f32 %v2837_v4, %v2724_v55 }
 0x49f   :  { %v2727_v30 = vpop.f32.mrf.mxu2 }
 0x4a0   :  { %v2932_v32 = vadd.f32 %v2838_v22, %v2352_v21  ;;  %v2501_v56 = vpop.f32.mrf.mxu0  ;;  %2670 = vmatmul.f32.gmra.mxu1 %v2456_v43  ;;  %v2363_v22 = vld [vmem:[#allocation11 + $0x80] sm:$0xff] }
 0x4a1   :  { %v2615_v48 = vadd.f32 %v2614_v39, %v2501_v56  ;;  %v2461_v56 = vld [vmem:[#allocation6 + $0x190] sm:$0xff] }
 0x4a2   :  { %2996 = vst [vmem:[#allocation11 + $0x28] sm:$0xff] %v2932_v32  ;;  %2887 = vmatmul.f32.gmra.mxu3 %v2450_v44 }
 0x4a3   :  { %v2933_v57 = vadd.f32 %v2615_v48, %v2353_v61  ;;  %2548 = vmatmul.f32.gmra.mxu0 %v2449_v52  ;;  %v2464_v61 = vld [vmem:[#allocation6 + $0x1a8] sm:$0xff] }
 0x4a4   :  { %2777 = vmatmul.f32.gmra.mxu2 %v2451_v63  ;;  %v2364_v48 = vld [vmem:[#allocation11 + $0x88] sm:$0xff] }
 0x4a5   :  { %2997 = vst [vmem:[#allocation11 + $0x30] sm:$0xff] %v2933_v57  ;;  %v2840_v51 = vpop.f32.mrf.mxu3  ;;  %v2626_v24 = vpop.f32.mrf.mxu1 }
 0x4a6   :  { %v2841_v3 = vadd.f32 %v2840_v51, %v2727_v30 }
 0x4a7   :  { %v2730_v46 = vpop.f32.mrf.mxu2 }
 0x4a8   :  { %v2934_v17 = vadd.f32 %v2841_v3, %v2354_v2  ;;  %v2504_v6 = vpop.f32.mrf.mxu0  ;;  %2673 = vmatmul.f32.gmra.mxu1 %v2458_v38  ;;  %v2365_v3 = vld [vmem:[#allocation11 + $0x90] sm:$0xff] }
 0x4a9   :  { %v2618_v53 = vadd.f32 %v2617_v49, %v2504_v6  ;;  %v2463_v6 = vld [vmem:[#allocation6 + $0x1a0] sm:$0xff] }
 0x4aa   :  { %2998 = vst [vmem:[#allocation11 + $0x38] sm:$0xff] %v2934_v17  ;;  %2890 = vmatmul.f32.gmra.mxu3 %v2452_v54 }
 0x4ab   :  { %v2935_v9 = vadd.f32 %v2618_v53, %v2355_v5  ;;  %2551 = vmatmul.f32.gmra.mxu0 %v2451_v63  ;;  %v2466_v5 = vld [vmem:[#allocation6 + $0x1b8] sm:$0xff] }
 0x4ac   :  { %2780 = vmatmul.f32.gmra.mxu2 %v2453_v41  ;;  %v2366_v53 = vld [vmem:[#allocation11 + $0x98] sm:$0xff] }
 0x4ad   :  { %2999 = vst [vmem:[#allocation11 + $0x40] sm:$0xff] %v2935_v9  ;;  %v2843_v14 = vpop.f32.mrf.mxu3  ;;  %v2629_v33 = vpop.f32.mrf.mxu1 }
 0x4ae   :  { %v2844_v31 = vadd.f32 %v2843_v14, %v2730_v46 }
 0x4af   :  { %v2733_v16 = vpop.f32.mrf.mxu2 }
 0x4b0   :  { %v2936_v26 = vadd.f32 %v2844_v31, %v2356_v36  ;;  %v2507_v11 = vpop.f32.mrf.mxu0  ;;  %2676 = vmatmul.f32.gmra.mxu1 %v2460_v37  ;;  %v2367_v31 = vld [vmem:[#allocation11 + $0xa0] sm:$0xff] }
 0x4b1   :  { %v2621_v20 = vadd.f32 %v2620_v62, %v2507_v11  ;;  %v2465_v11 = vld [vmem:[#allocation6 + $0x1b0] sm:$0xff] }
 0x4b2   :  { %3000 = vst [vmem:[#allocation11 + $0x48] sm:$0xff] %v2936_v26  ;;  %2893 = vmatmul.f32.gmra.mxu3 %v2454_v0 }
 0x4b3   :  { %v2937_v19 = vadd.f32 %v2621_v20, %v2357_v18  ;;  %2554 = vmatmul.f32.gmra.mxu0 %v2453_v41  ;;  %v2468_v18 = vld [vmem:[#allocation6 + $0x1c8] sm:$0xff] }
 0x4b4   :  { %2783 = vmatmul.f32.gmra.mxu2 %v2455_v1  ;;  %v2368_v20 = vld [vmem:[#allocation11 + $0xa8] sm:$0xff] }
 0x4b5   :  { %3001 = vst [vmem:[#allocation11 + $0x50] sm:$0xff] %v2937_v19  ;;  %v2846_v15 = vpop.f32.mrf.mxu3  ;;  %v2632_v55 = vpop.f32.mrf.mxu1 }
 0x4b6   :  { %v2847_v25 = vadd.f32 %v2846_v15, %v2733_v16 }
 0x4b7   :  { %v2736_v27 = vpop.f32.mrf.mxu2 }
 0x4b8   :  { %v2938_v29 = vadd.f32 %v2847_v25, %v2358_v23  ;;  %v2510_v10 = vpop.f32.mrf.mxu0  ;;  %2679 = vmatmul.f32.gmra.mxu1 %v2462_v58  ;;  %v2369_v25 = vld [vmem:[#allocation11 + $0xb0] sm:$0xff] }
 0x4b9   :  { %v2624_v60 = vadd.f32 %v2623_v12, %v2510_v10  ;;  %v2467_v10 = vld [vmem:[#allocation6 + $0x1c0] sm:$0xff] }
 0x4ba   :  { %3002 = vst [vmem:[#allocation11 + $0x58] sm:$0xff] %v2938_v29  ;;  %2896 = vmatmul.f32.gmra.mxu3 %v2456_v43 }
 0x4bb   :  { %v2939_v39 = vadd.f32 %v2624_v60, %v2359_v35  ;;  %2557 = vmatmul.f32.gmra.mxu0 %v2455_v1  ;;  %v2470_v35 = vld [vmem:[#allocation6 + $0x1d8] sm:$0xff] }
 0x4bc   :  { %2786 = vmatmul.f32.gmra.mxu2 %v2457_v13  ;;  %v2370_v60 = vld [vmem:[#allocation11 + $0xb8] sm:$0xff] }
 0x4bd   :  { %3003 = vst [vmem:[#allocation11 + $0x60] sm:$0xff] %v2939_v39  ;;  %v2849_v42 = vpop.f32.mrf.mxu3  ;;  %v2635_v30 = vpop.f32.mrf.mxu1 }
 0x4be   :  { %v2850_v44 = vadd.f32 %v2849_v42, %v2736_v27 }
 0x4bf   :  { %v2739_v7 = vpop.f32.mrf.mxu2 }
 0x4c0   :  { %v2940_v8 = vadd.f32 %v2850_v44, %v2360_v40  ;;  %v2513_v34 = vpop.f32.mrf.mxu0  ;;  %2682 = vmatmul.f32.gmra.mxu1 %v2464_v61  ;;  %v2371_v44 = vld [vmem:[#allocation11 + $0xc0] sm:$0xff] }
 0x4c1   :  { %v2627_v47 = vadd.f32 %v2626_v24, %v2513_v34  ;;  %v2469_v34 = vld [vmem:[#allocation6 + $0x1d0] sm:$0xff] }
 0x4c2   :  { %3004 = vst [vmem:[#allocation11 + $0x68] sm:$0xff] %v2940_v8  ;;  %2899 = vmatmul.f32.gmra.mxu3 %v2458_v38 }
 0x4c3   :  { %v2941_v49 = vadd.f32 %v2627_v47, %v2361_v45  ;;  %2560 = vmatmul.f32.gmra.mxu0 %v2457_v13  ;;  %v2472_v45 = vld [vmem:[#allocation6 + $0x1e8] sm:$0xff] }
 0x4c4   :  { %2789 = vmatmul.f32.gmra.mxu2 %v2459_v28  ;;  %v2372_v47 = vld [vmem:[#allocation11 + $0xc8] sm:$0xff] }
 0x4c5   :  { %3005 = vst [vmem:[#allocation11 + $0x70] sm:$0xff] %v2941_v49  ;;  %v2852_v52 = vpop.f32.mrf.mxu3  ;;  %v2638_v46 = vpop.f32.mrf.mxu1 }
 0x4c6   :  { %v2853_v54 = vadd.f32 %v2852_v52, %v2739_v7 }
 0x4c7   :  { %v2742_v59 = vpop.f32.mrf.mxu2 }
 0x4c8   :  { %v2942_v21 = vadd.f32 %v2853_v54, %v2362_v50  ;;  %v2516_v4 = vpop.f32.mrf.mxu0  ;;  %2685 = vmatmul.f32.gmra.mxu1 %v2466_v5  ;;  %v2373_v54 = vld [vmem:[#allocation11 + $0xd0] sm:$0xff] }
 0x4c9   :  { %v2630_v32 = vadd.f32 %v2629_v33, %v2516_v4  ;;  %v2471_v4 = vld [vmem:[#allocation6 + $0x1e0] sm:$0xff] }
 0x4ca   :  { %3006 = vst [vmem:[#allocation11 + $0x78] sm:$0xff] %v2942_v21  ;;  %2902 = vmatmul.f32.gmra.mxu3 %v2460_v37 }
 0x4cb   :  { %v2943_v62 = vadd.f32 %v2630_v32, %v2363_v22  ;;  %2563 = vmatmul.f32.gmra.mxu0 %v2459_v28  ;;  %v2474_v22 = vld [vmem:[#allocation6 + $0x1f8] sm:$0xff] }
 0x4cc   :  { %2792 = vmatmul.f32.gmra.mxu2 %v2461_v56  ;;  %v2374_v32 = vld [vmem:[#allocation11 + $0xd8] sm:$0xff] }
 0x4cd   :  { %3007 = vst [vmem:[#allocation11 + $0x80] sm:$0xff] %v2943_v62  ;;  %v2855_v63 = vpop.f32.mrf.mxu3  ;;  %v2641_v16 = vpop.f32.mrf.mxu1 }
 0x4ce   :  { %v2856_v0 = vadd.f32 %v2855_v63, %v2742_v59 }
 0x4cf   :  { %v2745_v57 = vpop.f32.mrf.mxu2 }
 0x4d0   :  { %v2944_v2 = vadd.f32 %v2856_v0, %v2364_v48  ;;  %v2519_v51 = vpop.f32.mrf.mxu0  ;;  %2688 = vmatmul.f32.gmra.mxu1 %v2468_v18  ;;  %v2375_v0 = vld [vmem:[#allocation11 + $0xe0] sm:$0xff] }
 0x4d1   :  { %v2633_v17 = vadd.f32 %v2632_v55, %v2519_v51  ;;  %v2473_v51 = vld [vmem:[#allocation6 + $0x1f0] sm:$0xff] }
 0x4d2   :  { %3008 = vst [vmem:[#allocation11 + $0x88] sm:$0xff] %v2944_v2  ;;  %2905 = vmatmul.f32.gmra.mxu3 %v2462_v58 }
 0x4d3   :  { %v2945_v12 = vadd.f32 %v2633_v17, %v2365_v3  ;;  %2566 = vmatmul.f32.gmra.mxu0 %v2461_v56 }
 0x4d4   :  { %2795 = vmatmul.f32.gmra.mxu2 %v2463_v6 }
 0x4d5   :  { %3009 = vst [vmem:[#allocation11 + $0x90] sm:$0xff] %v2945_v12  ;;  %v2858_v41 = vpop.f32.mrf.mxu3  ;;  %v2644_v27 = vpop.f32.mrf.mxu1 }
 0x4d6   :  { %v2859_v43 = vadd.f32 %v2858_v41, %v2745_v57  ;;  %v2377_v41 = vld [vmem:[#allocation11 + $0xf0] sm:$0xff] }
 0x4d7   :  { %v2748_v9 = vpop.f32.mrf.mxu2 }
 0x4d8   :  { %v2946_v36 = vadd.f32 %v2859_v43, %v2366_v53  ;;  %v2522_v14 = vpop.f32.mrf.mxu0  ;;  %2691 = vmatmul.f32.gmra.mxu1 %v2470_v35 }
 0x4d9   :  { %v2636_v26 = vadd.f32 %v2635_v30, %v2522_v14  ;;  %v2378_v14 = vld [vmem:[#allocation11 + $0xf8] sm:$0xff] }
 0x4da   :  { %3010 = vst [vmem:[#allocation11 + $0x98] sm:$0xff] %v2946_v36  ;;  %2908 = vmatmul.f32.gmra.mxu3 %v2464_v61 }
 0x4db   :  { %v2947_v24 = vadd.f32 %v2636_v26, %v2367_v31  ;;  %2569 = vmatmul.f32.gmra.mxu0 %v2463_v6 }
 0x4dc   :  { %2798 = vmatmul.f32.gmra.mxu2 %v2465_v11 }
 0x4dd   :  { %3011 = vst [vmem:[#allocation11 + $0xa0] sm:$0xff] %v2947_v24  ;;  %v2861_v1 = vpop.f32.mrf.mxu3  ;;  %v2647_v7 = vpop.f32.mrf.mxu1  ;;  %v2379_v24 = vld [vmem:[#allocation11 + $0x100] sm:$0xff] }
 0x4de   :  { %v2862_v38 = vadd.f32 %v2861_v1, %v2748_v9 }
 0x4df   :  { %v2751_v19 = vpop.f32.mrf.mxu2 }
 0x4e0   :  { %v2948_v23 = vadd.f32 %v2862_v38, %v2368_v20  ;;  %v2525_v15 = vpop.f32.mrf.mxu0  ;;  %2694 = vmatmul.f32.gmra.mxu1 %v2472_v45 }
 0x4e1   :  { %v2639_v29 = vadd.f32 %v2638_v46, %v2525_v15  ;;  %v2376_v46 = vld [vmem:[#allocation11 + $0xe8] sm:$0xff] }
 0x4e2   :  { %3012 = vst [vmem:[#allocation11 + $0xa8] sm:$0xff] %v2948_v23  ;;  %2911 = vmatmul.f32.gmra.mxu3 %v2466_v5 }
 0x4e3   :  { %v2949_v33 = vadd.f32 %v2639_v29, %v2369_v25  ;;  %2572 = vmatmul.f32.gmra.mxu0 %v2465_v11 }
 0x4e4   :  { %2801 = vmatmul.f32.gmra.mxu2 %v2467_v10 }
 0x4e5   :  { %3013 = vst [vmem:[#allocation11 + $0xb0] sm:$0xff] %v2949_v33  ;;  %v2864_v13 = vpop.f32.mrf.mxu3  ;;  %v2650_v59 = vpop.f32.mrf.mxu1 }
 0x4e6   :  { %v2865_v37 = vadd.f32 %v2864_v13, %v2751_v19  ;;  %v2380_v19 = vld [vmem:[#allocation11 + $0x108] sm:$0xff]  ;;  %v2382_v13 = vld [vmem:[#allocation11 + $0x118] sm:$0xff] }
 0x4e7   :  { %v2754_v39 = vpop.f32.mrf.mxu2 }
 0x4e8   :  { %v2950_v40 = vadd.f32 %v2865_v37, %v2370_v60  ;;  %v2528_v42 = vpop.f32.mrf.mxu0  ;;  %2697 = vmatmul.f32.gmra.mxu1 %v2474_v22 }
 0x4e9   :  { %v2642_v8 = vadd.f32 %v2641_v16, %v2528_v42 }
 0x4ea   :  { %3014 = vst [vmem:[#allocation11 + $0xb8] sm:$0xff] %v2950_v40  ;;  %2914 = vmatmul.f32.gmra.mxu3 %v2468_v18 }
 0x4eb   :  { %v2951_v55 = vadd.f32 %v2642_v8, %v2371_v44  ;;  %2575 = vmatmul.f32.gmra.mxu0 %v2467_v10  ;;  %v2381_v10 = vld [vmem:[#allocation11 + $0x110] sm:$0xff] }
 0x4ec   :  { %2804 = vmatmul.f32.gmra.mxu2 %v2469_v34 }
 0x4ed   :  { %3015 = vst [vmem:[#allocation11 + $0xc0] sm:$0xff] %v2951_v55  ;;  %v2867_v28 = vpop.f32.mrf.mxu3  ;;  %v2653_v57 = vpop.f32.mrf.mxu1  ;;  %v2384_v55 = vld [vmem:[#allocation11 + $0x128] sm:$0xff] }
 0x4ee   :  { %v2868_v58 = vadd.f32 %v2867_v28, %v2754_v39 }
 0x4ef   :  { %v2757_v49 = vpop.f32.mrf.mxu2 }
 0x4f0   :  { %v2952_v50 = vadd.f32 %v2868_v58, %v2372_v47  ;;  %v2531_v52 = vpop.f32.mrf.mxu0 }
 0x4f1   :  { %v2645_v21 = vadd.f32 %v2644_v27, %v2531_v52  ;;  %v2385_v52 = vld [vmem:[#allocation11 + $0x130] sm:$0xff] }
 0x4f2   :  { %3016 = vst [vmem:[#allocation11 + $0xc8] sm:$0xff] %v2952_v50  ;;  %2917 = vmatmul.f32.gmra.mxu3 %v2470_v35 }
 0x4f3   :  { %v2953_v30 = vadd.f32 %v2645_v21, %v2373_v54  ;;  %2578 = vmatmul.f32.gmra.mxu0 %v2469_v34 }
 0x4f4   :  { %2807 = vmatmul.f32.gmra.mxu2 %v2471_v4 }
 0x4f5   :  { %3017 = vst [vmem:[#allocation11 + $0xd0] sm:$0xff] %v2953_v30  ;;  %v2870_v56 = vpop.f32.mrf.mxu3  ;;  %v2656_v43 = vpop.f32.mrf.mxu1 }
 0x4f6   :  { %v2871_v61 = vadd.f32 %v2870_v56, %v2757_v49 }
 0x4f7   :  { %v2760_v62 = vpop.f32.mrf.mxu2 }
 0x4f8   :  { %v2954_v48 = vadd.f32 %v2871_v61, %v2374_v32  ;;  %v2534_v63 = vpop.f32.mrf.mxu0 }
 0x4f9   :  { %v2648_v2 = vadd.f32 %v2647_v7, %v2534_v63  ;;  %v2383_v7 = vld [vmem:[#allocation11 + $0x120] sm:$0xff] }
 0x4fa   :  { %3018 = vst [vmem:[#allocation11 + $0xd8] sm:$0xff] %v2954_v48  ;;  %2920 = vmatmul.f32.gmra.mxu3 %v2472_v45 }
 0x4fb   :  { %v2955_v3 = vadd.f32 %v2648_v2, %v2375_v0  ;;  %2581 = vmatmul.f32.gmra.mxu0 %v2471_v4  ;;  %v2386_v4 = vld [vmem:[#allocation11 + $0x138] sm:$0xff] }
 0x4fc   :  { %2810 = vmatmul.f32.gmra.mxu2 %v2473_v51 }
 0x4fd   :  { %3019 = vst [vmem:[#allocation11 + $0xe0] sm:$0xff] %v2955_v3  ;;  %v2873_v17 = vpop.f32.mrf.mxu3  ;;  %v2659_v20 = vpop.f32.mrf.mxu1 }
 0x4fe   :  { %v2874_v6 = vadd.f32 %v2873_v17, %v2760_v62  ;;  %v2387_v62 = vld [vmem:[#allocation11 + $0x140] sm:$0xff] }
 0x4ff   :  { %v2763_v5 = vpop.f32.mrf.mxu2 }
 0x500   :  { %v2956_v12 = vadd.f32 %v2874_v6, %v2376_v46  ;;  %v2537_v53 = vpop.f32.mrf.mxu0  ;;  %v2389_v6 = vld [vmem:[#allocation11 + $0x150] sm:$0xff] }
 0x501   :  { %v2651_v9 = vadd.f32 %v2650_v59, %v2537_v53 }
 0x502   :  { %3020 = vst [vmem:[#allocation11 + $0xe8] sm:$0xff] %v2956_v12  ;;  %2923 = vmatmul.f32.gmra.mxu3 %v2474_v22 }
 0x503   :  { %v2957_v36 = vadd.f32 %v2651_v9, %v2377_v41  ;;  %2584 = vmatmul.f32.gmra.mxu0 %v2473_v51  ;;  %v2390_v41 = vld [vmem:[#allocation11 + $0x158] sm:$0xff] }
 0x505   :  { %3021 = vst [vmem:[#allocation11 + $0xf0] sm:$0xff] %v2957_v36  ;;  %v2876_v31 = vpop.f32.mrf.mxu3  ;;  %v2662_v35 = vpop.f32.mrf.mxu1 }
 0x506   :  { %v2877_v16 = vadd.f32 %v2876_v31, %v2763_v5 }
 0x507   :  { %v2766_v26 = vpop.f32.mrf.mxu2 }
 0x508   :  { %v2958_v11 = vadd.f32 %v2877_v16, %v2378_v14  ;;  %v2540_v18 = vpop.f32.mrf.mxu0  ;;  %v2391_v16 = vld [vmem:[#allocation11 + $0x160] sm:$0xff] }
 0x509   :  { %v2654_v1 = vadd.f32 %v2653_v57, %v2540_v18  ;;  %v2388_v57 = vld [vmem:[#allocation11 + $0x148] sm:$0xff] }
 0x50a   :  { %3022 = vst [vmem:[#allocation11 + $0xf8] sm:$0xff] %v2958_v11 }
 0x50b   :  { %v2959_v38 = vadd.f32 %v2654_v1, %v2379_v24  ;;  %v2392_v24 = vld [vmem:[#allocation11 + $0x168] sm:$0xff] }
 0x50d   :  { %3023 = vst [vmem:[#allocation11 + $0x100] sm:$0xff] %v2959_v38  ;;  %v2879_v23 = vpop.f32.mrf.mxu3  ;;  %v2665_v8 = vpop.f32.mrf.mxu1 }
 0x50e   :  { %v2880_v15 = vadd.f32 %v2879_v23, %v2766_v26 }
 0x50f   :  { %v2769_v25 = vpop.f32.mrf.mxu2 }
 0x510   :  { %v2960_v27 = vadd.f32 %v2880_v15, %v2380_v19  ;;  %v2543_v29 = vpop.f32.mrf.mxu0  ;;  %v2393_v15 = vld [vmem:[#allocation11 + $0x170] sm:$0xff] }
 0x511   :  { %v2657_v33 = vadd.f32 %v2656_v43, %v2543_v29 }
 0x512   :  { %3024 = vst [vmem:[#allocation11 + $0x108] sm:$0xff] %v2960_v27 }
 0x513   :  { %v2961_v60 = vadd.f32 %v2657_v33, %v2381_v10  ;;  %v2394_v10 = vld [vmem:[#allocation11 + $0x178] sm:$0xff] }
 0x515   :  { %3025 = vst [vmem:[#allocation11 + $0x110] sm:$0xff] %v2961_v60  ;;  %v2882_v37 = vpop.f32.mrf.mxu3  ;;  %v2668_v54 = vpop.f32.mrf.mxu1 }
 0x516   :  { %v2883_v39 = vadd.f32 %v2882_v37, %v2769_v25 }
 0x517   :  { %v2772_v40 = vpop.f32.mrf.mxu2 }
 0x518   :  { %v2962_v42 = vadd.f32 %v2883_v39, %v2382_v13  ;;  %v2546_v44 = vpop.f32.mrf.mxu0  ;;  %v2395_v39 = vld [vmem:[#allocation11 + $0x180] sm:$0xff] }
 0x519   :  { %v2660_v34 = vadd.f32 %v2659_v20, %v2546_v44 }
 0x51a   :  { %3026 = vst [vmem:[#allocation11 + $0x118] sm:$0xff] %v2962_v42 }
 0x51b   :  { %v2963_v45 = vadd.f32 %v2660_v34, %v2383_v7  ;;  %v2396_v7 = vld [vmem:[#allocation11 + $0x188] sm:$0xff] }
 0x51d   :  { %3027 = vst [vmem:[#allocation11 + $0x120] sm:$0xff] %v2963_v45  ;;  %v2885_v47 = vpop.f32.mrf.mxu3  ;;  %v2671_v48 = vpop.f32.mrf.mxu1 }
 0x51e   :  { %v2886_v28 = vadd.f32 %v2885_v47, %v2772_v40 }
 0x51f   :  { %v2775_v58 = vpop.f32.mrf.mxu2 }
 0x520   :  { %v2964_v49 = vadd.f32 %v2886_v28, %v2384_v55  ;;  %v2549_v50 = vpop.f32.mrf.mxu0  ;;  %v2397_v28 = vld [vmem:[#allocation11 + $0x190] sm:$0xff] }
 0x521   :  { %v2663_v59 = vadd.f32 %v2662_v35, %v2549_v50  ;;  %v2398_v50 = vld [vmem:[#allocation11 + $0x198] sm:$0xff] }
 0x522   :  { %3028 = vst [vmem:[#allocation11 + $0x128] sm:$0xff] %v2964_v49 }
 0x523   :  { %v2965_v21 = vadd.f32 %v2663_v59, %v2385_v52 }
 0x525   :  { %3029 = vst [vmem:[#allocation11 + $0x130] sm:$0xff] %v2965_v21  ;;  %v2888_v22 = vpop.f32.mrf.mxu3  ;;  %v2674_v5 = vpop.f32.mrf.mxu1 }
 0x526   :  { %v2889_v30 = vadd.f32 %v2888_v22, %v2775_v58 }
 0x527   :  { %v2778_v32 = vpop.f32.mrf.mxu2 }
 0x528   :  { %v2966_v56 = vadd.f32 %v2889_v30, %v2386_v4  ;;  %v2552_v61 = vpop.f32.mrf.mxu0  ;;  %v2399_v30 = vld [vmem:[#allocation11 + $0x1a0] sm:$0xff] }
 0x529   :  { %v2666_v63 = vadd.f32 %v2665_v8, %v2552_v61  ;;  %v2400_v61 = vld [vmem:[#allocation11 + $0x1a8] sm:$0xff] }
 0x52a   :  { %3030 = vst [vmem:[#allocation11 + $0x138] sm:$0xff] %v2966_v56 }
 0x52b   :  { %v2967_v0 = vadd.f32 %v2666_v63, %v2387_v62 }
 0x52d   :  { %3031 = vst [vmem:[#allocation11 + $0x140] sm:$0xff] %v2967_v0  ;;  %v2891_v2 = vpop.f32.mrf.mxu3  ;;  %v2677_v26 = vpop.f32.mrf.mxu1 }
 0x52e   :  { %v2892_v51 = vadd.f32 %v2891_v2, %v2778_v32  ;;  %v2401_v2 = vld [vmem:[#allocation11 + $0x1b0] sm:$0xff] }
 0x52f   :  { %v2781_v3 = vpop.f32.mrf.mxu2 }
 0x530   :  { %v2968_v46 = vadd.f32 %v2892_v51, %v2388_v57  ;;  %v2555_v17 = vpop.f32.mrf.mxu0 }
 0x531   :  { %v2669_v12 = vadd.f32 %v2668_v54, %v2555_v17  ;;  %v2402_v17 = vld [vmem:[#allocation11 + $0x1b8] sm:$0xff] }
 0x532   :  { %3032 = vst [vmem:[#allocation11 + $0x148] sm:$0xff] %v2968_v46 }
 0x533   :  { %v2969_v53 = vadd.f32 %v2669_v12, %v2389_v6 }
 0x535   :  { %3033 = vst [vmem:[#allocation11 + $0x150] sm:$0xff] %v2969_v53  ;;  %v2894_v43 = vpop.f32.mrf.mxu3  ;;  %v2680_v27 = vpop.f32.mrf.mxu1 }
 0x536   :  { %v2895_v9 = vadd.f32 %v2894_v43, %v2781_v3  ;;  %v2403_v43 = vld [vmem:[#allocation11 + $0x1c0] sm:$0xff] }
 0x537   :  { %v2784_v36 = vpop.f32.mrf.mxu2 }
 0x538   :  { %v2970_v14 = vadd.f32 %v2895_v9, %v2390_v41  ;;  %v2558_v31 = vpop.f32.mrf.mxu0 }
 0x539   :  { %v2672_v11 = vadd.f32 %v2671_v48, %v2558_v31  ;;  %v2404_v31 = vld [vmem:[#allocation11 + $0x1c8] sm:$0xff] }
 0x53a   :  { %3034 = vst [vmem:[#allocation11 + $0x158] sm:$0xff] %v2970_v14 }
 0x53b   :  { %v2971_v18 = vadd.f32 %v2672_v11, %v2391_v16 }
 0x53d   :  { %3035 = vst [vmem:[#allocation11 + $0x160] sm:$0xff] %v2971_v18  ;;  %v2897_v20 = vpop.f32.mrf.mxu3  ;;  %v2683_v44 = vpop.f32.mrf.mxu1 }
 0x53e   :  { %v2898_v1 = vadd.f32 %v2897_v20, %v2784_v36  ;;  %v2405_v20 = vld [vmem:[#allocation11 + $0x1d0] sm:$0xff] }
 0x53f   :  { %v2787_v38 = vpop.f32.mrf.mxu2 }
 0x540   :  { %v2972_v19 = vadd.f32 %v2898_v1, %v2392_v24  ;;  %v2561_v23 = vpop.f32.mrf.mxu0 }
 0x541   :  { %v2675_v25 = vadd.f32 %v2674_v5, %v2561_v23  ;;  %v2406_v23 = vld [vmem:[#allocation11 + $0x1d8] sm:$0xff] }
 0x542   :  { %3036 = vst [vmem:[#allocation11 + $0x168] sm:$0xff] %v2972_v19 }
 0x543   :  { %v2973_v29 = vadd.f32 %v2675_v25, %v2393_v15 }
 0x545   :  { %3037 = vst [vmem:[#allocation11 + $0x170] sm:$0xff] %v2973_v29  ;;  %v2900_v35 = vpop.f32.mrf.mxu3  ;;  %v2686_v59 = vpop.f32.mrf.mxu1 }
 0x546   :  { %v2901_v33 = vadd.f32 %v2900_v35, %v2787_v38 }
 0x547   :  { %v2790_v60 = vpop.f32.mrf.mxu2 }
 0x548   :  { %v2974_v13 = vadd.f32 %v2901_v33, %v2394_v10  ;;  %v2564_v37 = vpop.f32.mrf.mxu0  ;;  %v2407_v10 = vld [vmem:[#allocation11 + $0x1e0] sm:$0xff] }
 0x549   :  { %v2678_v40 = vadd.f32 %v2677_v26, %v2564_v37 }
 0x54a   :  { %3038 = vst [vmem:[#allocation11 + $0x178] sm:$0xff] %v2974_v13  ;;  %v2408_v13 = vld [vmem:[#allocation11 + $0x1e8] sm:$0xff] }
 0x54b   :  { %v2975_v42 = vadd.f32 %v2678_v40, %v2395_v39 }
 0x54d   :  { %3039 = vst [vmem:[#allocation11 + $0x180] sm:$0xff] %v2975_v42  ;;  %v2903_v8 = vpop.f32.mrf.mxu3  ;;  %v2689_v51 = vpop.f32.mrf.mxu1 }
 0x54e   :  { %v2904_v34 = vadd.f32 %v2903_v8, %v2790_v60 }
 0x54f   :  { %v2793_v45 = vpop.f32.mrf.mxu2 }
 0x550   :  { %v2976_v55 = vadd.f32 %v2904_v34, %v2396_v7  ;;  %v2567_v47 = vpop.f32.mrf.mxu0  ;;  %v2409_v7 = vld [vmem:[#allocation11 + $0x1f0] sm:$0xff] }
 0x551   :  { %v2681_v58 = vadd.f32 %v2680_v27, %v2567_v47 }
 0x552   :  { %3040 = vst [vmem:[#allocation11 + $0x188] sm:$0xff] %v2976_v55  ;;  %v2410_v55 = vld [vmem:[#allocation11 + $0x1f8] sm:$0xff] }
 0x553   :  { %v2977_v49 = vadd.f32 %v2681_v58, %v2397_v28 }
 0x555   :  { %3041 = vst [vmem:[#allocation11 + $0x190] sm:$0xff] %v2977_v49  ;;  %v2906_v52 = vpop.f32.mrf.mxu3  ;;  %v2692_v36 = vpop.f32.mrf.mxu1 }
 0x556   :  { %v2907_v54 = vadd.f32 %v2906_v52, %v2793_v45 }
 0x557   :  { %v2796_v21 = vpop.f32.mrf.mxu2 }
 0x558   :  { %v2978_v4 = vadd.f32 %v2907_v54, %v2398_v50  ;;  %v2570_v22 = vpop.f32.mrf.mxu0 }
 0x559   :  { %v2684_v32 = vadd.f32 %v2683_v44, %v2570_v22 }
 0x55a   :  { %3042 = vst [vmem:[#allocation11 + $0x198] sm:$0xff] %v2978_v4 }
 0x55b   :  { %v2979_v56 = vadd.f32 %v2684_v32, %v2399_v30 }
 0x55d   :  { %3043 = vst [vmem:[#allocation11 + $0x1a0] sm:$0xff] %v2979_v56  ;;  %v2909_v62 = vpop.f32.mrf.mxu3  ;;  %v2695_v19 = vpop.f32.mrf.mxu1 }
 0x55e   :  { %v2910_v48 = vadd.f32 %v2909_v62, %v2796_v21 }
 0x55f   :  { %v2799_v63 = vpop.f32.mrf.mxu2 }
 0x560   :  { %v2980_v0 = vadd.f32 %v2910_v48, %v2400_v61  ;;  %v2573_v57 = vpop.f32.mrf.mxu0 }
 0x561   :  { %v2687_v3 = vadd.f32 %v2686_v59, %v2573_v57 }
 0x562   :  { %3044 = vst [vmem:[#allocation11 + $0x1a8] sm:$0xff] %v2980_v0 }
 0x563   :  { %v2981_v46 = vadd.f32 %v2687_v3, %v2401_v2 }
 0x565   :  { %3045 = vst [vmem:[#allocation11 + $0x1b0] sm:$0xff] %v2981_v46  ;;  %v2912_v6 = vpop.f32.mrf.mxu3  ;;  %v2698_v40 = vpop.f32.mrf.mxu1 }
 0x566   :  { %v2913_v5 = vadd.f32 %v2912_v6, %v2799_v63 }
 0x567   :  { %v2802_v12 = vpop.f32.mrf.mxu2 }
 0x568   :  { %v2982_v53 = vadd.f32 %v2913_v5, %v2402_v17  ;;  %v2576_v41 = vpop.f32.mrf.mxu0 }
 0x569   :  { %v2690_v9 = vadd.f32 %v2689_v51, %v2576_v41 }
 0x56a   :  { %3046 = vst [vmem:[#allocation11 + $0x1b8] sm:$0xff] %v2982_v53 }
 0x56b   :  { %v2983_v14 = vadd.f32 %v2690_v9, %v2403_v43 }
 0x56d   :  { %3047 = vst [vmem:[#allocation11 + $0x1c0] sm:$0xff] %v2983_v14  ;;  %v2915_v16 = vpop.f32.mrf.mxu3 }
 0x56e   :  { %v2916_v26 = vadd.f32 %v2915_v16, %v2802_v12 }
 0x56f   :  { %v2805_v11 = vpop.f32.mrf.mxu2 }
 0x570   :  { %v2984_v18 = vadd.f32 %v2916_v26, %v2404_v31  ;;  %v2579_v24 = vpop.f32.mrf.mxu0 }
 0x571   :  { %v2693_v1 = vadd.f32 %v2692_v36, %v2579_v24 }
 0x572   :  { %3048 = vst [vmem:[#allocation11 + $0x1c8] sm:$0xff] %v2984_v18 }
 0x573   :  { %v2985_v38 = vadd.f32 %v2693_v1, %v2405_v20 }
 0x575   :  { %3049 = vst [vmem:[#allocation11 + $0x1d0] sm:$0xff] %v2985_v38  ;;  %v2918_v15 = vpop.f32.mrf.mxu3 }
 0x576   :  { %v2919_v25 = vadd.f32 %v2918_v15, %v2805_v11 }
 0x577   :  { %v2808_v33 = vpop.f32.mrf.mxu2 }
 0x578   :  { %v2986_v27 = vadd.f32 %v2919_v25, %v2406_v23  ;;  %v2582_v29 = vpop.f32.mrf.mxu0 }
 0x579   :  { %v2696_v35 = vadd.f32 %v2695_v19, %v2582_v29 }
 0x57a   :  { %3050 = vst [vmem:[#allocation11 + $0x1d8] sm:$0xff] %v2986_v27 }
 0x57b   :  { %v2987_v60 = vadd.f32 %v2696_v35, %v2407_v10 }
 0x57d   :  { %3051 = vst [vmem:[#allocation11 + $0x1e0] sm:$0xff] %v2987_v60  ;;  %v2921_v37 = vpop.f32.mrf.mxu3 }
 0x57e   :  { %v2922_v39 = vadd.f32 %v2921_v37, %v2808_v33 }
 0x57f   :  { %v2811_v45 = vpop.f32.mrf.mxu2 }
 0x580   :  { %v2988_v42 = vadd.f32 %v2922_v39, %v2408_v13  ;;  %v2585_v44 = vpop.f32.mrf.mxu0 }
 0x581   :  { %v2699_v8 = vadd.f32 %v2698_v40, %v2585_v44 }
 0x582   :  { %3052 = vst [vmem:[#allocation11 + $0x1e8] sm:$0xff] %v2988_v42 }
 0x583   :  { %v2989_v34 = vadd.f32 %v2699_v8, %v2409_v7 }
 0x585   :  { %3053 = vst [vmem:[#allocation11 + $0x1f0] sm:$0xff] %v2989_v34  ;;  %v2924_v47 = vpop.f32.mrf.mxu3 }
 0x586   :  { %v2925_v28 = vadd.f32 %v2924_v47, %v2811_v45 }
 0x588   :  { %v2990_v58 = vadd.f32 %v2925_v28, %v2410_v55 }
 0x58a   :  { %3054 = vst [vmem:[#allocation11 + $0x1f8] sm:$0xff] %v2990_v58 }
 0x58b PF:  { %p3055_p9 = pnand %p2114_p7, %p1171_p4 }
 0x58d   :  { %3058 = sbr.rel (%p3055_p9) target bundleno = 1844 (0x734), region = 37 }
 0x592   :  { %v3218_v49 = vld [vmem:[#allocation9 + $0xf8] sm:$0xff]  ;;  %v3216_v52 = vld [vmem:[#allocation9 + $0xe8] sm:$0xff]  ;;  %v3217_v4 = vld [vmem:[#allocation9 + $0xf0] sm:$0xff] }
 0x593   :  { %v3250_v50 = vld [vmem:[#allocation9 + $0x1f8] sm:$0xff]  ;;  %3477 = vmatpush.msra.mxu2 %v3218_v49  ;;  %v3248_v54 = vld [vmem:[#allocation9 + $0x1e8] sm:$0xff]  ;;  %v3249_v22 = vld [vmem:[#allocation9 + $0x1f0] sm:$0xff]  ;;  %3251 = vmatpush.msra.mxu0 %v3217_v4 }
 0x594   :  { %3590 = vmatpush.msra.mxu3 %v3250_v50  ;;  %v3214_v59 = vld [vmem:[#allocation9 + $0xd8] sm:$0xff]  ;;  %v3215_v30 = vld [vmem:[#allocation9 + $0xe0] sm:$0xff]  ;;  %3364 = vmatpush.msra.mxu1 %v3249_v22  ;;  %v3212_v56 = vld [vmem:[#allocation9 + $0xc8] sm:$0xff] }
 0x595   :  { %v3246_v21 = vld [vmem:[#allocation9 + $0x1d8] sm:$0xff]  ;;  %3478 = vmatpush.msra.mxu2 %v3216_v52  ;;  %v3247_v32 = vld [vmem:[#allocation9 + $0x1e0] sm:$0xff]  ;;  %v3244_v61 = vld [vmem:[#allocation9 + $0x1c8] sm:$0xff]  ;;  %3252 = vmatpush.msra.mxu0 %v3215_v30 }
 0x596   :  { %3591 = vmatpush.msra.mxu3 %v3248_v54  ;;  %v3213_v62 = vld [vmem:[#allocation9 + $0xd0] sm:$0xff]  ;;  %3365 = vmatpush.msra.mxu1 %v3247_v32  ;;  %v3210_v63 = vld [vmem:[#allocation9 + $0xb8] sm:$0xff]  ;;  %v3211_v57 = vld [vmem:[#allocation9 + $0xc0] sm:$0xff] }
 0x597   :  { %3479 = vmatpush.msra.mxu2 %v3214_v59  ;;  %v3245_v48 = vld [vmem:[#allocation9 + $0x1d0] sm:$0xff]  ;;  %v3242_v0 = vld [vmem:[#allocation9 + $0x1b8] sm:$0xff]  ;;  %v3243_v2 = vld [vmem:[#allocation9 + $0x1c0] sm:$0xff]  ;;  %3253 = vmatpush.msra.mxu0 %v3213_v62 }
 0x598   :  { %3592 = vmatpush.msra.mxu3 %v3246_v21  ;;  %3366 = vmatpush.msra.mxu1 %v3245_v48  ;;  %v3208_v51 = vld [vmem:[#allocation9 + $0xa8] sm:$0xff]  ;;  %v3209_v46 = vld [vmem:[#allocation9 + $0xb0] sm:$0xff]  ;;  %v3206_v6 = vld [vmem:[#allocation9 + $0x98] sm:$0xff] }
 0x599   :  { %3480 = vmatpush.msra.mxu2 %v3212_v56  ;;  %v3240_v3 = vld [vmem:[#allocation9 + $0x1a8] sm:$0xff]  ;;  %v3241_v17 = vld [vmem:[#allocation9 + $0x1b0] sm:$0xff]  ;;  %3254 = vmatpush.msra.mxu0 %v3211_v57  ;;  %v3238_v5 = vld [vmem:[#allocation9 + $0x198] sm:$0xff] }
 0x59a   :  { %3593 = vmatpush.msra.mxu3 %v3244_v61  ;;  %3367 = vmatpush.msra.mxu1 %v3243_v2  ;;  %v3207_v12 = vld [vmem:[#allocation9 + $0xa0] sm:$0xff]  ;;  %v3204_v41 = vld [vmem:[#allocation9 + $0x88] sm:$0xff]  ;;  %v3205_v9 = vld [vmem:[#allocation9 + $0x90] sm:$0xff] }
 0x59b   :  { %3481 = vmatpush.msra.mxu2 %v3210_v63  ;;  %v3239_v53 = vld [vmem:[#allocation9 + $0x1a0] sm:$0xff]  ;;  %3255 = vmatpush.msra.mxu0 %v3209_v46  ;;  %v3236_v43 = vld [vmem:[#allocation9 + $0x188] sm:$0xff]  ;;  %v3237_v36 = vld [vmem:[#allocation9 + $0x190] sm:$0xff] }
 0x59c   :  { %3594 = vmatpush.msra.mxu3 %v3242_v0  ;;  %3368 = vmatpush.msra.mxu1 %v3241_v17  ;;  %v3202_v14 = vld [vmem:[#allocation9 + $0x78] sm:$0xff]  ;;  %v3203_v16 = vld [vmem:[#allocation9 + $0x80] sm:$0xff]  ;;  %v3200_v11 = vld [vmem:[#allocation9 + $0x68] sm:$0xff] }
 0x59d   :  { %3482 = vmatpush.msra.mxu2 %v3208_v51  ;;  %3256 = vmatpush.msra.mxu0 %v3207_v12  ;;  %v3234_v31 = vld [vmem:[#allocation9 + $0x178] sm:$0xff]  ;;  %v3235_v26 = vld [vmem:[#allocation9 + $0x180] sm:$0xff]  ;;  %v3232_v18 = vld [vmem:[#allocation9 + $0x168] sm:$0xff] }
 0x59e   :  { %3595 = vmatpush.msra.mxu3 %v3240_v3  ;;  %3369 = vmatpush.msra.mxu1 %v3239_v53  ;;  %v3201_v24 = vld [vmem:[#allocation9 + $0x70] sm:$0xff]  ;;  %v3198_v1 = vld [vmem:[#allocation9 + $0x58] sm:$0xff]  ;;  %v3199_v19 = vld [vmem:[#allocation9 + $0x60] sm:$0xff] }
 0x59f   :  { %3483 = vmatpush.msra.mxu2 %v3206_v6  ;;  %3257 = vmatpush.msra.mxu0 %v3205_v9  ;;  %v3233_v20 = vld [vmem:[#allocation9 + $0x170] sm:$0xff]  ;;  %v3230_v38 = vld [vmem:[#allocation9 + $0x158] sm:$0xff]  ;;  %v3231_v23 = vld [vmem:[#allocation9 + $0x160] sm:$0xff] }
 0x5a0   :  { %3596 = vmatpush.msra.mxu3 %v3238_v5  ;;  %3370 = vmatpush.msra.mxu1 %v3237_v36  ;;  %v3196_v15 = vld [vmem:[#allocation9 + $0x48] sm:$0xff]  ;;  %v3197_v27 = vld [vmem:[#allocation9 + $0x50] sm:$0xff]  ;;  %v3194_v10 = vld [vmem:[#allocation9 + $0x38] sm:$0xff] }
 0x5a1   :  { %3484 = vmatpush.msra.mxu2 %v3204_v41  ;;  %3258 = vmatpush.msra.mxu0 %v3203_v16  ;;  %v3228_v25 = vld [vmem:[#allocation9 + $0x148] sm:$0xff]  ;;  %v3229_v29 = vld [vmem:[#allocation9 + $0x150] sm:$0xff]  ;;  %v3226_v35 = vld [vmem:[#allocation9 + $0x138] sm:$0xff] }
 0x5a2   :  { %3597 = vmatpush.msra.mxu3 %v3236_v43  ;;  %3371 = vmatpush.msra.mxu1 %v3235_v26  ;;  %v3195_v33 = vld [vmem:[#allocation9 + $0x40] sm:$0xff]  ;;  %v3192_v13 = vld [vmem:[#allocation9 + $0x28] sm:$0xff]  ;;  %v3193_v39 = vld [vmem:[#allocation9 + $0x30] sm:$0xff] }
 0x5a3   :  { %3485 = vmatpush.msra.mxu2 %v3202_v14  ;;  %3259 = vmatpush.msra.mxu0 %v3201_v24  ;;  %v3227_v60 = vld [vmem:[#allocation9 + $0x140] sm:$0xff]  ;;  %v3224_v37 = vld [vmem:[#allocation9 + $0x128] sm:$0xff]  ;;  %v3225_v40 = vld [vmem:[#allocation9 + $0x130] sm:$0xff] }
 0x5a4   :  { %3598 = vmatpush.msra.mxu3 %v3234_v31  ;;  %3372 = vmatpush.msra.mxu1 %v3233_v20  ;;  %v3190_v42 = vld [vmem:[#allocation9 + $0x18] sm:$0xff]  ;;  %v3191_v7 = vld [vmem:[#allocation9 + $0x20] sm:$0xff]  ;;  %v3188_v34 = vld [vmem:[#allocation9 + $0x8] sm:$0xff] }
 0x5a5   :  { %3486 = vmatpush.msra.mxu2 %v3200_v11  ;;  %3260 = vmatpush.msra.mxu0 %v3199_v19  ;;  %v3222_v44 = vld [vmem:[#allocation9 + $0x118] sm:$0xff]  ;;  %v3223_v8 = vld [vmem:[#allocation9 + $0x120] sm:$0xff]  ;;  %v3220_v45 = vld [vmem:[#allocation9 + $0x108] sm:$0xff] }
 0x5a6   :  { %3599 = vmatpush.msra.mxu3 %v3232_v18  ;;  %3373 = vmatpush.msra.mxu1 %v3231_v23  ;;  %v3123_v55 = vld [vmem:[#allocation6] sm:$0xff]  ;;  %v3124_v47 = vld [vmem:[#allocation6 + $0x8] sm:$0xff]  ;;  %v3189_v28 = vld [vmem:[#allocation9 + $0x10] sm:$0xff] }
 0x5a7   :  { %3487 = vmatpush.msra.mxu2 %v3198_v1  ;;  %3261 = vmatpush.msra.mxu0 %v3197_v27  ;;  %v3221_v58 = vld [vmem:[#allocation9 + $0x110] sm:$0xff]  ;;  %v3187_v49 = vld [vmem:[#allocation9] sm:$0xff]  ;;  %v3126_v54 = vld [vmem:[#allocation6 + $0x18] sm:$0xff] }
 0x5a8   :  { %3600 = vmatpush.msra.mxu3 %v3230_v38  ;;  %3374 = vmatpush.msra.mxu1 %v3229_v29  ;;  %v3219_v50 = vld [vmem:[#allocation9 + $0x100] sm:$0xff]  ;;  %v3125_v52 = vld [vmem:[#allocation6 + $0x10] sm:$0xff]  ;;  %v3128_v21 = vld [vmem:[#allocation6 + $0x28] sm:$0xff] }
 0x5a9   :  { %3488 = vmatpush.msra.mxu2 %v3196_v15  ;;  %3262 = vmatpush.msra.mxu0 %v3195_v33  ;;  %v3127_v59 = vld [vmem:[#allocation6 + $0x20] sm:$0xff]  ;;  %v3129_v4 = vld [vmem:[#allocation6 + $0x30] sm:$0xff]  ;;  %v3130_v22 = vld [vmem:[#allocation6 + $0x38] sm:$0xff] }
 0x5aa   :  { %3601 = vmatpush.msra.mxu3 %v3228_v25  ;;  %3375 = vmatpush.msra.mxu1 %v3227_v60  ;;  %v3131_v30 = vld [vmem:[#allocation6 + $0x40] sm:$0xff]  ;;  %v3132_v32 = vld [vmem:[#allocation6 + $0x48] sm:$0xff]  ;;  %v3133_v56 = vld [vmem:[#allocation6 + $0x50] sm:$0xff] }
 0x5ab   :  { %3489 = vmatpush.msra.mxu2 %v3194_v10  ;;  %3263 = vmatpush.msra.mxu0 %v3193_v39  ;;  %v3134_v61 = vld [vmem:[#allocation6 + $0x58] sm:$0xff]  ;;  %v3135_v62 = vld [vmem:[#allocation6 + $0x60] sm:$0xff]  ;;  %v3136_v48 = vld [vmem:[#allocation6 + $0x68] sm:$0xff] }
 0x5ac   :  { %3602 = vmatpush.msra.mxu3 %v3226_v35  ;;  %3376 = vmatpush.msra.mxu1 %v3225_v40  ;;  %v3137_v63 = vld [vmem:[#allocation6 + $0x70] sm:$0xff]  ;;  %v3138_v0 = vld [vmem:[#allocation6 + $0x78] sm:$0xff]  ;;  %v3139_v57 = vld [vmem:[#allocation6 + $0x80] sm:$0xff] }
 0x5ad   :  { %3490 = vmatpush.msra.mxu2 %v3192_v13  ;;  %3264 = vmatpush.msra.mxu0 %v3191_v7  ;;  %v3140_v2 = vld [vmem:[#allocation6 + $0x88] sm:$0xff]  ;;  %v3141_v51 = vld [vmem:[#allocation6 + $0x90] sm:$0xff]  ;;  %v3142_v3 = vld [vmem:[#allocation6 + $0x98] sm:$0xff] }
 0x5ae   :  { %3603 = vmatpush.msra.mxu3 %v3224_v37  ;;  %3377 = vmatpush.msra.mxu1 %v3223_v8  ;;  %v3143_v46 = vld [vmem:[#allocation6 + $0xa0] sm:$0xff]  ;;  %v3144_v17 = vld [vmem:[#allocation6 + $0xa8] sm:$0xff]  ;;  %v3145_v6 = vld [vmem:[#allocation6 + $0xb0] sm:$0xff] }
 0x5af   :  { %3491 = vmatpush.msra.mxu2 %v3190_v42  ;;  %3265 = vmatpush.msra.mxu0 %v3189_v28  ;;  %v3146_v5 = vld [vmem:[#allocation6 + $0xb8] sm:$0xff]  ;;  %v3147_v12 = vld [vmem:[#allocation6 + $0xc0] sm:$0xff]  ;;  %v3148_v53 = vld [vmem:[#allocation6 + $0xc8] sm:$0xff] }
 0x5b0   :  { %3604 = vmatpush.msra.mxu3 %v3222_v44  ;;  %3378 = vmatpush.msra.mxu1 %v3221_v58  ;;  %v3149_v41 = vld [vmem:[#allocation6 + $0xd0] sm:$0xff]  ;;  %v3150_v43 = vld [vmem:[#allocation6 + $0xd8] sm:$0xff]  ;;  %v3151_v9 = vld [vmem:[#allocation6 + $0xe0] sm:$0xff] }
 0x5b1   :  { %3492 = vmatpush.msra.mxu2 %v3188_v34  ;;  %3266 = vmatpush.msra.mxu0 %v3187_v49  ;;  %v3152_v36 = vld [vmem:[#allocation6 + $0xe8] sm:$0xff]  ;;  %v3153_v14 = vld [vmem:[#allocation6 + $0xf0] sm:$0xff]  ;;  %v3154_v31 = vld [vmem:[#allocation6 + $0xf8] sm:$0xff] }
 0x5b2   :  { %3605 = vmatpush.msra.mxu3 %v3220_v45  ;;  %3493 = vmatmul.f32.vlgmr.msra.gmra.mxu2 %v3123_v55  ;;  %v3155_v16 = vld [vmem:[#allocation6 + $0x100] sm:$0xff]  ;;  %v3156_v26 = vld [vmem:[#allocation6 + $0x108] sm:$0xff]  ;;  %v3157_v25 = vld [vmem:[#allocation6 + $0x110] sm:$0xff] }
 0x5b3   :  { %3606 = vmatmul.f32.vlgmr.msra.gmra.mxu3 %v3124_v47  ;;  %3379 = vmatpush.msra.mxu1 %v3219_v50  ;;  %v3059_v18 = vld [vmem:[#allocation11] sm:$0xff]  ;;  %v3060_v38 = vld [vmem:[#allocation11 + $0x8] sm:$0xff]  ;;  %v3158_v27 = vld [vmem:[#allocation6 + $0x118] sm:$0xff] }
 0x5b4   :  { %3267 = vmatmul.f32.vlgmr.msra.gmra.mxu0 %v3123_v55  ;;  %3380 = vmatmul.f32.vlgmr.msra.gmra.mxu1 %v3124_v47  ;;  %v3061_v35 = vld [vmem:[#allocation11 + $0x10] sm:$0xff]  ;;  %v3062_v37 = vld [vmem:[#allocation11 + $0x18] sm:$0xff]  ;;  %v3159_v44 = vld [vmem:[#allocation6 + $0x120] sm:$0xff] }
 0x5b5   :  { %v3160_v7 = vld [vmem:[#allocation6 + $0x128] sm:$0xff]  ;;  %v3063_v45 = vld [vmem:[#allocation11 + $0x20] sm:$0xff] }
 0x5b6   :  { %v3064_v58 = vld [vmem:[#allocation11 + $0x28] sm:$0xff] }
 0x5ba   :  { %3496 = vmatmul.f32.gmra.mxu2 %v3125_v52 }
 0x5bb   :  { %3609 = vmatmul.f32.gmra.mxu3 %v3126_v54 }
 0x5bc   :  { %3270 = vmatmul.f32.gmra.mxu0 %v3125_v52  ;;  %3383 = vmatmul.f32.gmra.mxu1 %v3126_v54  ;;  %v3161_v54 = vld [vmem:[#allocation6 + $0x130] sm:$0xff] }
 0x5c2   :  { %3499 = vmatmul.f32.gmra.mxu2 %v3127_v59 }
 0x5c3   :  { %3612 = vmatmul.f32.gmra.mxu3 %v3128_v21 }
 0x5c4   :  { %3273 = vmatmul.f32.gmra.mxu0 %v3127_v59  ;;  %3386 = vmatmul.f32.gmra.mxu1 %v3128_v21  ;;  %v3162_v59 = vld [vmem:[#allocation6 + $0x138] sm:$0xff] }
 0x5ca   :  { %3502 = vmatmul.f32.gmra.mxu2 %v3129_v4 }
 0x5cb   :  { %3615 = vmatmul.f32.gmra.mxu3 %v3130_v22 }
 0x5cc   :  { %3276 = vmatmul.f32.gmra.mxu0 %v3129_v4  ;;  %3389 = vmatmul.f32.gmra.mxu1 %v3130_v22  ;;  %v3065_v22 = vld [vmem:[#allocation11 + $0x30] sm:$0xff] }
 0x5d2   :  { %3505 = vmatmul.f32.gmra.mxu2 %v3131_v30 }
 0x5d3   :  { %3618 = vmatmul.f32.gmra.mxu3 %v3132_v32 }
 0x5d4   :  { %3279 = vmatmul.f32.gmra.mxu0 %v3131_v30  ;;  %3392 = vmatmul.f32.gmra.mxu1 %v3132_v32 }
 0x5da   :  { %3508 = vmatmul.f32.gmra.mxu2 %v3133_v56 }
 0x5db   :  { %3621 = vmatmul.f32.gmra.mxu3 %v3134_v61 }
 0x5dc   :  { %3282 = vmatmul.f32.gmra.mxu0 %v3133_v56  ;;  %3395 = vmatmul.f32.gmra.mxu1 %v3134_v61  ;;  %v3066_v61 = vld [vmem:[#allocation11 + $0x38] sm:$0xff] }
 0x5e2   :  { %3511 = vmatmul.f32.gmra.mxu2 %v3135_v62 }
 0x5e3   :  { %3624 = vmatmul.f32.gmra.mxu3 %v3136_v48 }
 0x5e4   :  { %3285 = vmatmul.f32.gmra.mxu0 %v3135_v62  ;;  %3398 = vmatmul.f32.gmra.mxu1 %v3136_v48 }
 0x5ea   :  { %3514 = vmatmul.f32.gmra.mxu2 %v3137_v63 }
 0x5eb   :  { %3627 = vmatmul.f32.gmra.mxu3 %v3138_v0 }
 0x5ec   :  { %3288 = vmatmul.f32.gmra.mxu0 %v3137_v63  ;;  %3401 = vmatmul.f32.gmra.mxu1 %v3138_v0  ;;  %v3163_v0 = vld [vmem:[#allocation6 + $0x140] sm:$0xff] }
 0x5f2   :  { %3517 = vmatmul.f32.gmra.mxu2 %v3139_v57 }
 0x5f3   :  { %3630 = vmatmul.f32.gmra.mxu3 %v3140_v2 }
 0x5f4   :  { %3291 = vmatmul.f32.gmra.mxu0 %v3139_v57  ;;  %3404 = vmatmul.f32.gmra.mxu1 %v3140_v2  ;;  %v3164_v57 = vld [vmem:[#allocation6 + $0x148] sm:$0xff] }
 0x5fa   :  { %3520 = vmatmul.f32.gmra.mxu2 %v3141_v51 }
 0x5fb   :  { %3633 = vmatmul.f32.gmra.mxu3 %v3142_v3 }
 0x5fc   :  { %3294 = vmatmul.f32.gmra.mxu0 %v3141_v51  ;;  %3407 = vmatmul.f32.gmra.mxu1 %v3142_v3  ;;  %v3067_v3 = vld [vmem:[#allocation11 + $0x40] sm:$0xff] }
 0x602   :  { %3523 = vmatmul.f32.gmra.mxu2 %v3143_v46 }
 0x603   :  { %3636 = vmatmul.f32.gmra.mxu3 %v3144_v17 }
 0x604   :  { %3297 = vmatmul.f32.gmra.mxu0 %v3143_v46  ;;  %3410 = vmatmul.f32.gmra.mxu1 %v3144_v17 }
 0x60a   :  { %3526 = vmatmul.f32.gmra.mxu2 %v3145_v6 }
 0x60b   :  { %3639 = vmatmul.f32.gmra.mxu3 %v3146_v5 }
 0x60c   :  { %3300 = vmatmul.f32.gmra.mxu0 %v3145_v6  ;;  %3413 = vmatmul.f32.gmra.mxu1 %v3146_v5  ;;  %v3068_v5 = vld [vmem:[#allocation11 + $0x48] sm:$0xff] }
 0x612   :  { %3529 = vmatmul.f32.gmra.mxu2 %v3147_v12 }
 0x613   :  { %3642 = vmatmul.f32.gmra.mxu3 %v3148_v53 }
 0x614   :  { %3303 = vmatmul.f32.gmra.mxu0 %v3147_v12  ;;  %3416 = vmatmul.f32.gmra.mxu1 %v3148_v53 }
 0x61a   :  { %3532 = vmatmul.f32.gmra.mxu2 %v3149_v41 }
 0x61b   :  { %3645 = vmatmul.f32.gmra.mxu3 %v3150_v43 }
 0x61c   :  { %3306 = vmatmul.f32.gmra.mxu0 %v3149_v41  ;;  %3419 = vmatmul.f32.gmra.mxu1 %v3150_v43  ;;  %v3165_v43 = vld [vmem:[#allocation6 + $0x150] sm:$0xff] }
 0x622   :  { %3535 = vmatmul.f32.gmra.mxu2 %v3151_v9 }
 0x623   :  { %3648 = vmatmul.f32.gmra.mxu3 %v3152_v36 }
 0x624   :  { %3309 = vmatmul.f32.gmra.mxu0 %v3151_v9  ;;  %3422 = vmatmul.f32.gmra.mxu1 %v3152_v36  ;;  %v3166_v9 = vld [vmem:[#allocation6 + $0x158] sm:$0xff] }
 0x62a   :  { %3538 = vmatmul.f32.gmra.mxu2 %v3153_v14 }
 0x62b   :  { %3651 = vmatmul.f32.gmra.mxu3 %v3154_v31 }
 0x62c   :  { %3312 = vmatmul.f32.gmra.mxu0 %v3153_v14  ;;  %3425 = vmatmul.f32.gmra.mxu1 %v3154_v31  ;;  %v3069_v31 = vld [vmem:[#allocation11 + $0x50] sm:$0xff] }
 0x631   :  { %v3268_v11 = vpop.f32.mrf.mxu0  ;;  %v3381_v24 = vpop.f32.mrf.mxu1 }
 0x632   :  { %3541 = vmatmul.f32.gmra.mxu2 %v3155_v16  ;;  %v3382_v20 = vadd.f32 %v3381_v24, %v3268_v11 }
 0x633   :  { %3654 = vmatmul.f32.gmra.mxu3 %v3156_v26 }
 0x634   :  { %v3703_v23 = vadd.f32 %v3382_v20, %v3059_v18  ;;  %3315 = vmatmul.f32.gmra.mxu0 %v3155_v16  ;;  %3428 = vmatmul.f32.gmra.mxu1 %v3156_v26  ;;  %v3070_v18 = vld [vmem:[#allocation11 + $0x58] sm:$0xff] }
 0x635   :  { %v3494_v1 = vpop.f32.mrf.mxu2 }
 0x636   :  { %v3607_v19 = vpop.f32.mrf.mxu3  ;;  %3767 = vst [vmem:[#allocation11] sm:$0xff] %v3703_v23 }
 0x637   :  { %v3608_v15 = vadd.f32 %v3607_v19, %v3494_v1  ;;  %v3168_v19 = vld [vmem:[#allocation6 + $0x168] sm:$0xff] }
 0x639   :  { %v3704_v29 = vadd.f32 %v3608_v15, %v3060_v38  ;;  %v3271_v10 = vpop.f32.mrf.mxu0  ;;  %v3384_v33 = vpop.f32.mrf.mxu1  ;;  %v3167_v38 = vld [vmem:[#allocation6 + $0x160] sm:$0xff] }
 0x63a   :  { %3544 = vmatmul.f32.gmra.mxu2 %v3157_v25  ;;  %v3385_v60 = vadd.f32 %v3384_v33, %v3271_v10 }
 0x63b   :  { %3768 = vst [vmem:[#allocation11 + $0x8] sm:$0xff] %v3704_v29  ;;  %3657 = vmatmul.f32.gmra.mxu3 %v3158_v27 }
 0x63c   :  { %v3705_v40 = vadd.f32 %v3385_v60, %v3061_v35  ;;  %3318 = vmatmul.f32.gmra.mxu0 %v3157_v25  ;;  %3431 = vmatmul.f32.gmra.mxu1 %v3158_v27  ;;  %v3071_v25 = vld [vmem:[#allocation11 + $0x60] sm:$0xff]  ;;  %v3072_v35 = vld [vmem:[#allocation11 + $0x68] sm:$0xff] }
 0x63d   :  { %v3497_v13 = vpop.f32.mrf.mxu2 }
 0x63e   :  { %v3610_v39 = vpop.f32.mrf.mxu3  ;;  %3769 = vst [vmem:[#allocation11 + $0x10] sm:$0xff] %v3705_v40 }
 0x63f   :  { %v3611_v42 = vadd.f32 %v3610_v39, %v3497_v13  ;;  %v3170_v39 = vld [vmem:[#allocation6 + $0x178] sm:$0xff] }
 0x641   :  { %v3706_v8 = vadd.f32 %v3611_v42, %v3062_v37  ;;  %v3274_v34 = vpop.f32.mrf.mxu0  ;;  %v3387_v55 = vpop.f32.mrf.mxu1  ;;  %v3169_v37 = vld [vmem:[#allocation6 + $0x170] sm:$0xff] }
 0x642   :  { %3547 = vmatmul.f32.gmra.mxu2 %v3159_v44  ;;  %v3388_v47 = vadd.f32 %v3387_v55, %v3274_v34 }
 0x643   :  { %3770 = vst [vmem:[#allocation11 + $0x18] sm:$0xff] %v3706_v8  ;;  %3660 = vmatmul.f32.gmra.mxu3 %v3160_v7 }
 0x644   :  { %v3707_v50 = vadd.f32 %v3388_v47, %v3063_v45  ;;  %3321 = vmatmul.f32.gmra.mxu0 %v3159_v44  ;;  %3434 = vmatmul.f32.gmra.mxu1 %v3160_v7  ;;  %v3073_v44 = vld [vmem:[#allocation11 + $0x70] sm:$0xff]  ;;  %v3074_v45 = vld [vmem:[#allocation11 + $0x78] sm:$0xff] }
 0x645   :  { %v3500_v28 = vpop.f32.mrf.mxu2 }
 0x646   :  { %v3613_v49 = vpop.f32.mrf.mxu3  ;;  %3771 = vst [vmem:[#allocation11 + $0x20] sm:$0xff] %v3707_v50 }
 0x647   :  { %v3614_v52 = vadd.f32 %v3613_v49, %v3500_v28  ;;  %v3172_v49 = vld [vmem:[#allocation6 + $0x188] sm:$0xff] }
 0x649   :  { %v3708_v21 = vadd.f32 %v3614_v52, %v3064_v58  ;;  %v3277_v4 = vpop.f32.mrf.mxu0  ;;  %v3390_v30 = vpop.f32.mrf.mxu1  ;;  %v3171_v58 = vld [vmem:[#allocation6 + $0x180] sm:$0xff] }
 0x64a   :  { %3550 = vmatmul.f32.gmra.mxu2 %v3161_v54  ;;  %v3391_v32 = vadd.f32 %v3390_v30, %v3277_v4 }
 0x64b   :  { %3772 = vst [vmem:[#allocation11 + $0x28] sm:$0xff] %v3708_v21  ;;  %3663 = vmatmul.f32.gmra.mxu3 %v3162_v59 }
 0x64c   :  { %v3709_v48 = vadd.f32 %v3391_v32, %v3065_v22  ;;  %3324 = vmatmul.f32.gmra.mxu0 %v3161_v54  ;;  %3437 = vmatmul.f32.gmra.mxu1 %v3162_v59  ;;  %v3075_v54 = vld [vmem:[#allocation11 + $0x80] sm:$0xff]  ;;  %v3076_v22 = vld [vmem:[#allocation11 + $0x88] sm:$0xff] }
 0x64d   :  { %v3503_v56 = vpop.f32.mrf.mxu2 }
 0x64e   :  { %v3616_v62 = vpop.f32.mrf.mxu3  ;;  %3773 = vst [vmem:[#allocation11 + $0x30] sm:$0xff] %v3709_v48 }
 0x64f   :  { %v3617_v63 = vadd.f32 %v3616_v62, %v3503_v56  ;;  %v3174_v62 = vld [vmem:[#allocation6 + $0x198] sm:$0xff] }
 0x651   :  { %v3710_v2 = vadd.f32 %v3617_v63, %v3066_v61  ;;  %v3280_v51 = vpop.f32.mrf.mxu0  ;;  %v3393_v46 = vpop.f32.mrf.mxu1  ;;  %v3173_v61 = vld [vmem:[#allocation6 + $0x190] sm:$0xff] }
 0x652   :  { %3553 = vmatmul.f32.gmra.mxu2 %v3163_v0  ;;  %v3394_v17 = vadd.f32 %v3393_v46, %v3280_v51 }
 0x653   :  { %3774 = vst [vmem:[#allocation11 + $0x38] sm:$0xff] %v3710_v2  ;;  %3666 = vmatmul.f32.gmra.mxu3 %v3164_v57 }
 0x654   :  { %v3711_v53 = vadd.f32 %v3394_v17, %v3067_v3  ;;  %3327 = vmatmul.f32.gmra.mxu0 %v3163_v0  ;;  %3440 = vmatmul.f32.gmra.mxu1 %v3164_v57  ;;  %v3077_v0 = vld [vmem:[#allocation11 + $0x90] sm:$0xff]  ;;  %v3078_v3 = vld [vmem:[#allocation11 + $0x98] sm:$0xff] }
 0x655   :  { %v3506_v6 = vpop.f32.mrf.mxu2 }
 0x656   :  { %v3619_v12 = vpop.f32.mrf.mxu3  ;;  %3775 = vst [vmem:[#allocation11 + $0x40] sm:$0xff] %v3711_v53 }
 0x657   :  { %v3620_v41 = vadd.f32 %v3619_v12, %v3506_v6  ;;  %v3176_v12 = vld [vmem:[#allocation6 + $0x1a8] sm:$0xff] }
 0x659   :  { %v3712_v36 = vadd.f32 %v3620_v41, %v3068_v5  ;;  %v3283_v14 = vpop.f32.mrf.mxu0  ;;  %v3396_v16 = vpop.f32.mrf.mxu1  ;;  %v3175_v5 = vld [vmem:[#allocation6 + $0x1a0] sm:$0xff] }
 0x65a   :  { %3556 = vmatmul.f32.gmra.mxu2 %v3165_v43  ;;  %v3397_v26 = vadd.f32 %v3396_v16, %v3283_v14 }
 0x65b   :  { %3776 = vst [vmem:[#allocation11 + $0x48] sm:$0xff] %v3712_v36  ;;  %3669 = vmatmul.f32.gmra.mxu3 %v3166_v9 }
 0x65c   :  { %v3713_v20 = vadd.f32 %v3397_v26, %v3069_v31  ;;  %3330 = vmatmul.f32.gmra.mxu0 %v3165_v43  ;;  %3443 = vmatmul.f32.gmra.mxu1 %v3166_v9  ;;  %v3079_v43 = vld [vmem:[#allocation11 + $0xa0] sm:$0xff]  ;;  %v3080_v31 = vld [vmem:[#allocation11 + $0xa8] sm:$0xff] }
 0x65d   :  { %v3509_v11 = vpop.f32.mrf.mxu2 }
 0x65e   :  { %v3622_v24 = vpop.f32.mrf.mxu3  ;;  %3777 = vst [vmem:[#allocation11 + $0x50] sm:$0xff] %v3713_v20 }
 0x65f   :  { %v3623_v1 = vadd.f32 %v3622_v24, %v3509_v11  ;;  %v3178_v24 = vld [vmem:[#allocation6 + $0x1b8] sm:$0xff] }
 0x661   :  { %v3714_v23 = vadd.f32 %v3623_v1, %v3070_v18  ;;  %v3286_v15 = vpop.f32.mrf.mxu0  ;;  %v3399_v27 = vpop.f32.mrf.mxu1  ;;  %v3177_v18 = vld [vmem:[#allocation6 + $0x1b0] sm:$0xff] }
 0x662   :  { %3559 = vmatmul.f32.gmra.mxu2 %v3167_v38  ;;  %v3400_v29 = vadd.f32 %v3399_v27, %v3286_v15 }
 0x663   :  { %3778 = vst [vmem:[#allocation11 + $0x58] sm:$0xff] %v3714_v23  ;;  %3672 = vmatmul.f32.gmra.mxu3 %v3168_v19 }
 0x664   :  { %v3715_v60 = vadd.f32 %v3400_v29, %v3071_v25  ;;  %3333 = vmatmul.f32.gmra.mxu0 %v3167_v38  ;;  %3446 = vmatmul.f32.gmra.mxu1 %v3168_v19  ;;  %v3081_v38 = vld [vmem:[#allocation11 + $0xb0] sm:$0xff]  ;;  %v3082_v25 = vld [vmem:[#allocation11 + $0xb8] sm:$0xff] }
 0x665   :  { %v3512_v10 = vpop.f32.mrf.mxu2 }
 0x666   :  { %v3625_v33 = vpop.f32.mrf.mxu3  ;;  %3779 = vst [vmem:[#allocation11 + $0x60] sm:$0xff] %v3715_v60 }
 0x667   :  { %v3626_v13 = vadd.f32 %v3625_v33, %v3512_v10  ;;  %v3180_v33 = vld [vmem:[#allocation6 + $0x1c8] sm:$0xff] }
 0x669   :  { %v3716_v40 = vadd.f32 %v3626_v13, %v3072_v35  ;;  %v3289_v42 = vpop.f32.mrf.mxu0  ;;  %v3402_v7 = vpop.f32.mrf.mxu1  ;;  %v3179_v35 = vld [vmem:[#allocation6 + $0x1c0] sm:$0xff] }
 0x66a   :  { %3562 = vmatmul.f32.gmra.mxu2 %v3169_v37  ;;  %v3403_v8 = vadd.f32 %v3402_v7, %v3289_v42 }
 0x66b   :  { %3780 = vst [vmem:[#allocation11 + $0x68] sm:$0xff] %v3716_v40  ;;  %3675 = vmatmul.f32.gmra.mxu3 %v3170_v39 }
 0x66c   :  { %v3717_v47 = vadd.f32 %v3403_v8, %v3073_v44  ;;  %3336 = vmatmul.f32.gmra.mxu0 %v3169_v37  ;;  %3449 = vmatmul.f32.gmra.mxu1 %v3170_v39  ;;  %v3083_v37 = vld [vmem:[#allocation11 + $0xc0] sm:$0xff]  ;;  %v3084_v44 = vld [vmem:[#allocation11 + $0xc8] sm:$0xff] }
 0x66d   :  { %v3515_v34 = vpop.f32.mrf.mxu2 }
 0x66e   :  { %v3628_v55 = vpop.f32.mrf.mxu3  ;;  %3781 = vst [vmem:[#allocation11 + $0x70] sm:$0xff] %v3717_v47 }
 0x66f   :  { %v3629_v28 = vadd.f32 %v3628_v55, %v3515_v34  ;;  %v3182_v55 = vld [vmem:[#allocation6 + $0x1d8] sm:$0xff] }
 0x671   :  { %v3718_v50 = vadd.f32 %v3629_v28, %v3074_v45  ;;  %v3292_v52 = vpop.f32.mrf.mxu0  ;;  %v3405_v59 = vpop.f32.mrf.mxu1  ;;  %v3181_v45 = vld [vmem:[#allocation6 + $0x1d0] sm:$0xff] }
 0x672   :  { %3565 = vmatmul.f32.gmra.mxu2 %v3171_v58  ;;  %v3406_v21 = vadd.f32 %v3405_v59, %v3292_v52 }
 0x673   :  { %3782 = vst [vmem:[#allocation11 + $0x78] sm:$0xff] %v3718_v50  ;;  %3678 = vmatmul.f32.gmra.mxu3 %v3172_v49 }
 0x674   :  { %v3719_v32 = vadd.f32 %v3406_v21, %v3075_v54  ;;  %3339 = vmatmul.f32.gmra.mxu0 %v3171_v58  ;;  %3452 = vmatmul.f32.gmra.mxu1 %v3172_v49  ;;  %v3085_v58 = vld [vmem:[#allocation11 + $0xd0] sm:$0xff]  ;;  %v3086_v54 = vld [vmem:[#allocation11 + $0xd8] sm:$0xff] }
 0x675   :  { %v3518_v4 = vpop.f32.mrf.mxu2 }
 0x676   :  { %v3631_v30 = vpop.f32.mrf.mxu3  ;;  %3783 = vst [vmem:[#allocation11 + $0x80] sm:$0xff] %v3719_v32 }
 0x677   :  { %v3632_v56 = vadd.f32 %v3631_v30, %v3518_v4  ;;  %v3184_v30 = vld [vmem:[#allocation6 + $0x1e8] sm:$0xff] }
 0x679   :  { %v3720_v48 = vadd.f32 %v3632_v56, %v3076_v22  ;;  %v3295_v63 = vpop.f32.mrf.mxu0  ;;  %v3408_v57 = vpop.f32.mrf.mxu1  ;;  %v3183_v22 = vld [vmem:[#allocation6 + $0x1e0] sm:$0xff] }
 0x67a   :  { %3568 = vmatmul.f32.gmra.mxu2 %v3173_v61  ;;  %v3409_v2 = vadd.f32 %v3408_v57, %v3295_v63 }
 0x67b   :  { %3784 = vst [vmem:[#allocation11 + $0x88] sm:$0xff] %v3720_v48  ;;  %3681 = vmatmul.f32.gmra.mxu3 %v3174_v62 }
 0x67c   :  { %v3721_v17 = vadd.f32 %v3409_v2, %v3077_v0  ;;  %3342 = vmatmul.f32.gmra.mxu0 %v3173_v61  ;;  %3455 = vmatmul.f32.gmra.mxu1 %v3174_v62  ;;  %v3087_v61 = vld [vmem:[#allocation11 + $0xe0] sm:$0xff]  ;;  %v3088_v0 = vld [vmem:[#allocation11 + $0xe8] sm:$0xff] }
 0x67d   :  { %v3521_v51 = vpop.f32.mrf.mxu2 }
 0x67e   :  { %v3634_v46 = vpop.f32.mrf.mxu3  ;;  %3785 = vst [vmem:[#allocation11 + $0x90] sm:$0xff] %v3721_v17 }
 0x67f   :  { %v3635_v6 = vadd.f32 %v3634_v46, %v3521_v51  ;;  %v3186_v46 = vld [vmem:[#allocation6 + $0x1f8] sm:$0xff] }
 0x681   :  { %v3722_v53 = vadd.f32 %v3635_v6, %v3078_v3  ;;  %v3298_v41 = vpop.f32.mrf.mxu0  ;;  %v3411_v9 = vpop.f32.mrf.mxu1  ;;  %v3185_v3 = vld [vmem:[#allocation6 + $0x1f0] sm:$0xff] }
 0x682   :  { %3571 = vmatmul.f32.gmra.mxu2 %v3175_v5  ;;  %v3412_v36 = vadd.f32 %v3411_v9, %v3298_v41 }
 0x683   :  { %3786 = vst [vmem:[#allocation11 + $0x98] sm:$0xff] %v3722_v53  ;;  %3684 = vmatmul.f32.gmra.mxu3 %v3176_v12 }
 0x684   :  { %v3723_v26 = vadd.f32 %v3412_v36, %v3079_v43  ;;  %3345 = vmatmul.f32.gmra.mxu0 %v3175_v5  ;;  %3458 = vmatmul.f32.gmra.mxu1 %v3176_v12  ;;  %v3089_v5 = vld [vmem:[#allocation11 + $0xf0] sm:$0xff]  ;;  %v3090_v43 = vld [vmem:[#allocation11 + $0xf8] sm:$0xff] }
 0x685   :  { %v3524_v14 = vpop.f32.mrf.mxu2 }
 0x686   :  { %v3637_v16 = vpop.f32.mrf.mxu3  ;;  %3787 = vst [vmem:[#allocation11 + $0xa0] sm:$0xff] %v3723_v26  ;;  %v3091_v26 = vld [vmem:[#allocation11 + $0x100] sm:$0xff] }
 0x687   :  { %v3638_v11 = vadd.f32 %v3637_v16, %v3524_v14 }
 0x689   :  { %v3724_v20 = vadd.f32 %v3638_v11, %v3080_v31  ;;  %v3301_v1 = vpop.f32.mrf.mxu0  ;;  %v3414_v19 = vpop.f32.mrf.mxu1 }
 0x68a   :  { %3574 = vmatmul.f32.gmra.mxu2 %v3177_v18  ;;  %v3415_v23 = vadd.f32 %v3414_v19, %v3301_v1 }
 0x68b   :  { %3788 = vst [vmem:[#allocation11 + $0xa8] sm:$0xff] %v3724_v20  ;;  %3687 = vmatmul.f32.gmra.mxu3 %v3178_v24  ;;  %v3092_v20 = vld [vmem:[#allocation11 + $0x108] sm:$0xff] }
 0x68c   :  { %v3725_v29 = vadd.f32 %v3415_v23, %v3081_v38  ;;  %3348 = vmatmul.f32.gmra.mxu0 %v3177_v18  ;;  %3461 = vmatmul.f32.gmra.mxu1 %v3178_v24 }
 0x68d   :  { %v3527_v15 = vpop.f32.mrf.mxu2 }
 0x68e   :  { %v3640_v27 = vpop.f32.mrf.mxu3  ;;  %3789 = vst [vmem:[#allocation11 + $0xb0] sm:$0xff] %v3725_v29 }
 0x68f   :  { %v3641_v10 = vadd.f32 %v3640_v27, %v3527_v15 }
 0x691   :  { %v3726_v60 = vadd.f32 %v3641_v10, %v3082_v25  ;;  %v3304_v13 = vpop.f32.mrf.mxu0  ;;  %v3417_v39 = vpop.f32.mrf.mxu1  ;;  %v3093_v25 = vld [vmem:[#allocation11 + $0x110] sm:$0xff] }
 0x692   :  { %3577 = vmatmul.f32.gmra.mxu2 %v3179_v35  ;;  %v3418_v40 = vadd.f32 %v3417_v39, %v3304_v13 }
 0x693   :  { %3790 = vst [vmem:[#allocation11 + $0xb8] sm:$0xff] %v3726_v60  ;;  %3690 = vmatmul.f32.gmra.mxu3 %v3180_v33 }
 0x694   :  { %v3727_v8 = vadd.f32 %v3418_v40, %v3083_v37  ;;  %3351 = vmatmul.f32.gmra.mxu0 %v3179_v35  ;;  %3464 = vmatmul.f32.gmra.mxu1 %v3180_v33  ;;  %v3094_v35 = vld [vmem:[#allocation11 + $0x118] sm:$0xff]  ;;  %v3095_v40 = vld [vmem:[#allocation11 + $0x120] sm:$0xff] }
 0x695   :  { %v3530_v42 = vpop.f32.mrf.mxu2 }
 0x696   :  { %v3643_v7 = vpop.f32.mrf.mxu3  ;;  %3791 = vst [vmem:[#allocation11 + $0xc0] sm:$0xff] %v3727_v8  ;;  %v3096_v8 = vld [vmem:[#allocation11 + $0x128] sm:$0xff] }
 0x697   :  { %v3644_v34 = vadd.f32 %v3643_v7, %v3530_v42 }
 0x699   :  { %v3728_v47 = vadd.f32 %v3644_v34, %v3084_v44  ;;  %v3307_v28 = vpop.f32.mrf.mxu0  ;;  %v3420_v49 = vpop.f32.mrf.mxu1 }
 0x69a   :  { %3580 = vmatmul.f32.gmra.mxu2 %v3181_v45  ;;  %v3421_v50 = vadd.f32 %v3420_v49, %v3307_v28 }
 0x69b   :  { %3792 = vst [vmem:[#allocation11 + $0xc8] sm:$0xff] %v3728_v47  ;;  %3693 = vmatmul.f32.gmra.mxu3 %v3182_v55 }
 0x69c   :  { %v3729_v21 = vadd.f32 %v3421_v50, %v3085_v58  ;;  %3354 = vmatmul.f32.gmra.mxu0 %v3181_v45  ;;  %3467 = vmatmul.f32.gmra.mxu1 %v3182_v55  ;;  %v3097_v58 = vld [vmem:[#allocation11 + $0x130] sm:$0xff] }
 0x69d   :  { %v3533_v52 = vpop.f32.mrf.mxu2 }
 0x69e   :  { %v3646_v59 = vpop.f32.mrf.mxu3  ;;  %3793 = vst [vmem:[#allocation11 + $0xd0] sm:$0xff] %v3729_v21 }
 0x69f   :  { %v3647_v4 = vadd.f32 %v3646_v59, %v3533_v52 }
 0x6a1   :  { %v3730_v32 = vadd.f32 %v3647_v4, %v3086_v54  ;;  %v3310_v56 = vpop.f32.mrf.mxu0  ;;  %v3423_v62 = vpop.f32.mrf.mxu1  ;;  %v3098_v54 = vld [vmem:[#allocation11 + $0x138] sm:$0xff] }
 0x6a2   :  { %3583 = vmatmul.f32.gmra.mxu2 %v3183_v22  ;;  %v3424_v48 = vadd.f32 %v3423_v62, %v3310_v56 }
 0x6a3   :  { %3794 = vst [vmem:[#allocation11 + $0xd8] sm:$0xff] %v3730_v32  ;;  %3696 = vmatmul.f32.gmra.mxu3 %v3184_v30  ;;  %v3099_v32 = vld [vmem:[#allocation11 + $0x140] sm:$0xff] }
 0x6a4   :  { %v3731_v2 = vadd.f32 %v3424_v48, %v3087_v61  ;;  %3357 = vmatmul.f32.gmra.mxu0 %v3183_v22  ;;  %3470 = vmatmul.f32.gmra.mxu1 %v3184_v30  ;;  %v3100_v48 = vld [vmem:[#allocation11 + $0x148] sm:$0xff] }
 0x6a5   :  { %v3536_v63 = vpop.f32.mrf.mxu2 }
 0x6a6   :  { %v3649_v57 = vpop.f32.mrf.mxu3  ;;  %3795 = vst [vmem:[#allocation11 + $0xe0] sm:$0xff] %v3731_v2 }
 0x6a7   :  { %v3650_v51 = vadd.f32 %v3649_v57, %v3536_v63 }
 0x6a9   :  { %v3732_v17 = vadd.f32 %v3650_v51, %v3088_v0  ;;  %v3313_v6 = vpop.f32.mrf.mxu0  ;;  %v3426_v12 = vpop.f32.mrf.mxu1 }
 0x6aa   :  { %3586 = vmatmul.f32.gmra.mxu2 %v3185_v3  ;;  %v3427_v53 = vadd.f32 %v3426_v12, %v3313_v6 }
 0x6ab   :  { %3796 = vst [vmem:[#allocation11 + $0xe8] sm:$0xff] %v3732_v17  ;;  %3699 = vmatmul.f32.gmra.mxu3 %v3186_v46 }
 0x6ac   :  { %v3733_v36 = vadd.f32 %v3427_v53, %v3089_v5  ;;  %3360 = vmatmul.f32.gmra.mxu0 %v3185_v3  ;;  %3473 = vmatmul.f32.gmra.mxu1 %v3186_v46  ;;  %v3101_v3 = vld [vmem:[#allocation11 + $0x150] sm:$0xff]  ;;  %v3102_v5 = vld [vmem:[#allocation11 + $0x158] sm:$0xff] }
 0x6ad   :  { %v3539_v41 = vpop.f32.mrf.mxu2 }
 0x6ae   :  { %v3652_v9 = vpop.f32.mrf.mxu3  ;;  %3797 = vst [vmem:[#allocation11 + $0xf0] sm:$0xff] %v3733_v36  ;;  %v3103_v36 = vld [vmem:[#allocation11 + $0x160] sm:$0xff] }
 0x6af   :  { %v3653_v14 = vadd.f32 %v3652_v9, %v3539_v41 }
 0x6b1   :  { %v3734_v31 = vadd.f32 %v3653_v14, %v3090_v43  ;;  %v3316_v16 = vpop.f32.mrf.mxu0  ;;  %v3429_v11 = vpop.f32.mrf.mxu1 }
 0x6b2   :  { %v3430_v18 = vadd.f32 %v3429_v11, %v3316_v16 }
 0x6b3   :  { %3798 = vst [vmem:[#allocation11 + $0xf8] sm:$0xff] %v3734_v31 }
 0x6b4   :  { %v3735_v38 = vadd.f32 %v3430_v18, %v3091_v26  ;;  %v3104_v26 = vld [vmem:[#allocation11 + $0x168] sm:$0xff] }
 0x6b5   :  { %v3542_v24 = vpop.f32.mrf.mxu2 }
 0x6b6   :  { %v3655_v1 = vpop.f32.mrf.mxu3  ;;  %3799 = vst [vmem:[#allocation11 + $0x100] sm:$0xff] %v3735_v38  ;;  %v3105_v38 = vld [vmem:[#allocation11 + $0x170] sm:$0xff] }
 0x6b7   :  { %v3656_v19 = vadd.f32 %v3655_v1, %v3542_v24 }
 0x6b9   :  { %v3736_v23 = vadd.f32 %v3656_v19, %v3092_v20  ;;  %v3319_v15 = vpop.f32.mrf.mxu0  ;;  %v3432_v27 = vpop.f32.mrf.mxu1 }
 0x6ba   :  { %v3433_v29 = vadd.f32 %v3432_v27, %v3319_v15 }
 0x6bb   :  { %3800 = vst [vmem:[#allocation11 + $0x108] sm:$0xff] %v3736_v23 }
 0x6bc   :  { %v3737_v60 = vadd.f32 %v3433_v29, %v3093_v25  ;;  %v3106_v25 = vld [vmem:[#allocation11 + $0x178] sm:$0xff] }
 0x6bd   :  { %v3545_v10 = vpop.f32.mrf.mxu2 }
 0x6be   :  { %v3658_v33 = vpop.f32.mrf.mxu3  ;;  %3801 = vst [vmem:[#allocation11 + $0x110] sm:$0xff] %v3737_v60  ;;  %v3107_v60 = vld [vmem:[#allocation11 + $0x180] sm:$0xff] }
 0x6bf   :  { %v3659_v13 = vadd.f32 %v3658_v33, %v3545_v10 }
 0x6c1   :  { %v3738_v37 = vadd.f32 %v3659_v13, %v3094_v35  ;;  %v3322_v39 = vpop.f32.mrf.mxu0  ;;  %v3435_v42 = vpop.f32.mrf.mxu1 }
 0x6c2   :  { %v3436_v44 = vadd.f32 %v3435_v42, %v3322_v39 }
 0x6c3   :  { %3802 = vst [vmem:[#allocation11 + $0x118] sm:$0xff] %v3738_v37 }
 0x6c4   :  { %v3739_v45 = vadd.f32 %v3436_v44, %v3095_v40  ;;  %v3108_v40 = vld [vmem:[#allocation11 + $0x188] sm:$0xff] }
 0x6c5   :  { %v3548_v7 = vpop.f32.mrf.mxu2 }
 0x6c6   :  { %v3661_v34 = vpop.f32.mrf.mxu3  ;;  %3803 = vst [vmem:[#allocation11 + $0x120] sm:$0xff] %v3739_v45  ;;  %v3109_v45 = vld [vmem:[#allocation11 + $0x190] sm:$0xff] }
 0x6c7   :  { %v3662_v55 = vadd.f32 %v3661_v34, %v3548_v7 }
 0x6c9   :  { %v3740_v47 = vadd.f32 %v3662_v55, %v3096_v8  ;;  %v3325_v28 = vpop.f32.mrf.mxu0  ;;  %v3438_v49 = vpop.f32.mrf.mxu1 }
 0x6ca   :  { %v3439_v50 = vadd.f32 %v3438_v49, %v3325_v28 }
 0x6cb   :  { %3804 = vst [vmem:[#allocation11 + $0x128] sm:$0xff] %v3740_v47 }
 0x6cc   :  { %v3741_v21 = vadd.f32 %v3439_v50, %v3097_v58  ;;  %v3110_v58 = vld [vmem:[#allocation11 + $0x198] sm:$0xff] }
 0x6cd   :  { %v3551_v52 = vpop.f32.mrf.mxu2 }
 0x6ce   :  { %v3664_v59 = vpop.f32.mrf.mxu3  ;;  %3805 = vst [vmem:[#allocation11 + $0x130] sm:$0xff] %v3741_v21  ;;  %v3111_v21 = vld [vmem:[#allocation11 + $0x1a0] sm:$0xff] }
 0x6cf   :  { %v3665_v4 = vadd.f32 %v3664_v59, %v3551_v52 }
 0x6d1   :  { %v3742_v22 = vadd.f32 %v3665_v4, %v3098_v54  ;;  %v3328_v30 = vpop.f32.mrf.mxu0  ;;  %v3441_v56 = vpop.f32.mrf.mxu1 }
 0x6d2   :  { %v3442_v61 = vadd.f32 %v3441_v56, %v3328_v30 }
 0x6d3   :  { %3806 = vst [vmem:[#allocation11 + $0x138] sm:$0xff] %v3742_v22 }
 0x6d4   :  { %v3743_v0 = vadd.f32 %v3442_v61, %v3099_v32  ;;  %v3112_v32 = vld [vmem:[#allocation11 + $0x1a8] sm:$0xff] }
 0x6d5   :  { %v3554_v62 = vpop.f32.mrf.mxu2 }
 0x6d6   :  { %v3667_v63 = vpop.f32.mrf.mxu3  ;;  %3807 = vst [vmem:[#allocation11 + $0x140] sm:$0xff] %v3743_v0  ;;  %v3113_v0 = vld [vmem:[#allocation11 + $0x1b0] sm:$0xff] }
 0x6d7   :  { %v3668_v57 = vadd.f32 %v3667_v63, %v3554_v62 }
 0x6d9   :  { %v3744_v2 = vadd.f32 %v3668_v57, %v3100_v48  ;;  %v3331_v51 = vpop.f32.mrf.mxu0  ;;  %v3444_v46 = vpop.f32.mrf.mxu1 }
 0x6da   :  { %v3445_v17 = vadd.f32 %v3444_v46, %v3331_v51 }
 0x6db   :  { %3808 = vst [vmem:[#allocation11 + $0x148] sm:$0xff] %v3744_v2 }
 0x6dc   :  { %v3745_v53 = vadd.f32 %v3445_v17, %v3101_v3  ;;  %v3114_v3 = vld [vmem:[#allocation11 + $0x1b8] sm:$0xff] }
 0x6dd   :  { %v3557_v6 = vpop.f32.mrf.mxu2 }
 0x6de   :  { %v3670_v12 = vpop.f32.mrf.mxu3  ;;  %3809 = vst [vmem:[#allocation11 + $0x150] sm:$0xff] %v3745_v53  ;;  %v3115_v53 = vld [vmem:[#allocation11 + $0x1c0] sm:$0xff] }
 0x6df   :  { %v3671_v41 = vadd.f32 %v3670_v12, %v3557_v6 }
 0x6e1   :  { %v3746_v43 = vadd.f32 %v3671_v41, %v3102_v5  ;;  %v3334_v9 = vpop.f32.mrf.mxu0  ;;  %v3447_v14 = vpop.f32.mrf.mxu1 }
 0x6e2   :  { %v3448_v31 = vadd.f32 %v3447_v14, %v3334_v9 }
 0x6e3   :  { %3810 = vst [vmem:[#allocation11 + $0x158] sm:$0xff] %v3746_v43 }
 0x6e4   :  { %v3747_v18 = vadd.f32 %v3448_v31, %v3103_v36  ;;  %v3116_v36 = vld [vmem:[#allocation11 + $0x1c8] sm:$0xff] }
 0x6e5   :  { %v3560_v16 = vpop.f32.mrf.mxu2 }
 0x6e6   :  { %v3673_v11 = vpop.f32.mrf.mxu3  ;;  %3811 = vst [vmem:[#allocation11 + $0x160] sm:$0xff] %v3747_v18  ;;  %v3117_v18 = vld [vmem:[#allocation11 + $0x1d0] sm:$0xff] }
 0x6e7   :  { %v3674_v24 = vadd.f32 %v3673_v11, %v3560_v16 }
 0x6e9   :  { %v3748_v20 = vadd.f32 %v3674_v24, %v3104_v26  ;;  %v3337_v1 = vpop.f32.mrf.mxu0  ;;  %v3450_v19 = vpop.f32.mrf.mxu1 }
 0x6ea   :  { %v3451_v23 = vadd.f32 %v3450_v19, %v3337_v1 }
 0x6eb   :  { %3812 = vst [vmem:[#allocation11 + $0x168] sm:$0xff] %v3748_v20 }
 0x6ec   :  { %v3749_v29 = vadd.f32 %v3451_v23, %v3105_v38  ;;  %v3118_v38 = vld [vmem:[#allocation11 + $0x1d8] sm:$0xff] }
 0x6ed   :  { %v3563_v15 = vpop.f32.mrf.mxu2 }
 0x6ee   :  { %v3676_v27 = vpop.f32.mrf.mxu3  ;;  %3813 = vst [vmem:[#allocation11 + $0x170] sm:$0xff] %v3749_v29  ;;  %v3119_v29 = vld [vmem:[#allocation11 + $0x1e0] sm:$0xff] }
 0x6ef   :  { %v3677_v10 = vadd.f32 %v3676_v27, %v3563_v15 }
 0x6f1   :  { %v3750_v35 = vadd.f32 %v3677_v10, %v3106_v25  ;;  %v3340_v33 = vpop.f32.mrf.mxu0  ;;  %v3453_v13 = vpop.f32.mrf.mxu1 }
 0x6f2   :  { %v3454_v37 = vadd.f32 %v3453_v13, %v3340_v33 }
 0x6f3   :  { %3814 = vst [vmem:[#allocation11 + $0x178] sm:$0xff] %v3750_v35 }
 0x6f4   :  { %v3751_v44 = vadd.f32 %v3454_v37, %v3107_v60  ;;  %v3120_v60 = vld [vmem:[#allocation11 + $0x1e8] sm:$0xff] }
 0x6f5   :  { %v3566_v39 = vpop.f32.mrf.mxu2 }
 0x6f6   :  { %v3679_v42 = vpop.f32.mrf.mxu3  ;;  %3815 = vst [vmem:[#allocation11 + $0x180] sm:$0xff] %v3751_v44  ;;  %v3121_v44 = vld [vmem:[#allocation11 + $0x1f0] sm:$0xff] }
 0x6f7   :  { %v3680_v7 = vadd.f32 %v3679_v42, %v3566_v39 }
 0x6f9   :  { %v3752_v8 = vadd.f32 %v3680_v7, %v3108_v40  ;;  %v3343_v34 = vpop.f32.mrf.mxu0  ;;  %v3456_v55 = vpop.f32.mrf.mxu1 }
 0x6fa   :  { %v3457_v47 = vadd.f32 %v3456_v55, %v3343_v34 }
 0x6fb   :  { %3816 = vst [vmem:[#allocation11 + $0x188] sm:$0xff] %v3752_v8 }
 0x6fc   :  { %v3753_v50 = vadd.f32 %v3457_v47, %v3109_v45  ;;  %v3122_v45 = vld [vmem:[#allocation11 + $0x1f8] sm:$0xff] }
 0x6fd   :  { %v3569_v28 = vpop.f32.mrf.mxu2 }
 0x6fe   :  { %v3682_v49 = vpop.f32.mrf.mxu3  ;;  %3817 = vst [vmem:[#allocation11 + $0x190] sm:$0xff] %v3753_v50 }
 0x6ff   :  { %v3683_v52 = vadd.f32 %v3682_v49, %v3569_v28 }
 0x701   :  { %v3754_v54 = vadd.f32 %v3683_v52, %v3110_v58  ;;  %v3346_v59 = vpop.f32.mrf.mxu0  ;;  %v3459_v4 = vpop.f32.mrf.mxu1 }
 0x702   :  { %v3460_v22 = vadd.f32 %v3459_v4, %v3346_v59 }
 0x703   :  { %3818 = vst [vmem:[#allocation11 + $0x198] sm:$0xff] %v3754_v54 }
 0x704   :  { %v3755_v61 = vadd.f32 %v3460_v22, %v3111_v21 }
 0x705   :  { %v3572_v30 = vpop.f32.mrf.mxu2 }
 0x706   :  { %v3685_v56 = vpop.f32.mrf.mxu3  ;;  %3819 = vst [vmem:[#allocation11 + $0x1a0] sm:$0xff] %v3755_v61 }
 0x707   :  { %v3686_v62 = vadd.f32 %v3685_v56, %v3572_v30 }
 0x709   :  { %v3756_v48 = vadd.f32 %v3686_v62, %v3112_v32  ;;  %v3349_v63 = vpop.f32.mrf.mxu0  ;;  %v3462_v57 = vpop.f32.mrf.mxu1 }
 0x70a   :  { %v3463_v2 = vadd.f32 %v3462_v57, %v3349_v63 }
 0x70b   :  { %3820 = vst [vmem:[#allocation11 + $0x1a8] sm:$0xff] %v3756_v48 }
 0x70c   :  { %v3757_v17 = vadd.f32 %v3463_v2, %v3113_v0 }
 0x70d   :  { %v3575_v51 = vpop.f32.mrf.mxu2 }
 0x70e   :  { %v3688_v46 = vpop.f32.mrf.mxu3  ;;  %3821 = vst [vmem:[#allocation11 + $0x1b0] sm:$0xff] %v3757_v17 }
 0x70f   :  { %v3689_v6 = vadd.f32 %v3688_v46, %v3575_v51 }
 0x711   :  { %v3758_v5 = vadd.f32 %v3689_v6, %v3114_v3  ;;  %v3352_v12 = vpop.f32.mrf.mxu0  ;;  %v3465_v41 = vpop.f32.mrf.mxu1 }
 0x712   :  { %v3466_v43 = vadd.f32 %v3465_v41, %v3352_v12 }
 0x713   :  { %3822 = vst [vmem:[#allocation11 + $0x1b8] sm:$0xff] %v3758_v5 }
 0x714   :  { %v3759_v31 = vadd.f32 %v3466_v43, %v3115_v53 }
 0x715   :  { %v3578_v9 = vpop.f32.mrf.mxu2 }
 0x716   :  { %v3691_v14 = vpop.f32.mrf.mxu3  ;;  %3823 = vst [vmem:[#allocation11 + $0x1c0] sm:$0xff] %v3759_v31 }
 0x717   :  { %v3692_v16 = vadd.f32 %v3691_v14, %v3578_v9 }
 0x719   :  { %v3760_v26 = vadd.f32 %v3692_v16, %v3116_v36  ;;  %v3355_v11 = vpop.f32.mrf.mxu0  ;;  %v3468_v24 = vpop.f32.mrf.mxu1 }
 0x71a   :  { %v3469_v20 = vadd.f32 %v3468_v24, %v3355_v11 }
 0x71b   :  { %3824 = vst [vmem:[#allocation11 + $0x1c8] sm:$0xff] %v3760_v26 }
 0x71c   :  { %v3761_v23 = vadd.f32 %v3469_v20, %v3117_v18 }
 0x71d   :  { %v3581_v1 = vpop.f32.mrf.mxu2 }
 0x71e   :  { %v3694_v19 = vpop.f32.mrf.mxu3  ;;  %3825 = vst [vmem:[#allocation11 + $0x1d0] sm:$0xff] %v3761_v23 }
 0x71f   :  { %v3695_v15 = vadd.f32 %v3694_v19, %v3581_v1 }
 0x721   :  { %v3762_v25 = vadd.f32 %v3695_v15, %v3118_v38  ;;  %v3358_v27 = vpop.f32.mrf.mxu0  ;;  %v3471_v10 = vpop.f32.mrf.mxu1 }
 0x722   :  { %v3472_v35 = vadd.f32 %v3471_v10, %v3358_v27 }
 0x723   :  { %3826 = vst [vmem:[#allocation11 + $0x1d8] sm:$0xff] %v3762_v25 }
 0x724   :  { %v3763_v37 = vadd.f32 %v3472_v35, %v3119_v29 }
 0x725   :  { %v3584_v33 = vpop.f32.mrf.mxu2 }
 0x726   :  { %v3697_v13 = vpop.f32.mrf.mxu3  ;;  %3827 = vst [vmem:[#allocation11 + $0x1e0] sm:$0xff] %v3763_v37 }
 0x727   :  { %v3698_v39 = vadd.f32 %v3697_v13, %v3584_v33 }
 0x729   :  { %v3764_v40 = vadd.f32 %v3698_v39, %v3120_v60  ;;  %v3361_v42 = vpop.f32.mrf.mxu0  ;;  %v3474_v7 = vpop.f32.mrf.mxu1 }
 0x72a   :  { %v3475_v8 = vadd.f32 %v3474_v7, %v3361_v42 }
 0x72b   :  { %3828 = vst [vmem:[#allocation11 + $0x1e8] sm:$0xff] %v3764_v40 }
 0x72c   :  { %v3765_v47 = vadd.f32 %v3475_v8, %v3121_v44 }
 0x72d   :  { %v3587_v34 = vpop.f32.mrf.mxu2 }
 0x72e   :  { %v3700_v55 = vpop.f32.mrf.mxu3  ;;  %3829 = vst [vmem:[#allocation11 + $0x1f0] sm:$0xff] %v3765_v47 }
 0x72f   :  { %v3701_v28 = vadd.f32 %v3700_v55, %v3587_v34 }
 0x731   :  { %v3766_v58 = vadd.f32 %v3701_v28, %v3122_v45 }
 0x733   :  { %3830 = vst [vmem:[#allocation11 + $0x1f8] sm:$0xff] %v3766_v58 }
 0x734 PF:  { %s3834_s2 = sld [smem:[#allocation3]]  ;;  %s4178_s17 = smov [#allocation11]  }
 0x735   :  { %s3835_s11 = sld [smem:[#allocation4]]  ;;  %s3844_s18 = sshll.u32 %s4178_s17, 4  ;;  %s3845_s18 = int_to_ptr.vmem [resolvable:$true] %s3844_s18 }
 0x736   :  { %s4156_s3 = scalar_lea.hbm %s5174_s5, 512 }
 0x73a   :  { %s4082_s14 = sshll.u32 %s3834_s2, 6 }
 0x73b   :  { %s4077_s16 = sshll.u32 %s3835_s11, 1 }
 0x73c   :  { %s3841_s19 = sadd.s32 %s4082_s14, %s4077_s16 }
 0x73d   :  { %s4079_s20 = sshll.u32 %s3841_s19, 3 }
 0x73e   :  { %s3843_s25 = scalar_lea.hbm %s5174_s5, %s4079_s20 }
 0x73f   :  { %s3846_s26 = sshll.u32 %s3843_s25, 4  ;;  %s3847_s26 = int_to_ptr.hbm [resolvable:$true] %s3846_s26 }
 0x740   :  { %s4152_s27 = sshra.s32 %s3847_s26, 4  ;;  %s4153_s27 = int_to_ptr.hbm [resolvable:$true] %s4152_s27 }
 0x741   :  { %s4154_s0 = scalar_lea.hbm %s4153_s27, 512  ;;  %p4157_p11 = scmp.lt.s32.totalorder %s4153_s27, %s5174_s5 }
 0x742   :  { %p4155_p10 = scmp.ne.s32.totalorder %s4153_s27, %s4154_s0  ;;  %p4158_p12 = scmp.lt.s32.totalorder %s4156_s3, %s4154_s0 }
 0x744   :  { %p4159_p13 = por %p4158_p12, %p4157_p11 }
 0x746   :  { %p4160_p0 = pnand %p4159_p13, %p4155_p10 }
 0x748   :  { %4163 = shalt.err (!%p4160_p0)
}
 0x749   :  { %3852 = dma.vmem_to_hbm [thread:$0]  %s3845_s18, 8192, %s3847_s26, [#allocation8], %s4172_s23, %s4172_s23, %s4173_s24  }
 0x74a   :  { %4168 = dma.done.wait [#allocation8], 8192  }
 0x74b   :  { %4169 = vsyncadd [#allocation8], 4294959104 }
 0x74c   :  { %3857 = vsyncpa [#allocation7], 1 }
 0x74d   :  { %3858 = vsyncpa [#allocation10], 1 }
 0x74e   :  { %3859 = vsyncpa [#allocation8], 1 }

</bundles_post_ra>
